<compile_context>
chip_gen: v7x
topology: tpu7x:2x2x1
jax: 0.10.0
libtpu: 0.0.40
codegen_flags: <defaults>
</compile_context>

<pallas_src>
import math

import jax
import jax.numpy as jnp
from jax.experimental import pallas as pl
from jax.experimental.pallas import tpu as pltpu


_VMEM_LIMIT = 32 * 1024 * 1024  # explicit scoped-VMEM budget (fits v5e/v6e/v7x)


def _tile(n, target):
    """Largest divisor of n that is <= target (grid tiling helper)."""
    return max(math.gcd(n, target), 1)


# ----------------------------------------------------------------------------
# Kernel 1: 1x1 conv == row-tiled matmul  [M, Cin] @ [Cin, D] + bias
# ----------------------------------------------------------------------------
def _conv1x1_kernel(x_ref, w_ref, b_ref, o_ref):
    acc = jnp.dot(x_ref[...], w_ref[...], preferred_element_type=jnp.float32)
    o_ref[...] = (acc + b_ref[...]).astype(o_ref.dtype)


def conv1x1_pallas(x_flat, w, b, *, tm=512, out_dtype=jnp.bfloat16):
    """x_flat: [M, Cin] bf16, w: [Cin, D] bf16, b: [D] f32 -> [M, D] out_dtype."""
    M, Cin = x_flat.shape
    Cin2, D = w.shape
    assert Cin == Cin2
    tm = _tile(M, tm)
    return pl.pallas_call(
        _conv1x1_kernel,
        out_shape=jax.ShapeDtypeStruct((M, D), out_dtype),
        grid=(M // tm,),
        in_specs=[
            pl.BlockSpec((tm, Cin), lambda i: (i, 0)),
            pl.BlockSpec((Cin, D), lambda i: (0, 0)),   # resident weights
            pl.BlockSpec((1, D), lambda i: (0, 0)),     # resident bias
        ],
        out_specs=pl.BlockSpec((tm, D), lambda i: (i, 0)),
        compiler_params=pltpu.CompilerParams(
            dimension_semantics=("parallel",),
            vmem_limit_bytes=_VMEM_LIMIT,
        ),
    )(x_flat, w, b.reshape(1, D))


# ----------------------------------------------------------------------------
# Kernel 2: 3x3 conv (padding=1) on an NHWC tensor, row-band tiled with halo views
# ----------------------------------------------------------------------------
def _make_conv3x3_kernel(TH, W):
    def kernel(top_ref, mid_ref, bot_ref, w3_ref, b3_ref, o_ref):
        D = o_ref.shape[-1]
        # Assemble the (TH + 2, Wp, D) halo slab in f32 (clean sublane layouts).
        top = top_ref[0].astype(jnp.float32)      # (1,  Wp, D)
        mid = mid_ref[0].astype(jnp.float32)      # (TH, Wp, D)
        bot = bot_ref[0].astype(jnp.float32)      # (1,  Wp, D)
        slab = jnp.concatenate([top, mid, bot], axis=0)

        # Three W-shifted views of the slab (hoisted; shared across the 3 row taps).
        cols = [slab[:, kx:kx + W, :] for kx in range(3)]      # each (TH+2, W, D)

        acc = None
        for ky in range(3):
            for kx in range(3):
                patch = cols[kx][ky:ky + TH]                   # (TH, W, D) f32
                p2 = patch.reshape(TH * W, D).astype(jnp.bfloat16)
                t = jnp.dot(p2, w3_ref[3 * ky + kx],
                            preferred_element_type=jnp.float32)
                acc = t if acc is None else acc + t
        out = acc + b3_ref[...]                                # (TH*W, D) + (1, D)
        o_ref[...] = out.reshape(o_ref.shape).astype(o_ref.dtype)
    return kernel


def conv3x3_pallas(y_nhwc, w3, b3, *, th=8, out_dtype=jnp.float32):
    """3x3 conv, padding=1.  y_nhwc: [B,H,W,D] bf16; w3: [9, D, D] (tap = 3*ky+kx,
    laid out [Cin, Cout]); b3: [D] f32."""
    B, H, W, D = y_nhwc.shape
    assert W % 8 == 0, "W must be a multiple of 8 (sublane tiling of the row slab)"
    TH = _tile(H, th)
    ntiles = H // TH
    Wp = W + 2
    # Zero-pad: TH rows top/bottom keep the centre view block-aligned; 1-col W halo.
    # (Padding is applied to the conv_1x1 OUTPUT, matching PyTorch's padding=1.)
    yp = jnp.pad(y_nhwc, ((0, 0), (TH, TH), (1, 1), (0, 0)))

    kernel = _make_conv3x3_kernel(TH, W)
    return pl.pallas_call(
        kernel,
        out_shape=jax.ShapeDtypeStruct((B, H, W, D), out_dtype),
        grid=(B, ntiles),
        in_specs=[
            # three views of the same padded tensor: top halo row / centre band / bottom halo row
            pl.BlockSpec((1, 1, Wp, D), lambda b, i: (b, (i + 1) * TH - 1, 0, 0)),
            pl.BlockSpec((1, TH, Wp, D), lambda b, i: (b, i + 1, 0, 0)),
            pl.BlockSpec((1, 1, Wp, D), lambda b, i: (b, (i + 2) * TH, 0, 0)),
            pl.BlockSpec((9, D, D), lambda b, i: (0, 0, 0)),   # resident weights
            pl.BlockSpec((1, D), lambda b, i: (0, 0)),         # resident bias
        ],
        out_specs=pl.BlockSpec((1, TH, W, D), lambda b, i: (b, i, 0, 0)),
        compiler_params=pltpu.CompilerParams(
            dimension_semantics=("parallel", "parallel"),
            vmem_limit_bytes=_VMEM_LIMIT,
        ),
    )(yp, yp, yp, w3, b3.reshape(1, D))


# ----------------------------------------------------------------------------
# Level-0 neck path (conv_1x1 -> conv_3x3), jitted so boundary layout ops fuse
# ----------------------------------------------------------------------------
@jax.jit
def _neck_level0_forward(x_nchw, w1, b1, w3, b3):
    B, Cin, H, W = x_nchw.shape
    D = w1.shape[1]
    # NCHW -> NHWC at the interface boundary (fused into this jit region).
    x_flat = jnp.transpose(x_nchw, (0, 2, 3, 1)).reshape(B * H * W, Cin)
    x_flat = x_flat.astype(jnp.bfloat16)                   # bf16 operands, f32 accum
    y = conv1x1_pallas(x_flat, w1, b1).reshape(B, H, W, D)  # bf16 intermediate
    z = conv3x3_pallas(y, w3, b3)                            # f32 NHWC
    return jnp.transpose(z, (0, 3, 1, 2))                    # back to NCHW


# ----------------------------------------------------------------------------
# Position encoding (shape-only; plain JAX, constant-folds -- not a Pallas hot path)
# ----------------------------------------------------------------------------
class PositionEmbeddingSine:
    def __init__(self, num_pos_feats, temperature=10000.0, normalize=True, scale=None):
        assert num_pos_feats % 2 == 0
        self.num_pos_feats = num_pos_feats
        self.temperature = temperature
        self.normalize = normalize
        self.scale = 2.0 * math.pi if scale is None else scale

    def __call__(self, x_nchw):
        B, _, H, W = x_nchw.shape
        npf = self.num_pos_feats // 2
        eps = 1e-6
        y_embed = jnp.broadcast_to(jnp.arange(1, H + 1, dtype=jnp.float32)[:, None], (H, W))
        x_embed = jnp.broadcast_to(jnp.arange(1, W + 1, dtype=jnp.float32)[None, :], (H, W))
        if self.normalize:
            y_embed = y_embed / (H + eps) * self.scale
            x_embed = x_embed / (W + eps) * self.scale
        dim_t = jnp.arange(npf, dtype=jnp.float32)
        dim_t = self.temperature ** (2.0 * jnp.floor(dim_t / 2.0) / npf)
        pos_x = x_embed[:, :, None] / dim_t
        pos_y = y_embed[:, :, None] / dim_t
        pos_x = jnp.stack([jnp.sin(pos_x[:, :, 0::2]), jnp.cos(pos_x[:, :, 1::2])],
                          axis=3).reshape(H, W, npf)
        pos_y = jnp.stack([jnp.sin(pos_y[:, :, 0::2]), jnp.cos(pos_y[:, :, 1::2])],
                          axis=3).reshape(H, W, npf)
        pos = jnp.concatenate([pos_y, pos_x], axis=2)        # [H, W, num_pos_feats]
        pos = jnp.transpose(pos, (2, 0, 1))
        return jnp.broadcast_to(pos[None], (B, self.num_pos_feats, H, W))


# ----------------------------------------------------------------------------
# ViTDetNeck (Pallas port, neck_norm=None path)
# ----------------------------------------------------------------------------
class ViTDetNeck:
    def __init__(self, position_encoding, d_model, backbone_channel_list,
                 kernel_size=1, stride=1, padding=0, neck_norm=None, *, key):
        # TODO(synk): neck_norm (LayerNorm2d) variant not implemented; reference default is None.
        assert neck_norm is None
        self.backbone_channel_list = list(backbone_channel_list)
        self.position_encoding = position_encoding
        self.d_model = d_model
        D = d_model
        self.conv1_w, self.conv1_b, self.conv3_w, self.conv3_b = [], [], [], []
        keys = jax.random.split(key, 4 * max(1, len(self.backbone_channel_list)))
        for lvl, dim in enumerate(self.backbone_channel_list):
            kw1, kb1, kw3, kb3 = keys[4 * lvl: 4 * lvl + 4]
            s1 = 1.0 / math.sqrt(dim)
            s3 = 1.0 / math.sqrt(9 * D)
            # conv_1x1 weight laid out [Cin, D] (== torch weight[o, c, 0, 0].T)
            w1 = jax.random.normal(kw1, (dim, D), jnp.float32) * s1
            b1 = jax.random.uniform(kb1, (D,), jnp.float32, -s1, s1)
            # conv_3x3 weight laid out [tap = 3*ky + kx, Cin, Cout]
            w3 = jax.random.normal(kw3, (9, D, D), jnp.float32) * s3
            b3 = jax.random.uniform(kb3, (D,), jnp.float32, -s3, s3)
            self.conv1_w.append(w1.astype(jnp.bfloat16))   # bf16-resident weights
            self.conv1_b.append(b1)
            self.conv3_w.append(w3.astype(jnp.bfloat16))
            self.conv3_b.append(b3)

    def __call__(self, xs, debug_name=None):
        return self.forward(xs, debug_name=debug_name)

    def forward(self, xs, debug_name=None):
        # TODO(synk): sam2.debug_utils capture hooks omitted (side-effect logging only).
        n = len(self.backbone_channel_list)
        assert len(xs) == n
        out = [None] * n
        pos = [None] * n
        x = xs[0]
        x_out = _neck_level0_forward(x, self.conv1_w[0], self.conv1_b[0],
                                     self.conv3_w[0], self.conv3_b[0])
        out[0] = x_out
        pos[0] = self.position_encoding(x_out).astype(x_out.dtype)
        return out, pos


# ----------------------------------------------------------------------------
# Plain-JAX reference (same bf16-rounded operands, f32 math) for a sanity check
# ----------------------------------------------------------------------------
def _reference_neck_level0(x_nchw, w1, b1, w3, b3):
    B, Cin, H, W = x_nchw.shape
    hi = jax.lax.Precision.HIGHEST
    xf = jnp.transpose(x_nchw, (0, 2, 3, 1)).astype(jnp.bfloat16).astype(jnp.float32)
    w1f = w1.astype(jnp.float32)
    w3f = w3.astype(jnp.float32)
    y = jnp.einsum('bhwc,cd->bhwd', xf, w1f, precision=hi) + b1
    y = y.astype(jnp.bfloat16).astype(jnp.float32)   # kernel stores the 1x1 output in bf16
    yp = jnp.pad(y, ((0, 0), (1, 1), (1, 1), (0, 0)))
    z = 0.0
    for ky in range(3):
        for kx in range(3):
            z = z + jnp.einsum('bhwc,cd->bhwd', yp[:, ky:ky + H, kx:kx + W, :],
                               w3f[3 * ky + kx], precision=hi)
    z = z + b3
    return jnp.transpose(z, (0, 3, 1, 2))


# ----------------------------------------------------------------------------

if __name__ == "__main__":
    key = jax.random.PRNGKey(0)
    k0, k1, kn = jax.random.split(key, 3)

    # small but lane-dense shapes (channels / d_model multiples of 128)
    B, d_model = 2, 256
    backbone_channel_list = [256, 256]
    xs = [
        jax.random.normal(k0, (B, backbone_channel_list[0], 32, 32), jnp.float32),
        jax.random.normal(k1, (B, backbone_channel_list[1], 16, 16), jnp.float32),
    ]

    neck = ViTDetNeck(
        position_encoding=PositionEmbeddingSine(num_pos_feats=d_model),
        d_model=d_model,
        backbone_channel_list=backbone_channel_list,
        key=kn,
    )

    out, pos = neck(xs)
    jax.block_until_ready(out[0])
    jax.block_until_ready(pos[0])

    # light sanity check against a plain-JAX reference (same bf16-rounded operands)
    ref = _reference_neck_level0(xs[0], neck.conv1_w[0], neck.conv1_b[0],
                                 neck.conv3_w[0], neck.conv3_b[0])
    err = float(jnp.max(jnp.abs(out[0] - ref)))
    scale = float(jnp.max(jnp.abs(ref))) + 1e-6
    if err > 2e-2 * scale:
        raise RuntimeError(f"Pallas output mismatch vs reference: max|err|={err:.4e}")

    assert out[1] is None and pos[1] is None  # matches the reference forward semantics
    print("KERNEL_OK")
</pallas_src>

<mosaic_0001>
module attributes {stable_mosaic.version = 11 : i64} {
  func.func @kernel(%arg0: i32, %arg1: i32, %arg2: memref<1x1x34x256xbf16, #tpu.memory_space<vmem>>, %arg3: memref<1x8x34x256xbf16, #tpu.memory_space<vmem>>, %arg4: memref<1x1x34x256xbf16, #tpu.memory_space<vmem>>, %arg5: memref<9x256x256xbf16, #tpu.memory_space<vmem>>, %arg6: memref<1x256xf32, #tpu.memory_space<vmem>>, %arg7: memref<1x8x32x256xf32, #tpu.memory_space<vmem>>) attributes {dimension_semantics = [#tpu.dimension_semantics<parallel>, #tpu.dimension_semantics<parallel>], iteration_bounds = array<i64: 2, 4>, scalar_prefetch = 0 : i64, scratch_operands = 0 : i64, tpu.core_type = #tpu.core_type<tc>, window_params = [{transform_indices = @transform_0, window_bounds = array<i64: 1, 1, 34, 256>}, {transform_indices = @transform_1, window_bounds = array<i64: 1, 8, 34, 256>}, {transform_indices = @transform_2, window_bounds = array<i64: 1, 1, 34, 256>}, {pipeline_mode = #tpu.pipeline_mode<synchronous>, transform_indices = @transform_3, window_bounds = array<i64: 9, 256, 256>}, {pipeline_mode = #tpu.pipeline_mode<synchronous>, transform_indices = @transform_4, window_bounds = array<i64: 1, 256>}, {transform_indices = @transform_5, window_bounds = array<i64: 1, 8, 32, 256>}]} {
    %c0 = arith.constant 0 : index
    %c0_0 = arith.constant 0 : index
    %c0_1 = arith.constant 0 : index
    %c0_2 = arith.constant 0 : index
    %0 = vector.load %arg2[%c0, %c0_0, %c0_1, %c0_2] : memref<1x1x34x256xbf16, #tpu.memory_space<vmem>>, vector<1x1x34x256xbf16>
    %1 = vector.shape_cast %0 : vector<1x1x34x256xbf16> to vector<1x34x256xbf16>
    %2 = arith.extf %1 : vector<1x34x256xbf16> to vector<1x34x256xf32>
    %c0_3 = arith.constant 0 : index
    %c0_4 = arith.constant 0 : index
    %c0_5 = arith.constant 0 : index
    %c0_6 = arith.constant 0 : index
    %3 = vector.load %arg3[%c0_3, %c0_4, %c0_5, %c0_6] : memref<1x8x34x256xbf16, #tpu.memory_space<vmem>>, vector<1x8x34x256xbf16>
    %4 = vector.shape_cast %3 : vector<1x8x34x256xbf16> to vector<8x34x256xbf16>
    %5 = arith.extf %4 : vector<8x34x256xbf16> to vector<8x34x256xf32>
    %c0_7 = arith.constant 0 : index
    %c0_8 = arith.constant 0 : index
    %c0_9 = arith.constant 0 : index
    %c0_10 = arith.constant 0 : index
    %6 = vector.load %arg4[%c0_7, %c0_8, %c0_9, %c0_10] : memref<1x1x34x256xbf16, #tpu.memory_space<vmem>>, vector<1x1x34x256xbf16>
    %7 = vector.shape_cast %6 : vector<1x1x34x256xbf16> to vector<1x34x256xbf16>
    %8 = arith.extf %7 : vector<1x34x256xbf16> to vector<1x34x256xf32>
    %9 = tpu.concatenate %2, %5, %8 in 0 : vector<1x34x256xf32>, vector<8x34x256xf32>, vector<1x34x256xf32> -> vector<10x34x256xf32>
    %10 = vector.extract_strided_slice %9 {offsets = [0, 0, 0], sizes = [10, 32, 256], strides = [1, 1, 1]} : vector<10x34x256xf32> to vector<10x32x256xf32>
    %11 = vector.extract_strided_slice %9 {offsets = [0, 1, 0], sizes = [10, 32, 256], strides = [1, 1, 1]} : vector<10x34x256xf32> to vector<10x32x256xf32>
    %12 = vector.extract_strided_slice %9 {offsets = [0, 2, 0], sizes = [10, 32, 256], strides = [1, 1, 1]} : vector<10x34x256xf32> to vector<10x32x256xf32>
    %13 = vector.extract_strided_slice %10 {offsets = [0, 0, 0], sizes = [8, 32, 256], strides = [1, 1, 1]} : vector<10x32x256xf32> to vector<8x32x256xf32>
    %14 = vector.shape_cast %13 : vector<8x32x256xf32> to vector<256x256xf32>
    %15 = arith.truncf %14 : vector<256x256xf32> to vector<256x256xbf16>
    %c0_11 = arith.constant 0 : index
    %c0_12 = arith.constant 0 : index
    %c0_13 = arith.constant 0 : index
    %16 = vector.load %arg5[%c0_11, %c0_12, %c0_13] : memref<9x256x256xbf16, #tpu.memory_space<vmem>>, vector<1x256x256xbf16>
    %17 = vector.shape_cast %16 : vector<1x256x256xbf16> to vector<256x256xbf16>
    %cst = arith.constant dense<0.000000e+00> : vector<256x256xf32>
    %18 = tpu.matmul %15, %17, %cst {dimension_numbers = #tpu.dot_dimension_numbers<[1], [0], [0], [1], [0, 0, 1, 1], [], []>} : vector<256x256xbf16>, vector<256x256xbf16>, vector<256x256xf32> -> vector<256x256xf32>
    %19 = vector.extract_strided_slice %11 {offsets = [0, 0, 0], sizes = [8, 32, 256], strides = [1, 1, 1]} : vector<10x32x256xf32> to vector<8x32x256xf32>
    %20 = vector.shape_cast %19 : vector<8x32x256xf32> to vector<256x256xf32>
    %21 = arith.truncf %20 : vector<256x256xf32> to vector<256x256xbf16>
    %c1 = arith.constant 1 : index
    %c0_14 = arith.constant 0 : index
    %c0_15 = arith.constant 0 : index
    %22 = vector.load %arg5[%c1, %c0_14, %c0_15] : memref<9x256x256xbf16, #tpu.memory_space<vmem>>, vector<1x256x256xbf16>
    %23 = vector.shape_cast %22 : vector<1x256x256xbf16> to vector<256x256xbf16>
    %cst_16 = arith.constant dense<0.000000e+00> : vector<256x256xf32>
    %24 = tpu.matmul %21, %23, %cst_16 {dimension_numbers = #tpu.dot_dimension_numbers<[1], [0], [0], [1], [0, 0, 1, 1], [], []>} : vector<256x256xbf16>, vector<256x256xbf16>, vector<256x256xf32> -> vector<256x256xf32>
    %25 = arith.addf %18, %24 : vector<256x256xf32>
    %26 = vector.extract_strided_slice %12 {offsets = [0, 0, 0], sizes = [8, 32, 256], strides = [1, 1, 1]} : vector<10x32x256xf32> to vector<8x32x256xf32>
    %27 = vector.shape_cast %26 : vector<8x32x256xf32> to vector<256x256xf32>
    %28 = arith.truncf %27 : vector<256x256xf32> to vector<256x256xbf16>
    %c2 = arith.constant 2 : index
    %c0_17 = arith.constant 0 : index
    %c0_18 = arith.constant 0 : index
    %29 = vector.load %arg5[%c2, %c0_17, %c0_18] : memref<9x256x256xbf16, #tpu.memory_space<vmem>>, vector<1x256x256xbf16>
    %30 = vector.shape_cast %29 : vector<1x256x256xbf16> to vector<256x256xbf16>
    %cst_19 = arith.constant dense<0.000000e+00> : vector<256x256xf32>
    %31 = tpu.matmul %28, %30, %cst_19 {dimension_numbers = #tpu.dot_dimension_numbers<[1], [0], [0], [1], [0, 0, 1, 1], [], []>} : vector<256x256xbf16>, vector<256x256xbf16>, vector<256x256xf32> -> vector<256x256xf32>
    %32 = arith.addf %25, %31 : vector<256x256xf32>
    %33 = vector.extract_strided_slice %10 {offsets = [1, 0, 0], sizes = [8, 32, 256], strides = [1, 1, 1]} : vector<10x32x256xf32> to vector<8x32x256xf32>
    %34 = vector.shape_cast %33 : vector<8x32x256xf32> to vector<256x256xf32>
    %35 = arith.truncf %34 : vector<256x256xf32> to vector<256x256xbf16>
    %c3 = arith.constant 3 : index
    %c0_20 = arith.constant 0 : index
    %c0_21 = arith.constant 0 : index
    %36 = vector.load %arg5[%c3, %c0_20, %c0_21] : memref<9x256x256xbf16, #tpu.memory_space<vmem>>, vector<1x256x256xbf16>
    %37 = vector.shape_cast %36 : vector<1x256x256xbf16> to vector<256x256xbf16>
    %cst_22 = arith.constant dense<0.000000e+00> : vector<256x256xf32>
    %38 = tpu.matmul %35, %37, %cst_22 {dimension_numbers = #tpu.dot_dimension_numbers<[1], [0], [0], [1], [0, 0, 1, 1], [], []>} : vector<256x256xbf16>, vector<256x256xbf16>, vector<256x256xf32> -> vector<256x256xf32>
    %39 = arith.addf %32, %38 : vector<256x256xf32>
    %40 = vector.extract_strided_slice %11 {offsets = [1, 0, 0], sizes = [8, 32, 256], strides = [1, 1, 1]} : vector<10x32x256xf32> to vector<8x32x256xf32>
    %41 = vector.shape_cast %40 : vector<8x32x256xf32> to vector<256x256xf32>
    %42 = arith.truncf %41 : vector<256x256xf32> to vector<256x256xbf16>
    %c4 = arith.constant 4 : index
    %c0_23 = arith.constant 0 : index
    %c0_24 = arith.constant 0 : index
    %43 = vector.load %arg5[%c4, %c0_23, %c0_24] : memref<9x256x256xbf16, #tpu.memory_space<vmem>>, vector<1x256x256xbf16>
    %44 = vector.shape_cast %43 : vector<1x256x256xbf16> to vector<256x256xbf16>
    %cst_25 = arith.constant dense<0.000000e+00> : vector<256x256xf32>
    %45 = tpu.matmul %42, %44, %cst_25 {dimension_numbers = #tpu.dot_dimension_numbers<[1], [0], [0], [1], [0, 0, 1, 1], [], []>} : vector<256x256xbf16>, vector<256x256xbf16>, vector<256x256xf32> -> vector<256x256xf32>
    %46 = arith.addf %39, %45 : vector<256x256xf32>
    %47 = vector.extract_strided_slice %12 {offsets = [1, 0, 0], sizes = [8, 32, 256], strides = [1, 1, 1]} : vector<10x32x256xf32> to vector<8x32x256xf32>
    %48 = vector.shape_cast %47 : vector<8x32x256xf32> to vector<256x256xf32>
    %49 = arith.truncf %48 : vector<256x256xf32> to vector<256x256xbf16>
    %c5 = arith.constant 5 : index
    %c0_26 = arith.constant 0 : index
    %c0_27 = arith.constant 0 : index
    %50 = vector.load %arg5[%c5, %c0_26, %c0_27] : memref<9x256x256xbf16, #tpu.memory_space<vmem>>, vector<1x256x256xbf16>
    %51 = vector.shape_cast %50 : vector<1x256x256xbf16> to vector<256x256xbf16>
    %cst_28 = arith.constant dense<0.000000e+00> : vector<256x256xf32>
    %52 = tpu.matmul %49, %51, %cst_28 {dimension_numbers = #tpu.dot_dimension_numbers<[1], [0], [0], [1], [0, 0, 1, 1], [], []>} : vector<256x256xbf16>, vector<256x256xbf16>, vector<256x256xf32> -> vector<256x256xf32>
    %53 = arith.addf %46, %52 : vector<256x256xf32>
    %54 = vector.extract_strided_slice %10 {offsets = [2, 0, 0], sizes = [8, 32, 256], strides = [1, 1, 1]} : vector<10x32x256xf32> to vector<8x32x256xf32>
    %55 = vector.shape_cast %54 : vector<8x32x256xf32> to vector<256x256xf32>
    %56 = arith.truncf %55 : vector<256x256xf32> to vector<256x256xbf16>
    %c6 = arith.constant 6 : index
    %c0_29 = arith.constant 0 : index
    %c0_30 = arith.constant 0 : index
    %57 = vector.load %arg5[%c6, %c0_29, %c0_30] : memref<9x256x256xbf16, #tpu.memory_space<vmem>>, vector<1x256x256xbf16>
    %58 = vector.shape_cast %57 : vector<1x256x256xbf16> to vector<256x256xbf16>
    %cst_31 = arith.constant dense<0.000000e+00> : vector<256x256xf32>
    %59 = tpu.matmul %56, %58, %cst_31 {dimension_numbers = #tpu.dot_dimension_numbers<[1], [0], [0], [1], [0, 0, 1, 1], [], []>} : vector<256x256xbf16>, vector<256x256xbf16>, vector<256x256xf32> -> vector<256x256xf32>
    %60 = arith.addf %53, %59 : vector<256x256xf32>
    %61 = vector.extract_strided_slice %11 {offsets = [2, 0, 0], sizes = [8, 32, 256], strides = [1, 1, 1]} : vector<10x32x256xf32> to vector<8x32x256xf32>
    %62 = vector.shape_cast %61 : vector<8x32x256xf32> to vector<256x256xf32>
    %63 = arith.truncf %62 : vector<256x256xf32> to vector<256x256xbf16>
    %c7 = arith.constant 7 : index
    %c0_32 = arith.constant 0 : index
    %c0_33 = arith.constant 0 : index
    %64 = vector.load %arg5[%c7, %c0_32, %c0_33] : memref<9x256x256xbf16, #tpu.memory_space<vmem>>, vector<1x256x256xbf16>
    %65 = vector.shape_cast %64 : vector<1x256x256xbf16> to vector<256x256xbf16>
    %cst_34 = arith.constant dense<0.000000e+00> : vector<256x256xf32>
    %66 = tpu.matmul %63, %65, %cst_34 {dimension_numbers = #tpu.dot_dimension_numbers<[1], [0], [0], [1], [0, 0, 1, 1], [], []>} : vector<256x256xbf16>, vector<256x256xbf16>, vector<256x256xf32> -> vector<256x256xf32>
    %67 = arith.addf %60, %66 : vector<256x256xf32>
    %68 = vector.extract_strided_slice %12 {offsets = [2, 0, 0], sizes = [8, 32, 256], strides = [1, 1, 1]} : vector<10x32x256xf32> to vector<8x32x256xf32>
    %69 = vector.shape_cast %68 : vector<8x32x256xf32> to vector<256x256xf32>
    %70 = arith.truncf %69 : vector<256x256xf32> to vector<256x256xbf16>
    %c8 = arith.constant 8 : index
    %c0_35 = arith.constant 0 : index
    %c0_36 = arith.constant 0 : index
    %71 = vector.load %arg5[%c8, %c0_35, %c0_36] : memref<9x256x256xbf16, #tpu.memory_space<vmem>>, vector<1x256x256xbf16>
    %72 = vector.shape_cast %71 : vector<1x256x256xbf16> to vector<256x256xbf16>
    %cst_37 = arith.constant dense<0.000000e+00> : vector<256x256xf32>
    %73 = tpu.matmul %70, %72, %cst_37 {dimension_numbers = #tpu.dot_dimension_numbers<[1], [0], [0], [1], [0, 0, 1, 1], [], []>} : vector<256x256xbf16>, vector<256x256xbf16>, vector<256x256xf32> -> vector<256x256xf32>
    %74 = arith.addf %67, %73 : vector<256x256xf32>
    %c0_38 = arith.constant 0 : index
    %c0_39 = arith.constant 0 : index
    %75 = vector.load %arg6[%c0_38, %c0_39] : memref<1x256xf32, #tpu.memory_space<vmem>>, vector<1x256xf32>
    %76 = vector.broadcast %75 : vector<1x256xf32> to vector<256x256xf32>
    %77 = arith.addf %74, %76 : vector<256x256xf32>
    %78 = vector.shape_cast %77 : vector<256x256xf32> to vector<1x8x32x256xf32>
    %c0_40 = arith.constant 0 : index
    %c0_41 = arith.constant 0 : index
    %c0_42 = arith.constant 0 : index
    %c0_43 = arith.constant 0 : index
    %79 = vector.load %arg7[%c0_40, %c0_41, %c0_42, %c0_43] : memref<1x8x32x256xf32, #tpu.memory_space<vmem>>, vector<1x8x32x256xf32>
    tpu.vector_store %arg7[%c0_40, %c0_41, %c0_42, %c0_43], %78 {strides = array<i32>} : memref<1x8x32x256xf32, #tpu.memory_space<vmem>>, vector<1x8x32x256xf32>,
    return
  }
  func.func @transform_0(%arg0: i32, %arg1: i32) -> (i32, i32, i32, i32) {
    %c1_i32 = arith.constant 1 : i32
    %0 = arith.addi %arg1, %c1_i32 : i32
    %c8_i32 = arith.constant 8 : i32
    %1 = arith.muli %0, %c8_i32 : i32
    %c1_i32_0 = arith.constant 1 : i32
    %2 = arith.subi %1, %c1_i32_0 : i32
    %c0_i32 = arith.constant 0 : i32
    %c0_i32_1 = arith.constant 0 : i32
    %c0_i32_2 = arith.constant 0 : i32
    return %arg0, %2, %c0_i32, %c0_i32_1 : i32, i32, i32, i32
  }
  func.func @transform_1(%arg0: i32, %arg1: i32) -> (i32, i32, i32, i32) {
    %c1_i32 = arith.constant 1 : i32
    %0 = arith.addi %arg1, %c1_i32 : i32
    %c0_i32 = arith.constant 0 : i32
    %c0_i32_0 = arith.constant 0 : i32
    %c0_i32_1 = arith.constant 0 : i32
    return %arg0, %0, %c0_i32, %c0_i32_0 : i32, i32, i32, i32
  }
  func.func @transform_2(%arg0: i32, %arg1: i32) -> (i32, i32, i32, i32) {
    %c2_i32 = arith.constant 2 : i32
    %0 = arith.addi %arg1, %c2_i32 : i32
    %c8_i32 = arith.constant 8 : i32
    %1 = arith.muli %0, %c8_i32 : i32
    %c0_i32 = arith.constant 0 : i32
    %c0_i32_0 = arith.constant 0 : i32
    %c0_i32_1 = arith.constant 0 : i32
    return %arg0, %1, %c0_i32, %c0_i32_0 : i32, i32, i32, i32
  }
  func.func @transform_3(%arg0: i32, %arg1: i32) -> (i32, i32, i32) {
    %c0_i32 = arith.constant 0 : i32
    %c0_i32_0 = arith.constant 0 : i32
    %c0_i32_1 = arith.constant 0 : i32
    %c0_i32_2 = arith.constant 0 : i32
    return %c0_i32, %c0_i32_0, %c0_i32_1 : i32, i32, i32
  }
  func.func @transform_4(%arg0: i32, %arg1: i32) -> (i32, i32) {
    %c0_i32 = arith.constant 0 : i32
    %c0_i32_0 = arith.constant 0 : i32
    %c0_i32_1 = arith.constant 0 : i32
    return %c0_i32, %c0_i32_0 : i32, i32
  }
  func.func @transform_5(%arg0: i32, %arg1: i32) -> (i32, i32, i32, i32) {
    %c0_i32 = arith.constant 0 : i32
    %c0_i32_0 = arith.constant 0 : i32
    %c0_i32_1 = arith.constant 0 : i32
    return %arg0, %arg1, %c0_i32, %c0_i32_0 : i32, i32, i32, i32
  }
}

module attributes {stable_mosaic.version = 11 : i64} {
  func.func @_conv1x1_kernel(%arg0: i32, %arg1: memref<512x256xbf16, #tpu.memory_space<vmem>>, %arg2: memref<256x256xbf16, #tpu.memory_space<vmem>>, %arg3: memref<1x256xf32, #tpu.memory_space<vmem>>, %arg4: memref<512x256xbf16, #tpu.memory_space<vmem>>) attributes {dimension_semantics = [#tpu.dimension_semantics<parallel>], iteration_bounds = array<i64: 4>, scalar_prefetch = 0 : i64, scratch_operands = 0 : i64, tpu.core_type = #tpu.core_type<tc>, window_params = [{transform_indices = @transform_0, window_bounds = array<i64: 512, 256>}, {pipeline_mode = #tpu.pipeline_mode<synchronous>, transform_indices = @transform_1, window_bounds = array<i64: 256, 256>}, {pipeline_mode = #tpu.pipeline_mode<synchronous>, transform_indices = @transform_2, window_bounds = array<i64: 1, 256>}, {transform_indices = @transform_3, window_bounds = array<i64: 512, 256>}]} {
    %c0 = arith.constant 0 : index
    %c0_0 = arith.constant 0 : index
    %0 = vector.load %arg1[%c0, %c0_0] : memref<512x256xbf16, #tpu.memory_space<vmem>>, vector<512x256xbf16>
    %c0_1 = arith.constant 0 : index
    %c0_2 = arith.constant 0 : index
    %1 = vector.load %arg2[%c0_1, %c0_2] : memref<256x256xbf16, #tpu.memory_space<vmem>>, vector<256x256xbf16>
    %cst = arith.constant dense<0.000000e+00> : vector<512x256xf32>
    %2 = tpu.matmul %0, %1, %cst {dimension_numbers = #tpu.dot_dimension_numbers<[1], [0], [0], [1], [0, 0, 1, 1], [], []>} : vector<512x256xbf16>, vector<256x256xbf16>, vector<512x256xf32> -> vector<512x256xf32>
    %c0_3 = arith.constant 0 : index
    %c0_4 = arith.constant 0 : index
    %3 = vector.load %arg3[%c0_3, %c0_4] : memref<1x256xf32, #tpu.memory_space<vmem>>, vector<1x256xf32>
    %4 = vector.broadcast %3 : vector<1x256xf32> to vector<512x256xf32>
    %5 = arith.addf %2, %4 : vector<512x256xf32>
    %6 = arith.truncf %5 : vector<512x256xf32> to vector<512x256xbf16>
    %c0_5 = arith.constant 0 : index
    %c0_6 = arith.constant 0 : index
    %7 = vector.load %arg4[%c0_5, %c0_6] : memref<512x256xbf16, #tpu.memory_space<vmem>>, vector<512x256xbf16>
    tpu.vector_store %arg4[%c0_5, %c0_6], %6 {strides = array<i32>} : memref<512x256xbf16, #tpu.memory_space<vmem>>, vector<512x256xbf16>,
    return
  }
  func.func @transform_0(%arg0: i32) -> (i32, i32) {
    %c0_i32 = arith.constant 0 : i32
    %c0_i32_0 = arith.constant 0 : i32
    return %arg0, %c0_i32 : i32, i32
  }
  func.func @transform_1(%arg0: i32) -> (i32, i32) {
    %c0_i32 = arith.constant 0 : i32
    %c0_i32_0 = arith.constant 0 : i32
    %c0_i32_1 = arith.constant 0 : i32
    return %c0_i32, %c0_i32_0 : i32, i32
  }
  func.func @transform_2(%arg0: i32) -> (i32, i32) {
    %c0_i32 = arith.constant 0 : i32
    %c0_i32_0 = arith.constant 0 : i32
    %c0_i32_1 = arith.constant 0 : i32
    return %c0_i32, %c0_i32_0 : i32, i32
  }
  func.func @transform_3(%arg0: i32) -> (i32, i32) {
    %c0_i32 = arith.constant 0 : i32
    %c0_i32_0 = arith.constant 0 : i32
    return %arg0, %c0_i32 : i32, i32
  }
}

</mosaic_0001>

<bundles_post_ra>
// kernel: _neck_level0_forward.2
= control target key start
LH: loop header
LB: loop body
LE: loop exit
PB: predicated region body
PF: predicated region fallthrough
CT: control target
= control target key end

     0   :  { %s2077_s12 = smov 0   ;;  %s2464_s0 = inlined_call_operand.vmem [shape: bf16[2048,256], index: 0, kind: input, shape index: {}]   ;;  %s2465_s1 = inlined_call_operand.vmem [shape: bf16[256,256], index: 1, kind: input, shape index: {}]   ;;  %s2466_s2 = inlined_call_operand.vmem [shape: f32[1,256], index: 2, kind: input, shape index: {}]   ;;  %s2467_s3 = inlined_call_operand.vmem [shape: bf16[2048,256], index: 3, kind: output, shape index: {}]  }
   0x1 LB: > { %s1626_s13 = sadd.s32 4294967295, %s2055_s12   ;;  %p1630_p0 = scmp.ge.s32.totalorder %s2055_s12, 1  ;;  %s2055_s12 = sphi %s2077_s12, %s13_s12  }
   0x2   : > { %p139_p1 = scmp.lt.s32.totalorder %s2055_s12, 5 }
   0x4   : > { %p140_p2 = pnand %p1630_p0, %p139_p1 }
   0x5   : > { %v1905_v0 = vld [vmem:[%s2465_s1 + $0x4] ss:$8 sps:$4 sm:$0xff] (!%p140_p2)   ;;  %v1907_v1 = vld [vmem:[%s2465_s1] ss:$8 sps:$4 sm:$0xff] (!%p140_p2)   ;;  %v1908_v2 = vld [vmem:[%s2465_s1 + $0x14] ss:$8 sps:$4 sm:$0xff] (!%p140_p2)  }
   0x6   : > { %143 = sbr.rel (%p140_p2) target bundleno = 410 (0x19a), region = 32  ;;  %767 = vmatprep.subr.bf16.mxu0 (!%p140_p2), %v1905_v0  ;;  %1865 = vmatprep.subr.bf16.mxu1 (!%p140_p2), %v1905_v0  ;;  %v1910_v3 = vld [vmem:[%s2465_s1 + $0x10] ss:$8 sps:$4 sm:$0xff] (!%p140_p2)   ;;  %v1911_v4 = vld [vmem:[%s2465_s1 + $0x24] ss:$8 sps:$4 sm:$0xff] (!%p140_p2)   ;;  %s1631_s24 = sshll.u32 (!%p140_p2), %s1626_s13, 6 }
   0x7   : > { %768 = vmatpush1.bf16.msra.mxu0 (!%p140_p2), %v1907_v1  ;;  %1881 = vmatpush1.bf16.msra.mxu1 (!%p140_p2), %v1907_v1  ;;  %v1913_v5 = vld [vmem:[%s2465_s1 + $0x20] ss:$8 sps:$4 sm:$0xff] (!%p140_p2)   ;;  %v1914_v6 = vld [vmem:[%s2465_s1 + $0x34] ss:$8 sps:$4 sm:$0xff] (!%p140_p2)   ;;  %p166_p3 = scmp.lt.s32.totalorder (!%p140_p2), %s1631_s24, 255 }
   0x8   : > { %769 = vmatprep.subr.bf16.mxu0 (!%p140_p2), %v1908_v2  ;;  %1866 = vmatprep.subr.bf16.mxu1 (!%p140_p2), %v1908_v2  ;;  %v1916_v7 = vld [vmem:[%s2465_s1 + $0x30] ss:$8 sps:$4 sm:$0xff] (!%p140_p2)   ;;  %v1917_v8 = vld [vmem:[%s2465_s1 + $0x44] ss:$8 sps:$4 sm:$0xff] (!%p140_p2)   ;;  %v1919_v9 = vld [vmem:[%s2465_s1 + $0x40] ss:$8 sps:$4 sm:$0xff] (!%p140_p2)  }
   0x9   : > { %v1920_v10 = vld [vmem:[%s2465_s1 + $0x54] ss:$8 sps:$4 sm:$0xff] (!%p140_p2)   ;;  %v1922_v11 = vld [vmem:[%s2465_s1 + $0x50] ss:$8 sps:$4 sm:$0xff] (!%p140_p2)   ;;  %v1923_v12 = vld [vmem:[%s2465_s1 + $0x64] ss:$8 sps:$4 sm:$0xff] (!%p140_p2)  }
   0xa   : > { %v1925_v14 = vld [vmem:[%s2465_s1 + $0x60] ss:$8 sps:$4 sm:$0xff] (!%p140_p2)   ;;  %v1926_v16 = vld [vmem:[%s2465_s1 + $0x74] ss:$8 sps:$4 sm:$0xff] (!%p140_p2)   ;;  %v1928_v17 = vld [vmem:[%s2465_s1 + $0x70] ss:$8 sps:$4 sm:$0xff] (!%p140_p2)  }
   0xb   : > { %770 = vmatpush1.bf16.msra.mxu0 (!%p140_p2), %v1910_v3  ;;  %1882 = vmatpush1.bf16.msra.mxu1 (!%p140_p2), %v1910_v3  ;;  %v1929_v18 = vld [vmem:[%s2465_s1 + $0x84] ss:$8 sps:$4 sm:$0xff] (!%p140_p2)   ;;  %v1931_v19 = vld [vmem:[%s2465_s1 + $0x80] ss:$8 sps:$4 sm:$0xff] (!%p140_p2)   ;;  %v1932_v20 = vld [vmem:[%s2465_s1 + $0x94] ss:$8 sps:$4 sm:$0xff] (!%p140_p2)  }
   0xc   : > { %771 = vmatprep.subr.bf16.mxu0 (!%p140_p2), %v1911_v4  ;;  %1867 = vmatprep.subr.bf16.mxu1 (!%p140_p2), %v1911_v4  ;;  %v1934_v21 = vld [vmem:[%s2465_s1 + $0x90] ss:$8 sps:$4 sm:$0xff] (!%p140_p2)   ;;  %v1935_v22 = vld [vmem:[%s2465_s1 + $0xa4] ss:$8 sps:$4 sm:$0xff] (!%p140_p2)   ;;  %v1937_v23 = vld [vmem:[%s2465_s1 + $0xa0] ss:$8 sps:$4 sm:$0xff] (!%p140_p2)  }
   0xd   : > { %s2469_s24 = smov (!%p166_p3, %s1631_s24), 255  ;;  %v1938_v24 = vld [vmem:[%s2465_s1 + $0xb4] ss:$8 sps:$4 sm:$0xff]   ;;  %v1940_v25 = vld [vmem:[%s2465_s1 + $0xb0] ss:$8 sps:$4 sm:$0xff]  }
   0xe   : > { %s1799_s10 = sshll.u32 %s2469_s24, 3  ;;  %v1941_v26 = vld [vmem:[%s2465_s1 + $0xc4] ss:$8 sps:$4 sm:$0xff]   ;;  %v1943_v27 = vld [vmem:[%s2465_s1 + $0xc0] ss:$8 sps:$4 sm:$0xff]  }
   0xf   : > { %772 = vmatpush1.bf16.msra.mxu0 %v1913_v5  ;;  %1883 = vmatpush1.bf16.msra.mxu1 %v1913_v5  ;;  %s2129_s16 = scalar_lea.vmem %s2464_s0, %s1799_s10  ;;  %v1944_v28 = vld [vmem:[%s2465_s1 + $0xd4] ss:$8 sps:$4 sm:$0xff]   ;;  %v1946_v29 = vld [vmem:[%s2465_s1 + $0xd0] ss:$8 sps:$4 sm:$0xff]   ;;  %v1947_v30 = vld [vmem:[%s2465_s1 + $0xe4] ss:$8 sps:$4 sm:$0xff]   ;;  %s2271_s13 = scalar_lea.vmem %s2467_s3, %s1799_s10 }
  0x10   : > { %773 = vmatprep.subr.bf16.mxu0 %v1914_v6  ;;  %1868 = vmatprep.subr.bf16.mxu1 %v1914_v6  ;;  %v1955_v13 = vld [vmem:[%s2129_s16 + $0x4] ss:$8 sps:$4 sm:$0xff]   ;;  %v1949_v31 = vld [vmem:[%s2465_s1 + $0xe0] ss:$8 sps:$4 sm:$0xff]   ;;  %v1950_v32 = vld [vmem:[%s2465_s1 + $0xf4] ss:$8 sps:$4 sm:$0xff]  }
  0x11   : > { %v1958_v15 = vld [vmem:[%s2129_s16 + $0x104] ss:$8 sps:$4 sm:$0xff]   ;;  %799 = vmatprep.mubr.bf16.mxu0 %v1955_v13  ;;  %v1952_v33 = vld [vmem:[%s2465_s1 + $0xf0] ss:$8 sps:$4 sm:$0xff]   ;;  %v1953_v34 = vld [vmem:[%s2129_s16] ss:$8 sps:$4 sm:$0xff]  }
  0x12   : > { %959 = vmatprep.mubr.bf16.mxu1 %v1958_v15  ;;  %v1956_v35 = vld [vmem:[%s2129_s16 + $0x100] ss:$8 sps:$4 sm:$0xff]   ;;  %v1959_v36 = vld [vmem:[%s2129_s16 + $0x14] ss:$8 sps:$4 sm:$0xff]   ;;  %v1963_v38 = vld [vmem:[%s2129_s16 + $0x10] ss:$8 sps:$4 sm:$0xff]  }
  0x13   : > { %774 = vmatpush1.bf16.msra.mxu0 %v1916_v7  ;;  %1884 = vmatpush1.bf16.msra.mxu1 %v1916_v7  ;;  %v1961_v37 = vld [vmem:[%s2129_s16 + $0x114] ss:$8 sps:$4 sm:$0xff]   ;;  %v1964_v39 = vld [vmem:[%s2129_s16 + $0x110] ss:$8 sps:$4 sm:$0xff]   ;;  %v1965_v40 = vld [vmem:[%s2129_s16 + $0x24] ss:$8 sps:$4 sm:$0xff]  }
  0x14   : > { %775 = vmatprep.subr.bf16.mxu0 %v1917_v8  ;;  %1869 = vmatprep.subr.bf16.mxu1 %v1917_v8  ;;  %v1967_v41 = vld [vmem:[%s2129_s16 + $0x124] ss:$8 sps:$4 sm:$0xff]   ;;  %v1969_v42 = vld [vmem:[%s2129_s16 + $0x20] ss:$8 sps:$4 sm:$0xff]   ;;  %v1971_v44 = vld [vmem:[%s2129_s16 + $0x34] ss:$8 sps:$4 sm:$0xff]  }
  0x15   : > { %v1970_v43 = vld [vmem:[%s2129_s16 + $0x120] ss:$8 sps:$4 sm:$0xff]   ;;  %v1973_v45 = vld [vmem:[%s2129_s16 + $0x134] ss:$8 sps:$4 sm:$0xff]   ;;  %v1975_v46 = vld [vmem:[%s2129_s16 + $0x30] ss:$8 sps:$4 sm:$0xff]  }
  0x16   : > { %v1976_v47 = vld [vmem:[%s2129_s16 + $0x130] ss:$8 sps:$4 sm:$0xff]   ;;  %v1977_v48 = vld [vmem:[%s2129_s16 + $0x44] ss:$8 sps:$4 sm:$0xff]   ;;  %v1981_v50 = vld [vmem:[%s2129_s16 + $0x40] ss:$8 sps:$4 sm:$0xff]  }
  0x17   : > { %776 = vmatpush1.bf16.msra.mxu0 %v1919_v9  ;;  %1885 = vmatpush1.bf16.msra.mxu1 %v1919_v9  ;;  %v1979_v49 = vld [vmem:[%s2129_s16 + $0x144] ss:$8 sps:$4 sm:$0xff]   ;;  %v1982_v51 = vld [vmem:[%s2129_s16 + $0x140] ss:$8 sps:$4 sm:$0xff]   ;;  %v1983_v52 = vld [vmem:[%s2129_s16 + $0x54] ss:$8 sps:$4 sm:$0xff]  }
  0x18   : > { %777 = vmatprep.subr.bf16.mxu0 %v1920_v10  ;;  %1870 = vmatprep.subr.bf16.mxu1 %v1920_v10  ;;  %v1985_v53 = vld [vmem:[%s2129_s16 + $0x154] ss:$8 sps:$4 sm:$0xff]   ;;  %v1987_v54 = vld [vmem:[%s2129_s16 + $0x50] ss:$8 sps:$4 sm:$0xff]   ;;  %v1989_v56 = vld [vmem:[%s2129_s16 + $0x64] ss:$8 sps:$4 sm:$0xff]  }
  0x19   : > { %v1988_v55 = vld [vmem:[%s2129_s16 + $0x150] ss:$8 sps:$4 sm:$0xff]   ;;  %v1991_v57 = vld [vmem:[%s2129_s16 + $0x164] ss:$8 sps:$4 sm:$0xff]   ;;  %v1993_v58 = vld [vmem:[%s2129_s16 + $0x60] ss:$8 sps:$4 sm:$0xff]  }
  0x1a   : > { %v1994_v59 = vld [vmem:[%s2129_s16 + $0x160] ss:$8 sps:$4 sm:$0xff]   ;;  %v1995_v60 = vld [vmem:[%s2129_s16 + $0x74] ss:$8 sps:$4 sm:$0xff]   ;;  %v1999_v62 = vld [vmem:[%s2129_s16 + $0x70] ss:$8 sps:$4 sm:$0xff]  }
  0x1b   : > { %778 = vmatpush1.bf16.msra.mxu0 %v1922_v11  ;;  %1886 = vmatpush1.bf16.msra.mxu1 %v1922_v11  ;;  %v1997_v61 = vld [vmem:[%s2129_s16 + $0x174] ss:$8 sps:$4 sm:$0xff]   ;;  %v2000_v63 = vld [vmem:[%s2129_s16 + $0x170] ss:$8 sps:$4 sm:$0xff]   ;;  %v2001_v0 = vld [vmem:[%s2129_s16 + $0x84] ss:$8 sps:$4 sm:$0xff]  }
  0x1c   : > { %779 = vmatprep.subr.bf16.mxu0 %v1923_v12  ;;  %1871 = vmatprep.subr.bf16.mxu1 %v1923_v12  ;;  %v2003_v1 = vld [vmem:[%s2129_s16 + $0x184] ss:$8 sps:$4 sm:$0xff]   ;;  %v2005_v2 = vld [vmem:[%s2129_s16 + $0x80] ss:$8 sps:$4 sm:$0xff]   ;;  %v2007_v4 = vld [vmem:[%s2129_s16 + $0x94] ss:$8 sps:$4 sm:$0xff]  }
  0x1d   : > { %v2006_v3 = vld [vmem:[%s2129_s16 + $0x180] ss:$8 sps:$4 sm:$0xff]   ;;  %v2009_v5 = vld [vmem:[%s2129_s16 + $0x194] ss:$8 sps:$4 sm:$0xff]   ;;  %v2011_v6 = vld [vmem:[%s2129_s16 + $0x90] ss:$8 sps:$4 sm:$0xff]  }
  0x1e   : > { %v2012_v7 = vld [vmem:[%s2129_s16 + $0x190] ss:$8 sps:$4 sm:$0xff]   ;;  %v2013_v8 = vld [vmem:[%s2129_s16 + $0xa4] ss:$8 sps:$4 sm:$0xff]   ;;  %v2017_v10 = vld [vmem:[%s2129_s16 + $0xa0] ss:$8 sps:$4 sm:$0xff]  }
  0x1f   : > { %780 = vmatpush1.bf16.msra.mxu0 %v1925_v14  ;;  %1887 = vmatpush1.bf16.msra.mxu1 %v1925_v14  ;;  %v2015_v9 = vld [vmem:[%s2129_s16 + $0x1a4] ss:$8 sps:$4 sm:$0xff]   ;;  %v2018_v11 = vld [vmem:[%s2129_s16 + $0x1a0] ss:$8 sps:$4 sm:$0xff]   ;;  %v2019_v12 = vld [vmem:[%s2129_s16 + $0xb4] ss:$8 sps:$4 sm:$0xff]  }
  0x20   : > { %781 = vmatprep.subr.bf16.mxu0 %v1926_v16  ;;  %1872 = vmatprep.subr.bf16.mxu1 %v1926_v16  ;;  %v2021_v13 = vld [vmem:[%s2129_s16 + $0x1b4] ss:$8 sps:$4 sm:$0xff]   ;;  %v2023_v14 = vld [vmem:[%s2129_s16 + $0xb0] ss:$8 sps:$4 sm:$0xff]   ;;  %v2025_v16 = vld [vmem:[%s2129_s16 + $0xc4] ss:$8 sps:$4 sm:$0xff]  }
  0x21   : > { %v2024_v15 = vld [vmem:[%s2129_s16 + $0x1b0] ss:$8 sps:$4 sm:$0xff]  }
  0x23   : > { %782 = vmatpush1.bf16.msra.mxu0 %v1928_v17  ;;  %1888 = vmatpush1.bf16.msra.mxu1 %v1928_v17  ;;  %v2027_v17 = vld [vmem:[%s2129_s16 + $0x1c4] ss:$8 sps:$4 sm:$0xff]  }
  0x24   : > { %783 = vmatprep.subr.bf16.mxu0 %v1929_v18  ;;  %1873 = vmatprep.subr.bf16.mxu1 %v1929_v18  ;;  %v2029_v18 = vld [vmem:[%s2129_s16 + $0xc0] ss:$8 sps:$4 sm:$0xff]  }
  0x27   : > { %784 = vmatpush1.bf16.msra.mxu0 %v1931_v19  ;;  %1889 = vmatpush1.bf16.msra.mxu1 %v1931_v19  ;;  %v2030_v19 = vld [vmem:[%s2129_s16 + $0x1c0] ss:$8 sps:$4 sm:$0xff]  }
  0x28   : > { %785 = vmatprep.subr.bf16.mxu0 %v1932_v20  ;;  %1874 = vmatprep.subr.bf16.mxu1 %v1932_v20  ;;  %v2031_v20 = vld [vmem:[%s2129_s16 + $0xd4] ss:$8 sps:$4 sm:$0xff]  }
  0x2b   : > { %786 = vmatpush1.bf16.msra.mxu0 %v1934_v21  ;;  %1890 = vmatpush1.bf16.msra.mxu1 %v1934_v21  ;;  %v2033_v21 = vld [vmem:[%s2129_s16 + $0x1d4] ss:$8 sps:$4 sm:$0xff]  }
  0x2c   : > { %787 = vmatprep.subr.bf16.mxu0 %v1935_v22  ;;  %1875 = vmatprep.subr.bf16.mxu1 %v1935_v22  ;;  %v2035_v22 = vld [vmem:[%s2129_s16 + $0xd0] ss:$8 sps:$4 sm:$0xff]  }
  0x2f   : > { %788 = vmatpush1.bf16.msra.mxu0 %v1937_v23  ;;  %1891 = vmatpush1.bf16.msra.mxu1 %v1937_v23  ;;  %v2036_v23 = vld [vmem:[%s2129_s16 + $0x1d0] ss:$8 sps:$4 sm:$0xff]  }
  0x30   : > { %789 = vmatprep.subr.bf16.mxu0 %v1938_v24  ;;  %1876 = vmatprep.subr.bf16.mxu1 %v1938_v24  ;;  %v2037_v24 = vld [vmem:[%s2129_s16 + $0xe4] ss:$8 sps:$4 sm:$0xff]  }
  0x33   : > { %790 = vmatpush1.bf16.msra.mxu0 %v1940_v25  ;;  %1892 = vmatpush1.bf16.msra.mxu1 %v1940_v25  ;;  %v2039_v25 = vld [vmem:[%s2129_s16 + $0x1e4] ss:$8 sps:$4 sm:$0xff]  }
  0x34   : > { %791 = vmatprep.subr.bf16.mxu0 %v1941_v26  ;;  %1877 = vmatprep.subr.bf16.mxu1 %v1941_v26  ;;  %v2041_v26 = vld [vmem:[%s2129_s16 + $0xe0] ss:$8 sps:$4 sm:$0xff]  }
  0x37   : > { %792 = vmatpush1.bf16.msra.mxu0 %v1943_v27  ;;  %1893 = vmatpush1.bf16.msra.mxu1 %v1943_v27  ;;  %v2042_v27 = vld [vmem:[%s2129_s16 + $0x1e0] ss:$8 sps:$4 sm:$0xff]  }
  0x38   : > { %793 = vmatprep.subr.bf16.mxu0 %v1944_v28  ;;  %1878 = vmatprep.subr.bf16.mxu1 %v1944_v28  ;;  %v2043_v28 = vld [vmem:[%s2129_s16 + $0xf4] ss:$8 sps:$4 sm:$0xff]  }
  0x3b   : > { %794 = vmatpush1.bf16.msra.mxu0 %v1946_v29  ;;  %1894 = vmatpush1.bf16.msra.mxu1 %v1946_v29  ;;  %v2045_v29 = vld [vmem:[%s2129_s16 + $0x1f4] ss:$8 sps:$4 sm:$0xff]  }
  0x3c   : > { %795 = vmatprep.subr.bf16.mxu0 %v1947_v30  ;;  %1879 = vmatprep.subr.bf16.mxu1 %v1947_v30  ;;  %v2047_v30 = vld [vmem:[%s2129_s16 + $0xf0] ss:$8 sps:$4 sm:$0xff]  }
  0x3f   : > { %796 = vmatpush1.bf16.msra.mxu0 %v1949_v31  ;;  %1895 = vmatpush1.bf16.msra.mxu1 %v1949_v31  ;;  %v2048_v31 = vld [vmem:[%s2129_s16 + $0x1f0] ss:$8 sps:$4 sm:$0xff]  }
  0x40   : > { %797 = vmatprep.subr.bf16.mxu0 %v1950_v32  ;;  %1880 = vmatprep.subr.bf16.mxu1 %v1950_v32  ;;  %v277_v32 = vlaneseq }
  0x43   : > { %798 = vmatpush1.bf16.msra.mxu0 %v1952_v33  ;;  %1896 = vmatpush1.bf16.msra.mxu1 %v1952_v33  ;;  %v278_v33 = vshrl.u32 %v277_v32, 7 }
  0x46   : > { %800 = vmatmul.mubr.bf16.vlgmr.msra.gmra.mrb[0].mxu0 %v1953_v34  ;;  %960 = vmatmul.mubr.bf16.vlgmr.msra.gmra.mrb[0].mxu1 %v1956_v35  ;;  %v279_v34 = vsub.s32 0, %v278_v33  ;;  %v275_v35 = vld [vmem:[%s2466_s2] sm:$0x3] }
  0x47   : > { %809 = vmatprep.mubr.bf16.mxu0 %v1959_v36  ;;  %969 = vmatprep.mubr.bf16.mxu1 %v1961_v37  ;;  %v283_v36 = vsub.s32 1, %v278_v33 }
  0x48   : > { %v2258_v37 = vrot.slane %v275_v35, %v279_v34 }
  0x4e   : > { %810 = vmatmul.mubr.bf16.gmra.mrb[4].mxu0 %v1963_v38  ;;  %970 = vmatmul.mubr.bf16.gmra.mrb[4].mxu1 %v1964_v39  ;;  %v2260_v38 = vrot.slane %v275_v35, %v283_v36 }
  0x4f   : > { %819 = vmatprep.mubr.bf16.mxu0 %v1965_v40  ;;  %979 = vmatprep.mubr.bf16.mxu1 %v1967_v41 }
  0x56   : > { %820 = vmatmul.mubr.bf16.gmra.mrb[8].mxu0 %v1969_v42  ;;  %980 = vmatmul.mubr.bf16.gmra.mrb[8].mxu1 %v1970_v43 }
  0x57   : > { %829 = vmatprep.mubr.bf16.mxu0 %v1971_v44  ;;  %989 = vmatprep.mubr.bf16.mxu1 %v1973_v45 }
  0x5e   : > { %830 = vmatmul.mubr.bf16.gmra.mrb[12].mxu0 %v1975_v46  ;;  %990 = vmatmul.mubr.bf16.gmra.mrb[12].mxu1 %v1976_v47 }
  0x5f   : > { %839 = vmatprep.mubr.bf16.mxu0 %v1977_v48  ;;  %999 = vmatprep.mubr.bf16.mxu1 %v1979_v49 }
  0x66   : > { %840 = vmatmul.mubr.bf16.gmra.mrb[16].mxu0 %v1981_v50  ;;  %1000 = vmatmul.mubr.bf16.gmra.mrb[16].mxu1 %v1982_v51 }
  0x67   : > { %849 = vmatprep.mubr.bf16.mxu0 %v1983_v52  ;;  %1009 = vmatprep.mubr.bf16.mxu1 %v1985_v53 }
  0x6e   : > { %850 = vmatmul.mubr.bf16.gmra.mrb[20].mxu0 %v1987_v54  ;;  %1010 = vmatmul.mubr.bf16.gmra.mrb[20].mxu1 %v1988_v55 }
  0x6f   : > { %859 = vmatprep.mubr.bf16.mxu0 %v1989_v56  ;;  %1019 = vmatprep.mubr.bf16.mxu1 %v1991_v57 }
  0x76   : > { %860 = vmatmul.mubr.bf16.gmra.mrb[24].mxu0 %v1993_v58  ;;  %1020 = vmatmul.mubr.bf16.gmra.mrb[24].mxu1 %v1994_v59 }
  0x77   : > { %869 = vmatprep.mubr.bf16.mxu0 %v1995_v60  ;;  %1029 = vmatprep.mubr.bf16.mxu1 %v1997_v61 }
  0x7e   : > { %870 = vmatmul.mubr.bf16.gmra.mrb[28].mxu0 %v1999_v62  ;;  %1030 = vmatmul.mubr.bf16.gmra.mrb[28].mxu1 %v2000_v63 }
  0x7f   : > { %879 = vmatprep.mubr.bf16.mxu0 %v2001_v0  ;;  %1039 = vmatprep.mubr.bf16.mxu1 %v2003_v1 }
  0x86   : > { %880 = vmatmul.mubr.bf16.gmra.mrb[32].mxu0 %v2005_v2  ;;  %1040 = vmatmul.mubr.bf16.gmra.mrb[32].mxu1 %v2006_v3 }
  0x87   : > { %889 = vmatprep.mubr.bf16.mxu0 %v2007_v4  ;;  %1049 = vmatprep.mubr.bf16.mxu1 %v2009_v5 }
  0x8e   : > { %890 = vmatmul.mubr.bf16.gmra.mrb[36].mxu0 %v2011_v6  ;;  %1050 = vmatmul.mubr.bf16.gmra.mrb[36].mxu1 %v2012_v7 }
  0x8f   : > { %899 = vmatprep.mubr.bf16.mxu0 %v2013_v8  ;;  %1059 = vmatprep.mubr.bf16.mxu1 %v2015_v9 }
  0x96   : > { %900 = vmatmul.mubr.bf16.gmra.mrb[40].mxu0 %v2017_v10  ;;  %1060 = vmatmul.mubr.bf16.gmra.mrb[40].mxu1 %v2018_v11 }
  0x97   : > { %909 = vmatprep.mubr.bf16.mxu0 %v2019_v12  ;;  %1069 = vmatprep.mubr.bf16.mxu1 %v2021_v13 }
  0x9e   : > { %910 = vmatmul.mubr.bf16.gmra.mrb[44].mxu0 %v2023_v14  ;;  %1070 = vmatmul.mubr.bf16.gmra.mrb[44].mxu1 %v2024_v15 }
  0x9f   : > { %919 = vmatprep.mubr.bf16.mxu0 %v2025_v16  ;;  %1079 = vmatprep.mubr.bf16.mxu1 %v2027_v17 }
  0xa6   : > { %920 = vmatmul.mubr.bf16.gmra.mrb[48].mxu0 %v2029_v18  ;;  %1080 = vmatmul.mubr.bf16.gmra.mrb[48].mxu1 %v2030_v19 }
  0xa7   : > { %929 = vmatprep.mubr.bf16.mxu0 %v2031_v20  ;;  %1089 = vmatprep.mubr.bf16.mxu1 %v2033_v21 }
  0xae   : > { %930 = vmatmul.mubr.bf16.gmra.mrb[52].mxu0 %v2035_v22  ;;  %1090 = vmatmul.mubr.bf16.gmra.mrb[52].mxu1 %v2036_v23 }
  0xaf   : > { %939 = vmatprep.mubr.bf16.mxu0 %v2037_v24  ;;  %1099 = vmatprep.mubr.bf16.mxu1 %v2039_v25 }
  0xb6   : > { %940 = vmatmul.mubr.bf16.gmra.mrb[56].mxu0 %v2041_v26  ;;  %1100 = vmatmul.mubr.bf16.gmra.mrb[56].mxu1 %v2042_v27 }
  0xb7   : > { %949 = vmatprep.mubr.bf16.mxu0 %v2043_v28  ;;  %1109 = vmatprep.mubr.bf16.mxu1 %v2045_v29 }
  0xbe   : > { %950 = vmatmul.mubr.bf16.gmra.mrb[60].mxu0 %v2047_v30  ;;  %1110 = vmatmul.mubr.bf16.gmra.mrb[60].mxu1 %v2048_v31 }
 0x119   : > { %v801_v39 = vpop.f32.mrb[0].mxu0  ;;  %v961_v40 = vpop.f32.mrb[0].mxu1 }
 0x11a   : > { %v802_v41 = vadd.f32 %v801_v39, %v2258_v37  ;;  %v962_v42 = vadd.f32 %v961_v40, %v2258_v37  ;;  %v803_v43 = vpop.f32.mrb[1].mxu0  ;;  %v963_v44 = vpop.f32.mrb[1].mxu1 }
 0x11b   : > { %v804_v45 = vadd.f32 %v803_v43, %v2260_v38  ;;  %v964_v46 = vadd.f32 %v963_v44, %v2260_v38  ;;  %v805_v47 = vpop.f32.mrb[2].mxu0  ;;  %v965_v48 = vpop.f32.mrb[2].mxu1 }
 0x11c   : > { %v806_v49 = vadd.f32 %v805_v47, %v2258_v37  ;;  %v966_v50 = vadd.f32 %v965_v48, %v2258_v37  ;;  %v807_v51 = vpop.f32.mrb[3].mxu0  ;;  %v967_v52 = vpop.f32.mrb[3].mxu1 }
 0x11d   : > { %v1801_v53 = vpack.c.bf16 %v804_v45, %v802_v41  ;;  %v1833_v54 = vpack.c.bf16 %v964_v46, %v962_v42  ;;  %v808_v55 = vadd.f32 %v807_v51, %v2260_v38  ;;  %v968_v56 = vadd.f32 %v967_v52, %v2260_v38 }
 0x11f   : > { %1504 = vst [vmem:[%s2271_s13] sm:$0xff] %v1801_v53  ;;  %1536 = vst [vmem:[%s2271_s13 + $0x100] sm:$0xff] %v1833_v54  ;;  %v1802_v57 = vpack.c.bf16 %v808_v55, %v806_v49  ;;  %v1834_v58 = vpack.c.bf16 %v968_v56, %v966_v50 }
 0x121   : > { %1505 = vst [vmem:[%s2271_s13 + $0x8] sm:$0xff] %v1802_v57  ;;  %1537 = vst [vmem:[%s2271_s13 + $0x108] sm:$0xff] %v1834_v58  ;;  %v811_v59 = vpop.f32.mrb[4].mxu0  ;;  %v971_v60 = vpop.f32.mrb[4].mxu1 }
 0x122   : > { %v812_v61 = vadd.f32 %v811_v59, %v2258_v37  ;;  %v972_v62 = vadd.f32 %v971_v60, %v2258_v37  ;;  %v813_v63 = vpop.f32.mrb[5].mxu0  ;;  %v973_v0 = vpop.f32.mrb[5].mxu1 }
 0x123   : > { %v814_v1 = vadd.f32 %v813_v63, %v2260_v38  ;;  %v974_v2 = vadd.f32 %v973_v0, %v2260_v38  ;;  %v815_v3 = vpop.f32.mrb[6].mxu0  ;;  %v975_v4 = vpop.f32.mrb[6].mxu1 }
 0x124   : > { %v816_v5 = vadd.f32 %v815_v3, %v2258_v37  ;;  %v976_v6 = vadd.f32 %v975_v4, %v2258_v37  ;;  %v817_v7 = vpop.f32.mrb[7].mxu0  ;;  %v977_v8 = vpop.f32.mrb[7].mxu1 }
 0x125   : > { %v1803_v9 = vpack.c.bf16 %v814_v1, %v812_v61  ;;  %v1835_v10 = vpack.c.bf16 %v974_v2, %v972_v62  ;;  %v818_v11 = vadd.f32 %v817_v7, %v2260_v38  ;;  %v978_v12 = vadd.f32 %v977_v8, %v2260_v38 }
 0x127   : > { %1506 = vst [vmem:[%s2271_s13 + $0x10] sm:$0xff] %v1803_v9  ;;  %1538 = vst [vmem:[%s2271_s13 + $0x110] sm:$0xff] %v1835_v10  ;;  %v1804_v13 = vpack.c.bf16 %v818_v11, %v816_v5  ;;  %v1836_v14 = vpack.c.bf16 %v978_v12, %v976_v6 }
 0x129   : > { %1507 = vst [vmem:[%s2271_s13 + $0x18] sm:$0xff] %v1804_v13  ;;  %1539 = vst [vmem:[%s2271_s13 + $0x118] sm:$0xff] %v1836_v14  ;;  %v821_v15 = vpop.f32.mrb[8].mxu0  ;;  %v981_v16 = vpop.f32.mrb[8].mxu1 }
 0x12a   : > { %v822_v17 = vadd.f32 %v821_v15, %v2258_v37  ;;  %v982_v18 = vadd.f32 %v981_v16, %v2258_v37  ;;  %v823_v19 = vpop.f32.mrb[9].mxu0  ;;  %v983_v20 = vpop.f32.mrb[9].mxu1 }
 0x12b   : > { %v824_v21 = vadd.f32 %v823_v19, %v2260_v38  ;;  %v984_v22 = vadd.f32 %v983_v20, %v2260_v38  ;;  %v825_v23 = vpop.f32.mrb[10].mxu0  ;;  %v985_v24 = vpop.f32.mrb[10].mxu1 }
 0x12c   : > { %v826_v25 = vadd.f32 %v825_v23, %v2258_v37  ;;  %v986_v26 = vadd.f32 %v985_v24, %v2258_v37  ;;  %v827_v27 = vpop.f32.mrb[11].mxu0  ;;  %v987_v28 = vpop.f32.mrb[11].mxu1 }
 0x12d   : > { %v1805_v29 = vpack.c.bf16 %v824_v21, %v822_v17  ;;  %v1837_v30 = vpack.c.bf16 %v984_v22, %v982_v18  ;;  %v828_v31 = vadd.f32 %v827_v27, %v2260_v38  ;;  %v988_v32 = vadd.f32 %v987_v28, %v2260_v38 }
 0x12f   : > { %1508 = vst [vmem:[%s2271_s13 + $0x20] sm:$0xff] %v1805_v29  ;;  %1540 = vst [vmem:[%s2271_s13 + $0x120] sm:$0xff] %v1837_v30  ;;  %v1806_v33 = vpack.c.bf16 %v828_v31, %v826_v25  ;;  %v1838_v34 = vpack.c.bf16 %v988_v32, %v986_v26 }
 0x131   : > { %1509 = vst [vmem:[%s2271_s13 + $0x28] sm:$0xff] %v1806_v33  ;;  %1541 = vst [vmem:[%s2271_s13 + $0x128] sm:$0xff] %v1838_v34  ;;  %v831_v35 = vpop.f32.mrb[12].mxu0  ;;  %v991_v36 = vpop.f32.mrb[12].mxu1 }
 0x132   : > { %v832_v39 = vadd.f32 %v831_v35, %v2258_v37  ;;  %v992_v40 = vadd.f32 %v991_v36, %v2258_v37  ;;  %v833_v41 = vpop.f32.mrb[13].mxu0  ;;  %v993_v42 = vpop.f32.mrb[13].mxu1 }
 0x133   : > { %v834_v43 = vadd.f32 %v833_v41, %v2260_v38  ;;  %v994_v44 = vadd.f32 %v993_v42, %v2260_v38  ;;  %v835_v45 = vpop.f32.mrb[14].mxu0  ;;  %v995_v46 = vpop.f32.mrb[14].mxu1 }
 0x134   : > { %v836_v47 = vadd.f32 %v835_v45, %v2258_v37  ;;  %v996_v48 = vadd.f32 %v995_v46, %v2258_v37  ;;  %v837_v49 = vpop.f32.mrb[15].mxu0  ;;  %v997_v50 = vpop.f32.mrb[15].mxu1 }
 0x135   : > { %v1807_v51 = vpack.c.bf16 %v834_v43, %v832_v39  ;;  %v1839_v52 = vpack.c.bf16 %v994_v44, %v992_v40  ;;  %v838_v53 = vadd.f32 %v837_v49, %v2260_v38  ;;  %v998_v54 = vadd.f32 %v997_v50, %v2260_v38 }
 0x137   : > { %1510 = vst [vmem:[%s2271_s13 + $0x30] sm:$0xff] %v1807_v51  ;;  %1542 = vst [vmem:[%s2271_s13 + $0x130] sm:$0xff] %v1839_v52  ;;  %v1808_v55 = vpack.c.bf16 %v838_v53, %v836_v47  ;;  %v1840_v56 = vpack.c.bf16 %v998_v54, %v996_v48 }
 0x139   : > { %1511 = vst [vmem:[%s2271_s13 + $0x38] sm:$0xff] %v1808_v55  ;;  %1543 = vst [vmem:[%s2271_s13 + $0x138] sm:$0xff] %v1840_v56  ;;  %v841_v57 = vpop.f32.mrb[16].mxu0  ;;  %v1001_v58 = vpop.f32.mrb[16].mxu1 }
 0x13a   : > { %v842_v59 = vadd.f32 %v841_v57, %v2258_v37  ;;  %v1002_v60 = vadd.f32 %v1001_v58, %v2258_v37  ;;  %v843_v61 = vpop.f32.mrb[17].mxu0  ;;  %v1003_v62 = vpop.f32.mrb[17].mxu1 }
 0x13b   : > { %v844_v63 = vadd.f32 %v843_v61, %v2260_v38  ;;  %v1004_v0 = vadd.f32 %v1003_v62, %v2260_v38  ;;  %v845_v1 = vpop.f32.mrb[18].mxu0  ;;  %v1005_v2 = vpop.f32.mrb[18].mxu1 }
 0x13c   : > { %v846_v3 = vadd.f32 %v845_v1, %v2258_v37  ;;  %v1006_v4 = vadd.f32 %v1005_v2, %v2258_v37  ;;  %v847_v5 = vpop.f32.mrb[19].mxu0  ;;  %v1007_v6 = vpop.f32.mrb[19].mxu1 }
 0x13d   : > { %v1809_v7 = vpack.c.bf16 %v844_v63, %v842_v59  ;;  %v1841_v8 = vpack.c.bf16 %v1004_v0, %v1002_v60  ;;  %v848_v9 = vadd.f32 %v847_v5, %v2260_v38  ;;  %v1008_v10 = vadd.f32 %v1007_v6, %v2260_v38 }
 0x13f   : > { %1512 = vst [vmem:[%s2271_s13 + $0x40] sm:$0xff] %v1809_v7  ;;  %1544 = vst [vmem:[%s2271_s13 + $0x140] sm:$0xff] %v1841_v8  ;;  %v1810_v11 = vpack.c.bf16 %v848_v9, %v846_v3  ;;  %v1842_v12 = vpack.c.bf16 %v1008_v10, %v1006_v4 }
 0x141   : > { %1513 = vst [vmem:[%s2271_s13 + $0x48] sm:$0xff] %v1810_v11  ;;  %1545 = vst [vmem:[%s2271_s13 + $0x148] sm:$0xff] %v1842_v12  ;;  %v851_v13 = vpop.f32.mrb[20].mxu0  ;;  %v1011_v14 = vpop.f32.mrb[20].mxu1 }
 0x142   : > { %v852_v15 = vadd.f32 %v851_v13, %v2258_v37  ;;  %v1012_v16 = vadd.f32 %v1011_v14, %v2258_v37  ;;  %v853_v17 = vpop.f32.mrb[21].mxu0  ;;  %v1013_v18 = vpop.f32.mrb[21].mxu1 }
 0x143   : > { %v854_v19 = vadd.f32 %v853_v17, %v2260_v38  ;;  %v1014_v20 = vadd.f32 %v1013_v18, %v2260_v38  ;;  %v855_v21 = vpop.f32.mrb[22].mxu0  ;;  %v1015_v22 = vpop.f32.mrb[22].mxu1 }
 0x144   : > { %v856_v23 = vadd.f32 %v855_v21, %v2258_v37  ;;  %v1016_v24 = vadd.f32 %v1015_v22, %v2258_v37  ;;  %v857_v25 = vpop.f32.mrb[23].mxu0  ;;  %v1017_v26 = vpop.f32.mrb[23].mxu1 }
 0x145   : > { %v1811_v27 = vpack.c.bf16 %v854_v19, %v852_v15  ;;  %v1843_v28 = vpack.c.bf16 %v1014_v20, %v1012_v16  ;;  %v858_v29 = vadd.f32 %v857_v25, %v2260_v38  ;;  %v1018_v30 = vadd.f32 %v1017_v26, %v2260_v38 }
 0x147   : > { %1514 = vst [vmem:[%s2271_s13 + $0x50] sm:$0xff] %v1811_v27  ;;  %1546 = vst [vmem:[%s2271_s13 + $0x150] sm:$0xff] %v1843_v28  ;;  %v1812_v31 = vpack.c.bf16 %v858_v29, %v856_v23  ;;  %v1844_v32 = vpack.c.bf16 %v1018_v30, %v1016_v24 }
 0x149   : > { %1515 = vst [vmem:[%s2271_s13 + $0x58] sm:$0xff] %v1812_v31  ;;  %1547 = vst [vmem:[%s2271_s13 + $0x158] sm:$0xff] %v1844_v32  ;;  %v861_v33 = vpop.f32.mrb[24].mxu0  ;;  %v1021_v34 = vpop.f32.mrb[24].mxu1 }
 0x14a   : > { %v862_v35 = vadd.f32 %v861_v33, %v2258_v37  ;;  %v1022_v36 = vadd.f32 %v1021_v34, %v2258_v37  ;;  %v863_v39 = vpop.f32.mrb[25].mxu0  ;;  %v1023_v40 = vpop.f32.mrb[25].mxu1 }
 0x14b   : > { %v864_v41 = vadd.f32 %v863_v39, %v2260_v38  ;;  %v1024_v42 = vadd.f32 %v1023_v40, %v2260_v38  ;;  %v865_v43 = vpop.f32.mrb[26].mxu0  ;;  %v1025_v44 = vpop.f32.mrb[26].mxu1 }
 0x14c   : > { %v866_v45 = vadd.f32 %v865_v43, %v2258_v37  ;;  %v1026_v46 = vadd.f32 %v1025_v44, %v2258_v37  ;;  %v867_v47 = vpop.f32.mrb[27].mxu0  ;;  %v1027_v48 = vpop.f32.mrb[27].mxu1 }
 0x14d   : > { %v1813_v49 = vpack.c.bf16 %v864_v41, %v862_v35  ;;  %v1845_v50 = vpack.c.bf16 %v1024_v42, %v1022_v36  ;;  %v868_v51 = vadd.f32 %v867_v47, %v2260_v38  ;;  %v1028_v52 = vadd.f32 %v1027_v48, %v2260_v38 }
 0x14f   : > { %1516 = vst [vmem:[%s2271_s13 + $0x60] sm:$0xff] %v1813_v49  ;;  %1548 = vst [vmem:[%s2271_s13 + $0x160] sm:$0xff] %v1845_v50  ;;  %v1814_v53 = vpack.c.bf16 %v868_v51, %v866_v45  ;;  %v1846_v54 = vpack.c.bf16 %v1028_v52, %v1026_v46 }
 0x151   : > { %1517 = vst [vmem:[%s2271_s13 + $0x68] sm:$0xff] %v1814_v53  ;;  %1549 = vst [vmem:[%s2271_s13 + $0x168] sm:$0xff] %v1846_v54  ;;  %v871_v55 = vpop.f32.mrb[28].mxu0  ;;  %v1031_v56 = vpop.f32.mrb[28].mxu1 }
 0x152   : > { %v872_v57 = vadd.f32 %v871_v55, %v2258_v37  ;;  %v1032_v58 = vadd.f32 %v1031_v56, %v2258_v37  ;;  %v873_v59 = vpop.f32.mrb[29].mxu0  ;;  %v1033_v60 = vpop.f32.mrb[29].mxu1 }
 0x153   : > { %v874_v61 = vadd.f32 %v873_v59, %v2260_v38  ;;  %v1034_v62 = vadd.f32 %v1033_v60, %v2260_v38  ;;  %v875_v63 = vpop.f32.mrb[30].mxu0  ;;  %v1035_v0 = vpop.f32.mrb[30].mxu1 }
 0x154   : > { %v876_v1 = vadd.f32 %v875_v63, %v2258_v37  ;;  %v1036_v2 = vadd.f32 %v1035_v0, %v2258_v37  ;;  %v877_v3 = vpop.f32.mrb[31].mxu0  ;;  %v1037_v4 = vpop.f32.mrb[31].mxu1 }
 0x155   : > { %v1815_v5 = vpack.c.bf16 %v874_v61, %v872_v57  ;;  %v1847_v6 = vpack.c.bf16 %v1034_v62, %v1032_v58  ;;  %v878_v7 = vadd.f32 %v877_v3, %v2260_v38  ;;  %v1038_v8 = vadd.f32 %v1037_v4, %v2260_v38 }
 0x157   : > { %1518 = vst [vmem:[%s2271_s13 + $0x70] sm:$0xff] %v1815_v5  ;;  %1550 = vst [vmem:[%s2271_s13 + $0x170] sm:$0xff] %v1847_v6  ;;  %v1816_v9 = vpack.c.bf16 %v878_v7, %v876_v1  ;;  %v1848_v10 = vpack.c.bf16 %v1038_v8, %v1036_v2 }
 0x159   : > { %1519 = vst [vmem:[%s2271_s13 + $0x78] sm:$0xff] %v1816_v9  ;;  %1551 = vst [vmem:[%s2271_s13 + $0x178] sm:$0xff] %v1848_v10  ;;  %v881_v11 = vpop.f32.mrb[32].mxu0  ;;  %v1041_v12 = vpop.f32.mrb[32].mxu1 }
 0x15a   : > { %v882_v13 = vadd.f32 %v881_v11, %v2258_v37  ;;  %v1042_v14 = vadd.f32 %v1041_v12, %v2258_v37  ;;  %v883_v15 = vpop.f32.mrb[33].mxu0  ;;  %v1043_v16 = vpop.f32.mrb[33].mxu1 }
 0x15b   : > { %v884_v17 = vadd.f32 %v883_v15, %v2260_v38  ;;  %v1044_v18 = vadd.f32 %v1043_v16, %v2260_v38  ;;  %v885_v19 = vpop.f32.mrb[34].mxu0  ;;  %v1045_v20 = vpop.f32.mrb[34].mxu1 }
 0x15c   : > { %v886_v21 = vadd.f32 %v885_v19, %v2258_v37  ;;  %v1046_v22 = vadd.f32 %v1045_v20, %v2258_v37  ;;  %v887_v23 = vpop.f32.mrb[35].mxu0  ;;  %v1047_v24 = vpop.f32.mrb[35].mxu1 }
 0x15d   : > { %v1817_v25 = vpack.c.bf16 %v884_v17, %v882_v13  ;;  %v1849_v26 = vpack.c.bf16 %v1044_v18, %v1042_v14  ;;  %v888_v27 = vadd.f32 %v887_v23, %v2260_v38  ;;  %v1048_v28 = vadd.f32 %v1047_v24, %v2260_v38 }
 0x15f   : > { %1520 = vst [vmem:[%s2271_s13 + $0x80] sm:$0xff] %v1817_v25  ;;  %1552 = vst [vmem:[%s2271_s13 + $0x180] sm:$0xff] %v1849_v26  ;;  %v1818_v29 = vpack.c.bf16 %v888_v27, %v886_v21  ;;  %v1850_v30 = vpack.c.bf16 %v1048_v28, %v1046_v22 }
 0x161   : > { %1521 = vst [vmem:[%s2271_s13 + $0x88] sm:$0xff] %v1818_v29  ;;  %1553 = vst [vmem:[%s2271_s13 + $0x188] sm:$0xff] %v1850_v30  ;;  %v891_v31 = vpop.f32.mrb[36].mxu0  ;;  %v1051_v32 = vpop.f32.mrb[36].mxu1 }
 0x162   : > { %v892_v33 = vadd.f32 %v891_v31, %v2258_v37  ;;  %v1052_v34 = vadd.f32 %v1051_v32, %v2258_v37  ;;  %v893_v35 = vpop.f32.mrb[37].mxu0  ;;  %v1053_v36 = vpop.f32.mrb[37].mxu1 }
 0x163   : > { %v894_v39 = vadd.f32 %v893_v35, %v2260_v38  ;;  %v1054_v40 = vadd.f32 %v1053_v36, %v2260_v38  ;;  %v895_v41 = vpop.f32.mrb[38].mxu0  ;;  %v1055_v42 = vpop.f32.mrb[38].mxu1 }
 0x164   : > { %v896_v43 = vadd.f32 %v895_v41, %v2258_v37  ;;  %v1056_v44 = vadd.f32 %v1055_v42, %v2258_v37  ;;  %v897_v45 = vpop.f32.mrb[39].mxu0  ;;  %v1057_v46 = vpop.f32.mrb[39].mxu1 }
 0x165   : > { %v1819_v47 = vpack.c.bf16 %v894_v39, %v892_v33  ;;  %v1851_v48 = vpack.c.bf16 %v1054_v40, %v1052_v34  ;;  %v898_v49 = vadd.f32 %v897_v45, %v2260_v38  ;;  %v1058_v50 = vadd.f32 %v1057_v46, %v2260_v38 }
 0x167   : > { %1522 = vst [vmem:[%s2271_s13 + $0x90] sm:$0xff] %v1819_v47  ;;  %1554 = vst [vmem:[%s2271_s13 + $0x190] sm:$0xff] %v1851_v48  ;;  %v1820_v51 = vpack.c.bf16 %v898_v49, %v896_v43  ;;  %v1852_v52 = vpack.c.bf16 %v1058_v50, %v1056_v44 }
 0x169   : > { %1523 = vst [vmem:[%s2271_s13 + $0x98] sm:$0xff] %v1820_v51  ;;  %1555 = vst [vmem:[%s2271_s13 + $0x198] sm:$0xff] %v1852_v52  ;;  %v901_v53 = vpop.f32.mrb[40].mxu0  ;;  %v1061_v54 = vpop.f32.mrb[40].mxu1 }
 0x16a   : > { %v902_v55 = vadd.f32 %v901_v53, %v2258_v37  ;;  %v1062_v56 = vadd.f32 %v1061_v54, %v2258_v37  ;;  %v903_v57 = vpop.f32.mrb[41].mxu0  ;;  %v1063_v58 = vpop.f32.mrb[41].mxu1 }
 0x16b   : > { %v904_v59 = vadd.f32 %v903_v57, %v2260_v38  ;;  %v1064_v60 = vadd.f32 %v1063_v58, %v2260_v38  ;;  %v905_v61 = vpop.f32.mrb[42].mxu0  ;;  %v1065_v62 = vpop.f32.mrb[42].mxu1 }
 0x16c   : > { %v906_v63 = vadd.f32 %v905_v61, %v2258_v37  ;;  %v1066_v0 = vadd.f32 %v1065_v62, %v2258_v37  ;;  %v907_v1 = vpop.f32.mrb[43].mxu0  ;;  %v1067_v2 = vpop.f32.mrb[43].mxu1 }
 0x16d   : > { %v1821_v3 = vpack.c.bf16 %v904_v59, %v902_v55  ;;  %v1853_v4 = vpack.c.bf16 %v1064_v60, %v1062_v56  ;;  %v908_v5 = vadd.f32 %v907_v1, %v2260_v38  ;;  %v1068_v6 = vadd.f32 %v1067_v2, %v2260_v38 }
 0x16f   : > { %1524 = vst [vmem:[%s2271_s13 + $0xa0] sm:$0xff] %v1821_v3  ;;  %1556 = vst [vmem:[%s2271_s13 + $0x1a0] sm:$0xff] %v1853_v4  ;;  %v1822_v7 = vpack.c.bf16 %v908_v5, %v906_v63  ;;  %v1854_v8 = vpack.c.bf16 %v1068_v6, %v1066_v0 }
 0x171   : > { %1525 = vst [vmem:[%s2271_s13 + $0xa8] sm:$0xff] %v1822_v7  ;;  %1557 = vst [vmem:[%s2271_s13 + $0x1a8] sm:$0xff] %v1854_v8  ;;  %v911_v9 = vpop.f32.mrb[44].mxu0  ;;  %v1071_v10 = vpop.f32.mrb[44].mxu1 }
 0x172   : > { %v912_v11 = vadd.f32 %v911_v9, %v2258_v37  ;;  %v1072_v12 = vadd.f32 %v1071_v10, %v2258_v37  ;;  %v913_v13 = vpop.f32.mrb[45].mxu0  ;;  %v1073_v14 = vpop.f32.mrb[45].mxu1 }
 0x173   : > { %v914_v15 = vadd.f32 %v913_v13, %v2260_v38  ;;  %v1074_v16 = vadd.f32 %v1073_v14, %v2260_v38  ;;  %v915_v17 = vpop.f32.mrb[46].mxu0  ;;  %v1075_v18 = vpop.f32.mrb[46].mxu1 }
 0x174   : > { %v916_v19 = vadd.f32 %v915_v17, %v2258_v37  ;;  %v1076_v20 = vadd.f32 %v1075_v18, %v2258_v37  ;;  %v917_v21 = vpop.f32.mrb[47].mxu0  ;;  %v1077_v22 = vpop.f32.mrb[47].mxu1 }
 0x175   : > { %v1823_v23 = vpack.c.bf16 %v914_v15, %v912_v11  ;;  %v1855_v24 = vpack.c.bf16 %v1074_v16, %v1072_v12  ;;  %v918_v25 = vadd.f32 %v917_v21, %v2260_v38  ;;  %v1078_v26 = vadd.f32 %v1077_v22, %v2260_v38 }
 0x177   : > { %1526 = vst [vmem:[%s2271_s13 + $0xb0] sm:$0xff] %v1823_v23  ;;  %1558 = vst [vmem:[%s2271_s13 + $0x1b0] sm:$0xff] %v1855_v24  ;;  %v1824_v27 = vpack.c.bf16 %v918_v25, %v916_v19  ;;  %v1856_v28 = vpack.c.bf16 %v1078_v26, %v1076_v20 }
 0x179   : > { %1527 = vst [vmem:[%s2271_s13 + $0xb8] sm:$0xff] %v1824_v27  ;;  %1559 = vst [vmem:[%s2271_s13 + $0x1b8] sm:$0xff] %v1856_v28  ;;  %v921_v29 = vpop.f32.mrb[48].mxu0  ;;  %v1081_v30 = vpop.f32.mrb[48].mxu1 }
 0x17a   : > { %v922_v31 = vadd.f32 %v921_v29, %v2258_v37  ;;  %v1082_v32 = vadd.f32 %v1081_v30, %v2258_v37  ;;  %v923_v33 = vpop.f32.mrb[49].mxu0  ;;  %v1083_v34 = vpop.f32.mrb[49].mxu1 }
 0x17b   : > { %v924_v35 = vadd.f32 %v923_v33, %v2260_v38  ;;  %v1084_v36 = vadd.f32 %v1083_v34, %v2260_v38  ;;  %v925_v39 = vpop.f32.mrb[50].mxu0  ;;  %v1085_v40 = vpop.f32.mrb[50].mxu1 }
 0x17c   : > { %v926_v41 = vadd.f32 %v925_v39, %v2258_v37  ;;  %v1086_v42 = vadd.f32 %v1085_v40, %v2258_v37  ;;  %v927_v43 = vpop.f32.mrb[51].mxu0  ;;  %v1087_v44 = vpop.f32.mrb[51].mxu1 }
 0x17d   : > { %v1825_v45 = vpack.c.bf16 %v924_v35, %v922_v31  ;;  %v1857_v46 = vpack.c.bf16 %v1084_v36, %v1082_v32  ;;  %v928_v47 = vadd.f32 %v927_v43, %v2260_v38  ;;  %v1088_v48 = vadd.f32 %v1087_v44, %v2260_v38 }
 0x17f   : > { %1528 = vst [vmem:[%s2271_s13 + $0xc0] sm:$0xff] %v1825_v45  ;;  %1560 = vst [vmem:[%s2271_s13 + $0x1c0] sm:$0xff] %v1857_v46  ;;  %v1826_v49 = vpack.c.bf16 %v928_v47, %v926_v41  ;;  %v1858_v50 = vpack.c.bf16 %v1088_v48, %v1086_v42 }
 0x181   : > { %1529 = vst [vmem:[%s2271_s13 + $0xc8] sm:$0xff] %v1826_v49  ;;  %1561 = vst [vmem:[%s2271_s13 + $0x1c8] sm:$0xff] %v1858_v50  ;;  %v931_v51 = vpop.f32.mrb[52].mxu0  ;;  %v1091_v52 = vpop.f32.mrb[52].mxu1 }
 0x182   : > { %v932_v53 = vadd.f32 %v931_v51, %v2258_v37  ;;  %v1092_v54 = vadd.f32 %v1091_v52, %v2258_v37  ;;  %v933_v55 = vpop.f32.mrb[53].mxu0  ;;  %v1093_v56 = vpop.f32.mrb[53].mxu1 }
 0x183   : > { %v934_v57 = vadd.f32 %v933_v55, %v2260_v38  ;;  %v1094_v58 = vadd.f32 %v1093_v56, %v2260_v38  ;;  %v935_v59 = vpop.f32.mrb[54].mxu0  ;;  %v1095_v60 = vpop.f32.mrb[54].mxu1 }
 0x184   : > { %v936_v61 = vadd.f32 %v935_v59, %v2258_v37  ;;  %v1096_v62 = vadd.f32 %v1095_v60, %v2258_v37  ;;  %v937_v63 = vpop.f32.mrb[55].mxu0  ;;  %v1097_v0 = vpop.f32.mrb[55].mxu1 }
 0x185   : > { %v1827_v1 = vpack.c.bf16 %v934_v57, %v932_v53  ;;  %v1859_v2 = vpack.c.bf16 %v1094_v58, %v1092_v54  ;;  %v938_v3 = vadd.f32 %v937_v63, %v2260_v38  ;;  %v1098_v4 = vadd.f32 %v1097_v0, %v2260_v38 }
 0x187   : > { %1530 = vst [vmem:[%s2271_s13 + $0xd0] sm:$0xff] %v1827_v1  ;;  %1562 = vst [vmem:[%s2271_s13 + $0x1d0] sm:$0xff] %v1859_v2  ;;  %v1828_v5 = vpack.c.bf16 %v938_v3, %v936_v61  ;;  %v1860_v6 = vpack.c.bf16 %v1098_v4, %v1096_v62 }
 0x189   : > { %1531 = vst [vmem:[%s2271_s13 + $0xd8] sm:$0xff] %v1828_v5  ;;  %1563 = vst [vmem:[%s2271_s13 + $0x1d8] sm:$0xff] %v1860_v6  ;;  %v941_v7 = vpop.f32.mrb[56].mxu0  ;;  %v1101_v8 = vpop.f32.mrb[56].mxu1 }
 0x18a   : > { %v942_v9 = vadd.f32 %v941_v7, %v2258_v37  ;;  %v1102_v10 = vadd.f32 %v1101_v8, %v2258_v37  ;;  %v943_v11 = vpop.f32.mrb[57].mxu0  ;;  %v1103_v12 = vpop.f32.mrb[57].mxu1 }
 0x18b   : > { %v944_v13 = vadd.f32 %v943_v11, %v2260_v38  ;;  %v1104_v14 = vadd.f32 %v1103_v12, %v2260_v38  ;;  %v945_v15 = vpop.f32.mrb[58].mxu0  ;;  %v1105_v16 = vpop.f32.mrb[58].mxu1 }
 0x18c   : > { %v946_v17 = vadd.f32 %v945_v15, %v2258_v37  ;;  %v1106_v18 = vadd.f32 %v1105_v16, %v2258_v37  ;;  %v947_v19 = vpop.f32.mrb[59].mxu0  ;;  %v1107_v20 = vpop.f32.mrb[59].mxu1 }
 0x18d   : > { %v1829_v21 = vpack.c.bf16 %v944_v13, %v942_v9  ;;  %v1861_v22 = vpack.c.bf16 %v1104_v14, %v1102_v10  ;;  %v948_v23 = vadd.f32 %v947_v19, %v2260_v38  ;;  %v1108_v24 = vadd.f32 %v1107_v20, %v2260_v38 }
 0x18f   : > { %1532 = vst [vmem:[%s2271_s13 + $0xe0] sm:$0xff] %v1829_v21  ;;  %1564 = vst [vmem:[%s2271_s13 + $0x1e0] sm:$0xff] %v1861_v22  ;;  %v1830_v25 = vpack.c.bf16 %v948_v23, %v946_v17  ;;  %v1862_v26 = vpack.c.bf16 %v1108_v24, %v1106_v18 }
 0x191   : > { %1533 = vst [vmem:[%s2271_s13 + $0xe8] sm:$0xff] %v1830_v25  ;;  %1565 = vst [vmem:[%s2271_s13 + $0x1e8] sm:$0xff] %v1862_v26  ;;  %v951_v27 = vpop.f32.mrb[60].mxu0  ;;  %v1111_v28 = vpop.f32.mrb[60].mxu1 }
 0x192   : > { %v952_v29 = vadd.f32 %v951_v27, %v2258_v37  ;;  %v1112_v30 = vadd.f32 %v1111_v28, %v2258_v37  ;;  %v953_v31 = vpop.f32.mrb[61].mxu0  ;;  %v1113_v32 = vpop.f32.mrb[61].mxu1 }
 0x193   : > { %v954_v33 = vadd.f32 %v953_v31, %v2260_v38  ;;  %v1114_v34 = vadd.f32 %v1113_v32, %v2260_v38  ;;  %v955_v35 = vpop.f32.mrb[62].mxu0  ;;  %v1115_v36 = vpop.f32.mrb[62].mxu1 }
 0x194   : > { %v956_v39 = vadd.f32 %v955_v35, %v2258_v37  ;;  %v1116_v40 = vadd.f32 %v1115_v36, %v2258_v37  ;;  %v957_v41 = vpop.f32.mrb[63].mxu0  ;;  %v1117_v42 = vpop.f32.mrb[63].mxu1 }
 0x195   : > { %v1831_v43 = vpack.c.bf16 %v954_v33, %v952_v29  ;;  %v1863_v44 = vpack.c.bf16 %v1114_v34, %v1112_v30  ;;  %v958_v45 = vadd.f32 %v957_v41, %v2260_v38  ;;  %v1118_v46 = vadd.f32 %v1117_v42, %v2260_v38 }
 0x197   : > { %1534 = vst [vmem:[%s2271_s13 + $0xf0] sm:$0xff] %v1831_v43  ;;  %1566 = vst [vmem:[%s2271_s13 + $0x1f0] sm:$0xff] %v1863_v44  ;;  %v1832_v47 = vpack.c.bf16 %v958_v45, %v956_v39  ;;  %v1864_v48 = vpack.c.bf16 %v1118_v46, %v1116_v40 }
 0x199   : > { %1535 = vst [vmem:[%s2271_s13 + $0xf8] sm:$0xff] %v1832_v47  ;;  %1567 = vst [vmem:[%s2271_s13 + $0x1f8] sm:$0xff] %v1864_v48 }
 0x19a PF: > { %s13_s12 = sadd.s32 1, %s2055_s12  }
 0x19b   : > { %p10_p4 = scmp.ge.s32.totalorder %s13_s12, 6  }
 0x19d   :  { %12 = sbr.rel (!%p10_p4) target bundleno = 1 (0x1), region = 62 }

// kernel: _neck_level0_forward.3
= control target key start
LH: loop header
LB: loop body
LE: loop exit
PB: predicated region body
PF: predicated region fallthrough
CT: control target
= control target key end

     0   :  { %10 = vsyncpa [#allocation3], 0  ;;  %s10088_s0 = inlined_call_operand.vmem [shape: bf16[2,48,34,256], index: 0, kind: input, shape index: {}, may-alias: {0,1,2}]   ;;  %s10089_s1 = inlined_call_operand.vmem [shape: bf16[2,48,34,256], index: 1, kind: input, shape index: {}, may-alias: {0,1,2}]   ;;  %s10090_s2 = inlined_call_operand.vmem [shape: bf16[2,48,34,256], index: 2, kind: input, shape index: {}, may-alias: {0,1,2}]   ;;  %s10091_s3 = inlined_call_operand.vmem [shape: bf16[9,256,256], index: 3, kind: input, shape index: {}]   ;;  %s10092_s4 = inlined_call_operand.vmem [shape: f32[1,256], index: 4, kind: input, shape index: {}]   ;;  %s10093_s5 = inlined_call_operand.hbm [shape: f32[2,32,32,256], index: 5, kind: output, shape index: {}]  }
   0x1   :  { %12 = vsyncpa [#allocation3 + $0x1], 0  ;;  %s7361_s18 = smov 0   ;;  %s7363_s19 = smov 0  }
   0x2   :  { %s7365_s20 = smov 0   ;;  %s7367_s21 = smov 0  }
   0x3   :  { %s7369_s22 = smov 0   ;;  %s7371_s23 = smov 0  }
   0x4   :  { %s7373_s24 = smov 0   ;;  %s7375_s25 = smov 0  }
   0x5 LB: > { %10213 = sst [smem:[#allocation5_spill]] %s7322_s24  ;;  %s5464_s26 = sadd.s32 4294967295, %s7326_s25   ;;  %s7326_s25 = sphi %s7375_s25, %s18_s25   ;;  %s7322_s24 = sphi %s7373_s24, %s10420_s24   ;;  %s7318_s23 = sphi %s7371_s23, %s10425_s23   ;;  %s7314_s22 = sphi %s7369_s22, %s10418_s22   ;;  %s7310_s21 = sphi %s7367_s21, %s10424_s21   ;;  %s7306_s20 = sphi %s7365_s20, %s10423_s20   ;;  %s7302_s19 = sphi %s7363_s19, %s10422_s19   ;;  %s7298_s18 = sphi %s7361_s18, %s10421_s18  }
   0x6   : > { %s5465_s27 = sadd.s32 4294967294, %s7326_s25   ;;  %s27_s28 = sadd.s32 1, %s7318_s23 }
   0x7   : > { %p28_p0 = scmp.ge.s32.totalorder %s27_s28, 4  ;;  %s30_s29 = sadd.s32 1, %s7322_s24 }
   0x8   : > { %p187_p1 = scmp.ne.s32.totalorder %s7306_s20, %s7302_s19  ;;  %p188_p2 = scmp.eq.s32.totalorder %s5464_s26, 7 }
   0x9   : > { %s10427_s28 = smov (%p28_p0, %s27_s28), 0  ;;  %s10429_s29 = smov (!%p28_p0, %s30_s29), %s7322_s24 }
   0xa   : > { %10214 = sst [smem:[#allocation6_spill]] %s10427_s28  ;;  %s173_s30 = ssub.s32 %s7318_s23, %s10427_s28 }
   0xb   : > { %p7412_p3 = por %p188_p2, %p187_p1  ;;  %p32_p4 = scmp.ge.s32.totalorder %s10429_s29, 2 }
   0xc   : > { %p193_p5 = scmp.ne.s32.totalorder %s7302_s19, %s7298_s18  ;;  %p194_p6 = scmp.eq.s32.totalorder %s5465_s27, 7 }
   0xd   : > { %p5474_p7 = scmp.ge.s32.totalorder %s7326_s25, 1  ;;  %s10431_s29 = smov (%p32_p4, %s10429_s29), 0 }
   0xe   : > { %10216 = sst [smem:[#allocation7_spill]] %s10431_s29  ;;  %p7421_p8 = por %p194_p6, %p193_p5 }
   0xf   : > { %p268_p9 = scmp.lt.s32.totalorder %s7326_s25, 9  ;;  %s172_s8 = ssub.s32 %s7322_s24, %s10431_s29 }
  0x10   : > { %s177_s9 = sadd.s32 1, %s7306_s20  ;;  %s174_s10 = sor.u32 %s173_s30, %s172_s8 }
  0x11   : > { %p269_p10 = pnand %p5474_p7, %p268_p9  ;;  %p175_p11 = scmp.eq.s32.totalorder %s174_s10, 0 }
  0x13   : > { %s7430_s11 = scalar_select %p175_p11, %s7306_s20, %s177_s9  }
  0x14   : > { %272 = sbr.rel (%p269_p10) target bundleno = 895 (0x37f), region = 40 }
  0x1b   : > { %v6710_v0 = vld [vmem:[%s10091_s3 + $0x104] ss:$8 sps:$4 sm:$0xff]   ;;  %v6714_v2 = vld [vmem:[%s10091_s3 + $0x100] ss:$8 sps:$4 sm:$0xff]   ;;  %v6716_v4 = vld [vmem:[%s10091_s3 + $0x114] ss:$8 sps:$4 sm:$0xff]  }
  0x1c   : > { %v6712_v1 = vld [vmem:[%s10091_s3 + $0x404] ss:$8 sps:$4 sm:$0xff]   ;;  %1095 = vmatprep.subr.bf16.mxu1 %v6710_v0  ;;  %v6715_v3 = vld [vmem:[%s10091_s3 + $0x400] ss:$8 sps:$4 sm:$0xff]   ;;  %v6718_v5 = vld [vmem:[%s10091_s3 + $0x414] ss:$8 sps:$4 sm:$0xff]  }
  0x1d   : > { %3019 = vmatprep.subr.bf16.mxu0 %v6712_v1  ;;  %1096 = vmatpush1.bf16.msra.mxu1 %v6714_v2  ;;  %v6720_v6 = vld [vmem:[%s10091_s3 + $0x110] ss:$8 sps:$4 sm:$0xff]   ;;  %v6722_v8 = vld [vmem:[%s10091_s3 + $0x124] ss:$8 sps:$4 sm:$0xff]   ;;  %v6726_v10 = vld [vmem:[%s10091_s3 + $0x120] ss:$8 sps:$4 sm:$0xff]  }
  0x1e   : > { %3020 = vmatpush1.bf16.msra.mxu0 %v6715_v3  ;;  %1097 = vmatprep.subr.bf16.mxu1 %v6716_v4  ;;  %v6721_v7 = vld [vmem:[%s10091_s3 + $0x410] ss:$8 sps:$4 sm:$0xff]   ;;  %v6724_v9 = vld [vmem:[%s10091_s3 + $0x424] ss:$8 sps:$4 sm:$0xff]   ;;  %v6727_v11 = vld [vmem:[%s10091_s3 + $0x420] ss:$8 sps:$4 sm:$0xff]  }
  0x1f   : > { %3021 = vmatprep.subr.bf16.mxu0 %v6718_v5  ;;  %v6728_v12 = vld [vmem:[%s10091_s3 + $0x134] ss:$8 sps:$4 sm:$0xff]   ;;  %v6732_v14 = vld [vmem:[%s10091_s3 + $0x130] ss:$8 sps:$4 sm:$0xff]   ;;  %v6734_v16 = vld [vmem:[%s10091_s3 + $0x144] ss:$8 sps:$4 sm:$0xff]  }
  0x20   : > { %v6730_v13 = vld [vmem:[%s10091_s3 + $0x434] ss:$8 sps:$4 sm:$0xff]   ;;  %v6733_v15 = vld [vmem:[%s10091_s3 + $0x430] ss:$8 sps:$4 sm:$0xff]   ;;  %s10094_s9 = sshll.u32 %s7310_s21, 3  ;;  %p328_p12 = scmp.lt.s32.totalorder %s7314_s22, 1 }
  0x21   : > { %1098 = vmatpush1.bf16.msra.mxu1 %v6720_v6  ;;  %v6736_v17 = vld [vmem:[%s10091_s3 + $0x444] ss:$8 sps:$4 sm:$0xff]   ;;  %v6738_v18 = vld [vmem:[%s10091_s3 + $0x140] ss:$8 sps:$4 sm:$0xff]   ;;  %s6083_s17 = sadd.s32 8, %s10094_s9  ;;  %vm661_vm0 = vcmask 1046528  }
  0x22   : > { %3022 = vmatpush1.bf16.msra.mxu0 %v6721_v7  ;;  %1099 = vmatprep.subr.bf16.mxu1 %v6722_v8  ;;  %v6739_v19 = vld [vmem:[%s10091_s3 + $0x440] ss:$8 sps:$4 sm:$0xff]   ;;  %v6740_v20 = vld [vmem:[%s10091_s3 + $0x154] ss:$8 sps:$4 sm:$0xff]   ;;  %s5477_s10 = sadd.s32 4294967295, %s6083_s17  ;;  %p344_p0 = scmp.lt.s32.totalorder %s6083_s17, 47 }
  0x23   : > { %3023 = vmatprep.subr.bf16.mxu0 %v6724_v9  ;;  %v6742_v21 = vld [vmem:[%s10091_s3 + $0x454] ss:$8 sps:$4 sm:$0xff]   ;;  %v6744_v22 = vld [vmem:[%s10091_s3 + $0x150] ss:$8 sps:$4 sm:$0xff]   ;;  %v6746_v24 = vld [vmem:[%s10091_s3 + $0x164] ss:$8 sps:$4 sm:$0xff]  }
  0x24   : > { %v6745_v23 = vld [vmem:[%s10091_s3 + $0x450] ss:$8 sps:$4 sm:$0xff]   ;;  %v6748_v25 = vld [vmem:[%s10091_s3 + $0x464] ss:$8 sps:$4 sm:$0xff]   ;;  %p330_p13 = scmp.lt.s32.totalorder %s5477_s10, 47  ;;  %s10435_s17 = smov (!%p344_p0, %s6083_s17), 47 }
  0x25   : > { %1100 = vmatpush1.bf16.msra.mxu1 %v6726_v10  ;;  %v6750_v26 = vld [vmem:[%s10091_s3 + $0x160] ss:$8 sps:$4 sm:$0xff]   ;;  %v6752_v28 = vld [vmem:[%s10091_s3 + $0x174] ss:$8 sps:$4 sm:$0xff]   ;;  %s329_s26 = scalar_select %p328_p12, %s7314_s22, 1  ;;  %vm1641_vm1 = vcmask 1045504  }
  0x26   : > { %3024 = vmatpush1.bf16.msra.mxu0 %v6727_v11  ;;  %1101 = vmatprep.subr.bf16.mxu1 %v6728_v12  ;;  %v6751_v27 = vld [vmem:[%s10091_s3 + $0x460] ss:$8 sps:$4 sm:$0xff]   ;;  %v6754_v29 = vld [vmem:[%s10091_s3 + $0x474] ss:$8 sps:$4 sm:$0xff]   ;;  %s10433_s10 = smov (!%p330_p13, %s5477_s10), 47  ;;  %s6635_s12 = smul.u32 10, %s10435_s17 }
  0x27   : > { %3025 = vmatprep.subr.bf16.mxu0 %v6730_v13  ;;  %v6756_v30 = vld [vmem:[%s10091_s3 + $0x170] ss:$8 sps:$4 sm:$0xff]   ;;  %v6758_v32 = vld [vmem:[%s10091_s3 + $0x184] ss:$8 sps:$4 sm:$0xff]   ;;  %s7536_s9 = smul.u32 480, %s329_s26  ;;  %s6088_s26 = sshll.u32 %s7310_s21, 6 }
  0x28   : > { %v6757_v31 = vld [vmem:[%s10091_s3 + $0x470] ss:$8 sps:$4 sm:$0xff]   ;;  %v6760_v33 = vld [vmem:[%s10091_s3 + $0x484] ss:$8 sps:$4 sm:$0xff]   ;;  %s6633_s8 = smul.u32 10, %s10433_s10  ;;  %s6070_s16 = sshll.u32 %s7314_s22, 8 }
  0x29   : > { %1102 = vmatpush1.bf16.msra.mxu1 %v6732_v14  ;;  %v6762_v34 = vld [vmem:[%s10091_s3 + $0x180] ss:$8 sps:$4 sm:$0xff]   ;;  %v6764_v36 = vld [vmem:[%s10091_s3 + $0x194] ss:$8 sps:$4 sm:$0xff]   ;;  %s348_s10 = sadd.s32 %s6635_s12, %s7536_s9  ;;  %v6768_v38 = vld [vmem:[%s10091_s3 + $0x190] ss:$8 sps:$4 sm:$0xff]  }
  0x2a   : > { %3026 = vmatpush1.bf16.msra.mxu0 %v6733_v15  ;;  %1103 = vmatprep.subr.bf16.mxu1 %v6734_v16  ;;  %v6763_v35 = vld [vmem:[%s10091_s3 + $0x480] ss:$8 sps:$4 sm:$0xff]   ;;  %v6766_v37 = vld [vmem:[%s10091_s3 + $0x494] ss:$8 sps:$4 sm:$0xff]   ;;  %s334_s17 = sadd.s32 %s7536_s9, %s6633_s8  ;;  %v6769_v39 = vld [vmem:[%s10091_s3 + $0x490] ss:$8 sps:$4 sm:$0xff]  }
  0x2b   : > { %3027 = vmatprep.subr.bf16.mxu0 %v6736_v17  ;;  %v6770_v40 = vld [vmem:[%s10091_s3 + $0x1a4] ss:$8 sps:$4 sm:$0xff]   ;;  %s5478_s15 = sshll.u32 %s334_s17, 2  ;;  %s5480_s12 = sshll.u32 %s348_s10, 2  ;;  %v6774_v42 = vld [vmem:[%s10091_s3 + $0x1a0] ss:$8 sps:$4 sm:$0xff]  }
  0x2c   : > { %v6772_v41 = vld [vmem:[%s10091_s3 + $0x4a4] ss:$8 sps:$4 sm:$0xff]   ;;  %v6775_v43 = vld [vmem:[%s10091_s3 + $0x4a0] ss:$8 sps:$4 sm:$0xff]   ;;  %s7576_s14 = scalar_lea.vmem %s10088_s0, %s5478_s15  ;;  %v6776_v44 = vld [vmem:[%s10091_s3 + $0x1b4] ss:$8 sps:$4 sm:$0xff]   ;;  %s7584_s8 = scalar_lea.vmem %s10089_s1, %s5480_s12 }
  0x2d   : > { %1104 = vmatpush1.bf16.msra.mxu1 %v6738_v18  ;;  %v6778_v45 = vld [vmem:[%s10091_s3 + $0x4b4] ss:$8 sps:$4 sm:$0xff]   ;;  %v6780_v46 = vld [vmem:[%s10091_s3 + $0x1b0] ss:$8 sps:$4 sm:$0xff]   ;;  %v7596_v48 = vld [vmem:[%s7576_s14] sm:$0xff]  ;;  %s10342_s17 = sshll.u32 %s7310_s21, 3 }
  0x2e   : > { %3028 = vmatpush1.bf16.msra.mxu0 %v6739_v19  ;;  %1105 = vmatprep.subr.bf16.mxu1 %v6740_v20  ;;  %v6781_v47 = vld [vmem:[%s10091_s3 + $0x4b0] ss:$8 sps:$4 sm:$0xff]   ;;  %v7599_v49 = vld [vmem:[%s7576_s14 + $0x8] sm:$0xff]  ;;  %v10104_v51 = vunpack.c.h.bf16 %v7596_v48  ;;  %v7606_v52 = vld [vmem:[%s7584_s8] sm:$0xff]  ;;  %v10107_v8 = vunpack.c.l.bf16 %v7596_v48  ;;  %s6087_s10 = sadd.s32 16, %s10342_s17 }
  0x2f   : > { %3029 = vmatprep.subr.bf16.mxu0 %v6742_v21  ;;  %v7602_v50 = vld [vmem:[%s7576_s14 + $0x10] sm:$0xff]  ;;  %v10103_v53 = vunpack.c.h.bf16 %v7599_v49  ;;  %v7611_v55 = vld [vmem:[%s7584_s8 + $0x8] sm:$0xff]  ;;  %v423_v57 = vunpack.c.h.bf16 %v7606_v52  ;;  %v10106_v9 = vunpack.c.l.bf16 %v7599_v49  ;;  %v422_v19 = vunpack.c.l.bf16 %v7606_v52  ;;  %v7672_v20 = vld [vmem:[%s7576_s14 + $0x18] sm:$0xff]  ;;  %p357_p1 = scmp.lt.s32.totalorder %s6087_s10, 47 }
  0x30   : > { %v10102_v54 = vunpack.c.h.bf16 %v7602_v50  ;;  %v7614_v56 = vld [vmem:[%s7584_s8 + $0x10] sm:$0xff]  ;;  %v6782_v58 = vld [vmem:[%s10091_s3 + $0x1c4] ss:$8 sps:$4 sm:$0xff]   ;;  %v665_v60 = vrot.slane %v10104_v51, 1  ;;  %v425_v61 = vunpack.c.h.bf16 %v7611_v55  ;;  %v6786_v2 = vld [vmem:[%s10091_s3 + $0x1c0] ss:$8 sps:$4 sm:$0xff]   ;;  %v10105_v15 = vunpack.c.l.bf16 %v7602_v50 }
  0x31   : > { %1106 = vmatpush1.bf16.msra.mxu1 %v6744_v22  ;;  %v6784_v59 = vld [vmem:[%s10091_s3 + $0x4c4] ss:$8 sps:$4 sm:$0xff]   ;;  %v427_v62 = vunpack.c.h.bf16 %v7614_v56  ;;  %v666_v63 = vrot.slane %v10103_v53, 1  ;;  %v683_v1 = vrot.slane %v423_v57, 1  ;;  %v6787_v5 = vld [vmem:[%s10091_s3 + $0x4c0] ss:$8 sps:$4 sm:$0xff]  }
  0x32   : > { %3030 = vmatpush1.bf16.msra.mxu0 %v6745_v23  ;;  %1107 = vmatprep.subr.bf16.mxu1 %v6746_v24  ;;  %v7631_v0 = vrot.slane %v10102_v54, 1  ;;  %v684_v3 = vrot.slane %v425_v61, 1  ;;  %v6788_v10 = vld [vmem:[%s10091_s3 + $0x1d4] ss:$8 sps:$4 sm:$0xff]   ;;  %v6792_v16 = vld [vmem:[%s10091_s3 + $0x1d0] ss:$8 sps:$4 sm:$0xff]   ;;  %v424_v23 = vunpack.c.l.bf16 %v7611_v55  ;;  %v426_v24 = vunpack.c.l.bf16 %v7614_v56 }
  0x33   : > { %3031 = vmatprep.subr.bf16.mxu0 %v6748_v25  ;;  %v7642_v4 = vrot.slane %v427_v62, 1  ;;  %v667_v6 = vsel %vm661_vm0, %v665_v60, %v666_v63  ;;  %v6790_v11 = vld [vmem:[%s10091_s3 + $0x4d4] ss:$8 sps:$4 sm:$0xff]   ;;  %v6793_v17 = vld [vmem:[%s10091_s3 + $0x4d0] ss:$8 sps:$4 sm:$0xff]   ;;  %s10437_s10 = smov (!%p357_p1, %s6087_s10), 47 }
  0x34   : > { %v671_v7 = vsel %vm661_vm0, %v666_v63, %v7631_v0  ;;  %v685_v13 = vsel %vm661_vm0, %v683_v1, %v684_v3  ;;  %v7675_v21 = vld [vmem:[%s7576_s14 + $0x20] sm:$0x11]  ;;  %v7683_v25 = vld [vmem:[%s7584_s8 + $0x18] sm:$0xff] }
  0x35   : > { %1108 = vmatpush1.bf16.msra.mxu1 %v6750_v26  ;;  %v871_v12 = vpack.c.bf16 %v671_v7, %v667_v6  ;;  %v689_v14 = vsel %vm661_vm0, %v684_v3, %v7642_v4  ;;  %v6794_v22 = vld [vmem:[%s10091_s3 + $0x1e4] ss:$8 sps:$4 sm:$0xff]   ;;  %v7741_v60 = vld [vmem:[%s7584_s8 + $0x38] sm:$0xff]  ;;  %v10098_v3 = vunpack.c.l.bf16 %v7675_v21  ;;  %v428_v7 = vunpack.c.l.bf16 %v7683_v25 }
  0x36   : > { %3032 = vmatpush1.bf16.msra.mxu0 %v6751_v27  ;;  %1109 = vmatprep.subr.bf16.mxu1 %v6752_v28  ;;  %v7668_v18 = vpack.c.bf16 %v689_v14, %v685_v13  ;;  %v7686_v26 = vld [vmem:[%s7584_s8 + $0x20] sm:$0x11]  ;;  %v662_v28 = vrot.slane %v10107_v8, 1  ;;  %v6805_v6 = vld [vmem:[%s10091_s3 + $0x4f0] ss:$8 sps:$4 sm:$0xff]  }
  0x37   : > { %3033 = vmatprep.subr.bf16.mxu0 %v6754_v29  ;;  %1127 = vmatprep.mubr.bf16.mxu1 %v871_v12  ;;  %v6796_v27 = vld [vmem:[%s10091_s3 + $0x4e4] ss:$8 sps:$4 sm:$0xff]   ;;  %v663_v29 = vrot.slane %v10106_v9, 1  ;;  %v6835_v54 = vld [vmem:[%s10091_s3 + $0x34] ss:$8 sps:$4 sm:$0xff]  }
  0x38   : > { %3051 = vmatprep.mubr.bf16.mxu0 %v7668_v18  ;;  %v6811_v12 = vld [vmem:[%s10091_s3 + $0x504] ss:$8 sps:$4 sm:$0xff]  }
  0x39   : > { %1110 = vmatpush1.bf16.msra.mxu1 %v6756_v30  ;;  %v7697_v30 = vrot.slane %v10105_v15, 1  ;;  %v1663_v15 = vrot.slane %v423_v57, 2  ;;  %v7915_v9 = vld [vmem:[%s7584_s8 + $0x68] sm:$0xff] }
  0x3a   : > { %3034 = vmatpush1.bf16.msra.mxu0 %v6757_v31  ;;  %1111 = vmatprep.subr.bf16.mxu1 %v6758_v32  ;;  %v10101_v31 = vunpack.c.h.bf16 %v7672_v20  ;;  %v680_v32 = vrot.slane %v422_v19, 1  ;;  %v6844_v56 = vld [vmem:[%s10091_s3 + $0x44] ss:$8 sps:$4 sm:$0xff]  }
  0x3b   : > { %3035 = vmatprep.subr.bf16.mxu0 %v6760_v33  ;;  %v681_v33 = vrot.slane %v424_v23, 1 }
  0x3d   : > { %1112 = vmatpush1.bf16.msra.mxu1 %v6762_v34  ;;  %v10100_v34 = vunpack.c.h.bf16 %v7675_v21 }
  0x3e   : > { %3036 = vmatpush1.bf16.msra.mxu0 %v6763_v35  ;;  %1113 = vmatprep.subr.bf16.mxu1 %v6764_v36  ;;  %v429_v35 = vunpack.c.h.bf16 %v7683_v25  ;;  %v6798_v36 = vld [vmem:[%s10091_s3 + $0x1e0] ss:$8 sps:$4 sm:$0xff]  }
  0x3f   : > { %3037 = vmatprep.subr.bf16.mxu0 %v6766_v37  ;;  %v6799_v37 = vld [vmem:[%s10091_s3 + $0x4e0] ss:$8 sps:$4 sm:$0xff]  }
  0x41   : > { %1114 = vmatpush1.bf16.msra.mxu1 %v6768_v38  ;;  %v7715_v38 = vrot.slane %v426_v24, 1 }
  0x42   : > { %3038 = vmatpush1.bf16.msra.mxu0 %v6769_v39  ;;  %1115 = vmatprep.subr.bf16.mxu1 %v6770_v40  ;;  %v431_v39 = vunpack.c.h.bf16 %v7686_v26  ;;  %v6800_v40 = vld [vmem:[%s10091_s3 + $0x1f4] ss:$8 sps:$4 sm:$0xff]  }
  0x43   : > { %3039 = vmatprep.subr.bf16.mxu0 %v6772_v41  ;;  %v6802_v41 = vld [vmem:[%s10091_s3 + $0x4f4] ss:$8 sps:$4 sm:$0xff]   ;;  %v687_v63 = vsel %vm661_vm0, %v681_v33, %v7715_v38 }
  0x44   : > { %v696_v1 = vrot.slane %v431_v39, 1 }
  0x45   : > { %1116 = vmatpush1.bf16.msra.mxu1 %v6774_v42  ;;  %v7725_v42 = vld [vmem:[%s7584_s8 + $0x28] sm:$0xff] }
  0x46   : > { %3040 = vmatpush1.bf16.msra.mxu0 %v6775_v43  ;;  %1117 = vmatprep.subr.bf16.mxu1 %v6776_v44  ;;  %v664_v43 = vsel %vm661_vm0, %v662_v28, %v663_v29  ;;  %v669_v44 = vsel %vm661_vm0, %v663_v29, %v7697_v30  ;;  %v433_v13 = vunpack.c.h.bf16 %v7725_v42  ;;  %v6806_v29 = vld [vmem:[%s10091_s3] ss:$8 sps:$4 sm:$0xff]  }
  0x47   : > { %3041 = vmatprep.subr.bf16.mxu0 %v6778_v45  ;;  %v7731_v45 = vld [vmem:[%s7584_s8 + $0x30] sm:$0xff] }
  0x48   : > { %v435_v14 = vunpack.c.h.bf16 %v7731_v45 }
  0x49   : > { %1118 = vmatpush1.bf16.msra.mxu1 %v6780_v46  ;;  %v682_v46 = vsel %vm661_vm0, %v680_v32, %v681_v33 }
  0x4a   : > { %3042 = vmatpush1.bf16.msra.mxu0 %v6781_v47  ;;  %1119 = vmatprep.subr.bf16.mxu1 %v6782_v58  ;;  %v674_v47 = vrot.slane %v10101_v31, 1  ;;  %v678_v58 = vrot.slane %v10100_v34, 1  ;;  %v6821_v31 = vld [vmem:[%s10091_s3 + $0x530] ss:$8 sps:$4 sm:$0xff]  }
  0x4b   : > { %3043 = vmatprep.subr.bf16.mxu0 %v6784_v59  ;;  %v692_v59 = vrot.slane %v429_v35, 1 }
  0x4c   : > { %v679_v28 = vsel %vm661_vm0, %v674_v47, %v678_v58 }
  0x4d   : > { %1120 = vmatpush1.bf16.msra.mxu1 %v6786_v2  ;;  %v10099_v2 = vunpack.c.l.bf16 %v7672_v20  ;;  %v693_v32 = vsel %vm661_vm0, %v7642_v4, %v692_v59  ;;  %v697_v33 = vsel %vm661_vm0, %v692_v59, %v696_v1  ;;  %v6817_v59 = vld [vmem:[%s10091_s3 + $0x14] ss:$8 sps:$4 sm:$0xff]   ;;  %v7808_v1 = vld [vmem:[%s7584_s8 + $0x48] sm:$0x11] }
  0x4e   : > { %3044 = vmatpush1.bf16.msra.mxu0 %v6787_v5  ;;  %1121 = vmatprep.subr.bf16.mxu1 %v6788_v10  ;;  %v6804_v5 = vld [vmem:[%s10091_s3 + $0x1f0] ss:$8 sps:$4 sm:$0xff]   ;;  %v430_v10 = vunpack.c.l.bf16 %v7686_v26  ;;  %v7799_v58 = vpack.c.bf16 %v697_v33, %v693_v32  ;;  %v434_v32 = vunpack.c.l.bf16 %v7731_v45  ;;  %v6850_v45 = vld [vmem:[%s10091_s3 + $0x594] ss:$8 sps:$4 sm:$0xff]  }
  0x4f   : > { %3045 = vmatprep.subr.bf16.mxu0 %v6790_v11  ;;  %v6808_v11 = vld [vmem:[%s10091_s3 + $0x4] ss:$8 sps:$4 sm:$0xff]  }
  0x50   : > { %v694_v4 = vrot.slane %v430_v10, 1 }
  0x51   : > { %1122 = vmatpush1.bf16.msra.mxu1 %v6792_v16  ;;  %v437_v16 = vunpack.c.h.bf16 %v7741_v60 }
  0x52   : > { %3046 = vmatpush1.bf16.msra.mxu0 %v6793_v17  ;;  %1123 = vmatprep.subr.bf16.mxu1 %v6794_v22  ;;  %v870_v17 = vpack.c.bf16 %v669_v44, %v664_v43  ;;  %v7766_v22 = vpack.c.bf16 %v687_v63, %v682_v46  ;;  %v701_v44 = vrot.slane %v433_v13, 1  ;;  %v702_v46 = vrot.slane %v435_v14, 1  ;;  %v7805_v63 = vld [vmem:[%s7584_s8 + $0x40] sm:$0xff] }
  0x53   : > { %3047 = vmatprep.subr.bf16.mxu0 %v6796_v27  ;;  %v675_v27 = vsel %vm661_vm0, %v7631_v0, %v674_v47  ;;  %v6809_v0 = vld [vmem:[%s10091_s3 + $0x500] ss:$8 sps:$4 sm:$0xff]   ;;  %v7797_v47 = vrot.slane %v437_v16, 1  ;;  %v1686_v26 = vrot.slane %v437_v16, 2  ;;  %v8060_v16 = vcombine.low %v7606_v52, %v7611_v55 }
  0x54   : > { %v873_v43 = vpack.c.bf16 %v679_v28, %v675_v27  ;;  %v6815_v27 = vld [vmem:[%s10091_s3 + $0x10] ss:$8 sps:$4 sm:$0xff]   ;;  %v703_v33 = vsel %vm661_vm0, %v701_v44, %v702_v46 }
  0x55   : > { %1124 = vmatpush1.bf16.msra.mxu1 %v6798_v36  ;;  %v672_v36 = vrot.slane %v10099_v2, 1  ;;  %v7856_v2 = vld [vmem:[%s7584_s8 + $0x60] sm:$0xff]  ;;  %10223 = vst [vmem:[#allocation13_spill] sm:$0xff] %v8060_v16 }
  0x56   : > { %3048 = vmatpush1.bf16.msra.mxu0 %v6799_v37  ;;  %1125 = vmatprep.subr.bf16.mxu1 %v6800_v40  ;;  %v676_v37 = vrot.slane %v10098_v3, 1  ;;  %v690_v40 = vrot.slane %v428_v7, 1  ;;  %v7853_v3 = vld [vmem:[%s7584_s8 + $0x58] sm:$0xff] }
  0x57   : > { %3049 = vmatprep.subr.bf16.mxu0 %v6802_v41  ;;  %v6814_v41 = vld [vmem:[%s10091_s3 + $0x514] ss:$8 sps:$4 sm:$0xff]   ;;  %v10112_v34 = vunpack.c.h.bf16 %v7853_v3 }
  0x58   : > { %v695_v28 = vsel %vm661_vm0, %v690_v40, %v694_v4  ;;  %v7841_v4 = vrot.slane %v424_v23, 2 }
  0x59   : > { %1126 = vmatpush1.bf16.msra.mxu1 %v6804_v5  ;;  %v6812_v5 = vld [vmem:[%s10091_s3 + $0x510] ss:$8 sps:$4 sm:$0xff]  }
  0x5a   : > { %3050 = vmatpush1.bf16.msra.mxu0 %v6805_v6  ;;  %1448 = vmatprep.subr.bf16.mxu1 %v6808_v11  ;;  %v673_v6 = vsel %vm661_vm0, %v7697_v30, %v672_v36  ;;  %v677_v11 = vsel %vm661_vm0, %v672_v36, %v676_v37  ;;  %v436_v30 = vunpack.c.l.bf16 %v7741_v60  ;;  %v6826_v36 = vld [vmem:[%s10091_s3 + $0x24] ss:$8 sps:$4 sm:$0xff]   ;;  %v439_v37 = vunpack.c.h.bf16 %v7805_v63 }
  0x5b   : > { %3499 = vmatprep.subr.bf16.mxu0 %v6811_v12  ;;  %v432_v12 = vunpack.c.l.bf16 %v7725_v42  ;;  %v872_v44 = vpack.c.bf16 %v677_v11, %v673_v6  ;;  %v699_v6 = vrot.slane %v434_v32, 1  ;;  %v6860_v42 = vld [vmem:[%s10091_s3 + $0x60] ss:$8 sps:$4 sm:$0xff]  }
  0x5c   : > { %1128 = vmatmul.mubr.bf16.vlgmr.msra.gmra.mrb[0].mxu1 %v870_v17  ;;  %v691_v17 = vsel %vm661_vm0, %v7715_v38, %v690_v40  ;;  %v707_v38 = vsel %vm661_vm0, %v702_v46, %v7797_v47  ;;  %v1660_v40 = vrot.slane %v422_v19, 2  ;;  %v6823_v19 = vld [vmem:[%s10091_s3 + $0x534] ss:$8 sps:$4 sm:$0xff]   ;;  %v704_v11 = vrot.slane %v436_v30, 1 }
  0x5d   : > { %3052 = vmatmul.mubr.bf16.vlgmr.msra.gmra.mrb[0].mxu0 %v7766_v22  ;;  %1449 = vmatpush1.bf16.msra.mxu1 %v6806_v29  ;;  %v6820_v29 = vld [vmem:[%s10091_s3 + $0x524] ss:$8 sps:$4 sm:$0xff]   ;;  %v7850_v46 = vpack.c.bf16 %v695_v28, %v691_v17  ;;  %v7861_v23 = vpack.c.bf16 %v707_v38, %v703_v33  ;;  %v10108_v17 = vunpack.c.l.bf16 %v7805_v63  ;;  %v10109_v28 = vunpack.c.l.bf16 %v7808_v1  ;;  %v6824_v33 = vld [vmem:[%s10091_s3 + $0x20] ss:$8 sps:$4 sm:$0xff]  }
  0x5e   : > { %3500 = vmatpush1.bf16.msra.mxu0 %v6809_v0  ;;  %1137 = vmatprep.mubr.bf16.mxu1 %v873_v43  ;;  %v10110_v0 = vunpack.c.h.bf16 %v7808_v1  ;;  %v7848_v43 = vld [vmem:[%s7584_s8 + $0x50] sm:$0xff]  ;;  %v705_v51 = vsel %vm661_vm0, %v699_v6, %v704_v11 }
  0x5f   : > { %3501 = vmatprep.subr.bf16.mxu0 %v6814_v41  ;;  %3061 = vmatprep.mubr.bf16.mxu0 %v7799_v58  ;;  %v6818_v41 = vld [vmem:[%s10091_s3 + $0x520] ss:$8 sps:$4 sm:$0xff]   ;;  %v10113_v38 = vunpack.c.h.bf16 %v7848_v43  ;;  %v712_v57 = vrot.slane %v10109_v28, 1  ;;  %v10115_v28 = vunpack.c.l.bf16 %v7853_v3 }
  0x60   : > { %1450 = vmatprep.subr.bf16.mxu1 %v6817_v59  ;;  %v698_v59 = vrot.slane %v432_v12, 1 }
  0x61   : > { %1451 = vmatpush1.bf16.msra.mxu1 %v6815_v27  ;;  %v714_v27 = vrot.slane %v10110_v0, 1  ;;  %v7930_v0 = vld [vmem:[%s7584_s8 + $0x70] sm:$0x11] }
  0x62   : > { %3502 = vmatpush1.bf16.msra.mxu0 %v6812_v5  ;;  %1452 = vmatprep.subr.bf16.mxu1 %v6826_v36  ;;  %v710_v5 = vrot.slane %v439_v37, 1  ;;  %v1662_v36 = vsel %vm1641_vm1, %v1660_v40, %v7841_v4  ;;  %v700_v53 = vsel %vm661_vm0, %v698_v59, %v699_v6  ;;  %v6829_v40 = vld [vmem:[%s10091_s3 + $0x544] ss:$8 sps:$4 sm:$0xff]   ;;  %v708_v6 = vrot.slane %v10108_v17, 1 }
  0x63   : > { %3503 = vmatprep.subr.bf16.mxu0 %v6820_v29  ;;  %v10111_v29 = vunpack.c.h.bf16 %v7856_v2  ;;  %v7924_v8 = vpack.c.bf16 %v705_v51, %v700_v53  ;;  %v10116_v17 = vunpack.c.l.bf16 %v7848_v43  ;;  %v6832_v51 = vld [vmem:[%s10091_s3 + $0x554] ss:$8 sps:$4 sm:$0xff]  }
  0x64   : > { %1138 = vmatmul.mubr.bf16.gmra.mrb[4].mxu1 %v872_v44  ;;  %v6833_v44 = vld [vmem:[%s10091_s3 + $0x30] ss:$8 sps:$4 sm:$0xff]   ;;  %v711_v59 = vsel %vm661_vm0, %v7797_v47, %v710_v5 }
  0x65   : > { %3062 = vmatmul.mubr.bf16.gmra.mrb[4].mxu0 %v7850_v46  ;;  %1147 = vmatprep.mubr.bf16.mxu1 %v7668_v18  ;;  %v7905_v18 = vrot.slane %v426_v24, 2  ;;  %v719_v24 = vrot.slane %v10113_v38, 1  ;;  %v724_v47 = vrot.slane %v10111_v29, 1  ;;  %10218 = vst [vmem:[#allocation8_spill] sm:$0xff] %v7924_v8 }
  0x66   : > { %3504 = vmatpush1.bf16.msra.mxu0 %v6818_v41  ;;  %v1664_v41 = vrot.slane %v425_v61, 2  ;;  %3071 = vmatprep.mubr.bf16.mxu0 %v7861_v23  ;;  %v715_v61 = vsel %vm661_vm0, %v710_v5, %v714_v27  ;;  %v6827_v5 = vld [vmem:[%s10091_s3 + $0x540] ss:$8 sps:$4 sm:$0xff]   ;;  %v10117_v27 = vunpack.c.h.bf16 %v7915_v9 }
  0x67   : > { %3505 = vmatprep.subr.bf16.mxu0 %v6823_v19  ;;  %1453 = vmatpush1.bf16.msra.mxu1 %v6824_v33  ;;  %v720_v19 = vrot.slane %v10112_v34, 1  ;;  %v10114_v33 = vunpack.c.l.bf16 %v7856_v2  ;;  %v7940_v53 = vpack.c.bf16 %v715_v61, %v711_v59  ;;  %v1667_v34 = vsel %vm1641_vm1, %v7841_v4, %v7905_v18  ;;  %v6842_v4 = vld [vmem:[%s10091_s3 + $0x40] ss:$8 sps:$4 sm:$0xff]  }
  0x68   : > { %1454 = vmatprep.subr.bf16.mxu1 %v6835_v54  ;;  %v1665_v29 = vsel %vm1641_vm1, %v1663_v15, %v1664_v41  ;;  %v709_v54 = vsel %vm661_vm0, %v704_v11, %v708_v6  ;;  %v6830_v15 = vld [vmem:[%s10091_s3 + $0x550] ss:$8 sps:$4 sm:$0xff]   ;;  %v716_v11 = vrot.slane %v10116_v17, 1  ;;  %v728_v61 = vrot.slane %v10117_v27, 1 }
  0x69   : > { %10219 = vst [vmem:[#allocation9_spill] sm:$0xff] %v7940_v53  ;;  %v721_v38 = vsel %vm661_vm0, %v719_v24, %v720_v19  ;;  %v725_v59 = vsel %vm661_vm0, %v720_v19, %v724_v47  ;;  %v6853_v24 = vld [vmem:[%s10091_s3 + $0x54] ss:$8 sps:$4 sm:$0xff]  }
  0x6a   : > { %3506 = vmatpush1.bf16.msra.mxu0 %v6821_v31  ;;  %v1668_v31 = vrot.slane %v427_v62, 2  ;;  %v451_v62 = vunpack.c.h.bf16 %v7930_v0 }
  0x6b   : > { %3507 = vmatprep.subr.bf16.mxu0 %v6829_v40  ;;  %v713_v40 = vsel %vm661_vm0, %v708_v6, %v712_v57  ;;  %1455 = vmatpush1.bf16.msra.mxu1 %v6833_v44  ;;  %v717_v44 = vrot.slane %v10115_v28, 1  ;;  %v7969_v6 = vrot.slane %v10114_v33, 1  ;;  %v448_v57 = vunpack.c.l.bf16 %v7915_v9 }
  0x6c   : > { %1148 = vmatmul.mubr.bf16.gmra.mrb[8].mxu1 %v7766_v22  ;;  %v6838_v22 = vld [vmem:[%s10091_s3 + $0x564] ss:$8 sps:$4 sm:$0xff]   ;;  %v1669_v19 = vsel %vm1641_vm1, %v1664_v41, %v1668_v31  ;;  %v7982_v33 = vpack.c.bf16 %v1667_v34, %v1662_v36  ;;  %v7989_v28 = vpack.c.bf16 %v725_v59, %v721_v38  ;;  %1456 = vmatprep.subr.bf16.mxu1 %v6844_v56  ;;  %v732_v27 = vrot.slane %v451_v62, 1  ;;  %v6836_v38 = vld [vmem:[%s10091_s3 + $0x560] ss:$8 sps:$4 sm:$0xff]  }
  0x6d   : > { %3072 = vmatmul.mubr.bf16.gmra.mrb[8].mxu0 %v7924_v8  ;;  %1157 = vmatprep.mubr.bf16.mxu1 %v7799_v58  ;;  %v7987_v58 = vpack.c.bf16 %v713_v40, %v709_v54  ;;  %v7991_v17 = vpack.c.bf16 %v1669_v19, %v1665_v29  ;;  %v1672_v34 = vrot.slane %v429_v35, 2  ;;  %v718_v29 = vsel %vm661_vm0, %v716_v11, %v717_v44  ;;  %v6841_v40 = vld [vmem:[%s10091_s3 + $0x574] ss:$8 sps:$4 sm:$0xff]   ;;  %v8033_v41 = vld [vmem:[%s7584_s8 + $0x80] sm:$0xff] }
  0x6e   : > { %3508 = vmatpush1.bf16.msra.mxu0 %v6827_v5  ;;  %3081 = vmatprep.mubr.bf16.mxu0 %v7940_v53  ;;  %10221 = vst [vmem:[#allocation11_spill] sm:$0xff] %v7989_v28  ;;  %v726_v54 = vrot.slane %v448_v57, 1  ;;  %v1676_v35 = vrot.slane %v431_v39, 2  ;;  %v723_v59 = vsel %vm661_vm0, %v717_v44, %v7969_v6  ;;  %v729_v56 = vsel %vm661_vm0, %v724_v47, %v728_v61 }
  0x6f   : > { %3509 = vmatprep.subr.bf16.mxu0 %v6832_v51  ;;  %10220 = vst [vmem:[#allocation10_spill] sm:$0xff] %v7987_v58  ;;  %1457 = vmatpush1.bf16.msra.mxu1 %v6842_v4  ;;  %v450_v51 = vunpack.c.l.bf16 %v7930_v0  ;;  %v6851_v4 = vld [vmem:[%s10091_s3 + $0x50] ss:$8 sps:$4 sm:$0xff]   ;;  %v1673_v11 = vsel %vm1641_vm1, %v1668_v31, %v1672_v34  ;;  %v1670_v39 = vrot.slane %v428_v7, 2  ;;  %v1674_v44 = vrot.slane %v430_v10, 2 }
  0x70   : > { %1458 = vmatprep.subr.bf16.mxu1 %v6853_v24  ;;  %v1677_v19 = vsel %vm1641_vm1, %v1672_v34, %v1676_v35  ;;  %v1681_v47 = vrot.slane %v433_v13, 2  ;;  %v1682_v7 = vrot.slane %v435_v14, 2  ;;  %v8048_v13 = vld [vmem:[%s7584_s8 + $0x88] sm:$0xff]  ;;  %v8056_v14 = vcombine.high %v7606_v52, %v7611_v55 }
  0x71   : > { %v8035_v31 = vpack.c.bf16 %v1677_v19, %v1673_v11  ;;  %v1671_v25 = vsel %vm1641_vm1, %v7905_v18, %v1670_v39  ;;  %v730_v10 = vrot.slane %v450_v51, 1  ;;  %v1675_v18 = vsel %vm1641_vm1, %v1670_v39, %v1674_v44  ;;  %v6847_v52 = vld [vmem:[%s10091_s3 + $0x584] ss:$8 sps:$4 sm:$0xff]  }
  0x72   : > { %3510 = vmatpush1.bf16.msra.mxu0 %v6830_v15  ;;  %v8023_v15 = vld [vmem:[%s7584_s8 + $0x78] sm:$0xff]  ;;  %10222 = vst [vmem:[#allocation12_spill] sm:$0xff] %v8056_v14  ;;  %v8066_v34 = vpack.c.bf16 %v1675_v18, %v1671_v25  ;;  %v1683_v35 = vsel %vm1641_vm1, %v1681_v47, %v1682_v7  ;;  %v1687_v11 = vsel %vm1641_vm1, %v1682_v7, %v1686_v26  ;;  %v1678_v39 = vrot.slane %v432_v12, 2  ;;  %v8111_v7 = vld [vmem:[%s7584_s8 + $0x90] sm:$0xff] }
  0x73   : > { %3511 = vmatprep.subr.bf16.mxu0 %v6838_v22  ;;  %v6862_v22 = vld [vmem:[%s10091_s3 + $0x64] ss:$8 sps:$4 sm:$0xff]   ;;  %v733_v55 = vsel %vm661_vm0, %v728_v61, %v732_v27  ;;  %v455_v19 = vunpack.c.h.bf16 %v8033_v41  ;;  %v8079_v44 = vpack.c.bf16 %v1687_v11, %v1683_v35  ;;  %1459 = vmatpush1.bf16.msra.mxu1 %v6851_v4  ;;  %v457_v47 = vunpack.c.h.bf16 %v8048_v13  ;;  %v6845_v4 = vld [vmem:[%s10091_s3 + $0x580] ss:$8 sps:$4 sm:$0xff]   ;;  %v8131_v35 = vld [vmem:[%s7584_s8 + $0x98] sm:$0x11] }
  0x74   : > { %1158 = vmatmul.mubr.bf16.gmra.mrb[12].mxu1 %v7850_v46  ;;  %v6839_v46 = vld [vmem:[%s10091_s3 + $0x570] ss:$8 sps:$4 sm:$0xff]   ;;  %v1679_v12 = vrot.slane %v434_v32, 2  ;;  %v727_v27 = vsel %vm661_vm0, %v7969_v6, %v726_v54  ;;  %1460 = vmatprep.subr.bf16.mxu1 %v6862_v22  ;;  %v1684_v61 = vrot.slane %v436_v30, 2  ;;  %v8099_v32 = vpack.c.bf16 %v733_v55, %v729_v56  ;;  %v6880_v55 = vld [vmem:[%s10091_s3 + $0x84] ss:$8 sps:$4 sm:$0xff]  }
  0x75   : > { %3082 = vmatmul.mubr.bf16.gmra.mrb[12].mxu0 %v7987_v58  ;;  %1167 = vmatprep.mubr.bf16.mxu1 %v7861_v23  ;;  %v1690_v6 = vrot.slane %v439_v37, 2  ;;  %v738_v30 = vrot.slane %v455_v19, 1  ;;  %v10122_v25 = vunpack.c.l.bf16 %v8023_v15  ;;  %v6871_v37 = vld [vmem:[%s10091_s3 + $0x74] ss:$8 sps:$4 sm:$0xff]   ;;  %v6848_v22 = vld [vmem:[%s10091_s3 + $0x590] ss:$8 sps:$4 sm:$0xff]   ;;  %v10121_v18 = vunpack.c.l.bf16 %v8033_v41 }
  0x76   : > { %3512 = vmatpush1.bf16.msra.mxu0 %v6836_v38  ;;  %3091 = vmatprep.mubr.bf16.mxu0 %v7989_v28  ;;  %v453_v38 = vunpack.c.h.bf16 %v8023_v15  ;;  %10225 = vst [vmem:[#allocation15_spill] sm:$0xff] %v8099_v32  ;;  %v1685_v56 = vsel %vm1641_vm1, %v1679_v12, %v1684_v61  ;;  %v6869_v11 = vld [vmem:[%s10091_s3 + $0x70] ss:$8 sps:$4 sm:$0xff]   ;;  %v10229_v24 = vunpack.c.l.bf16 %v7808_v1 }
  0x77   : > { %3513 = vmatprep.subr.bf16.mxu0 %v6841_v40  ;;  %v8087_v40 = vpack.c.bf16 %v723_v59, %v718_v29  ;;  %v731_v29 = vsel %vm661_vm0, %v726_v54, %v730_v10  ;;  %v1680_v59 = vsel %vm1641_vm1, %v1678_v39, %v1679_v12  ;;  %v8116_v54 = vrot.slane %v457_v47, 1  ;;  %1461 = vmatpush1.bf16.msra.mxu1 %v6860_v42 }
  0x78   : > { %v737_v60 = vrot.slane %v453_v38, 1  ;;  %v8121_v10 = vpack.c.bf16 %v1685_v56, %v1680_v59  ;;  %v1691_v39 = vsel %vm1641_vm1, %v1686_v26, %v1690_v6  ;;  %v10227_v42 = vunpack.c.h.bf16 %v7808_v1  ;;  %v6856_v26 = vld [vmem:[%s10091_s3 + $0x5a4] ss:$8 sps:$4 sm:$0xff]   ;;  %1462 = vmatprep.subr.bf16.mxu1 %v6871_v37 }
  0x79   : > { %10224 = vst [vmem:[#allocation14_spill] sm:$0xff] %v8087_v40  ;;  %v10228_v59 = vunpack.c.l.bf16 %v7805_v63  ;;  %v743_v63 = vsel %vm661_vm0, %v738_v30, %v8116_v54 }
  0x7a   : > { %3514 = vmatpush1.bf16.msra.mxu0 %v6839_v46  ;;  %v10120_v46 = vunpack.c.l.bf16 %v8048_v13  ;;  %v1694_v12 = vrot.slane %v10227_v42, 2  ;;  %v1692_v42 = vrot.slane %v10229_v24, 2 }
  0x7b   : > { %3515 = vmatprep.subr.bf16.mxu0 %v6847_v52  ;;  %v8138_v52 = vpack.c.bf16 %v731_v29, %v727_v27  ;;  %v1688_v56 = vrot.slane %v10228_v59, 2  ;;  %v739_v27 = vsel %vm661_vm0, %v737_v60, %v738_v30  ;;  %v10119_v29 = vunpack.c.h.bf16 %v8111_v7  ;;  %1463 = vmatpush1.bf16.msra.mxu1 %v6869_v11  ;;  %v6854_v30 = vld [vmem:[%s10091_s3 + $0x5a0] ss:$8 sps:$4 sm:$0xff]  }
  0x7c   : > { %1168 = vmatmul.mubr.bf16.gmra.mrb[16].mxu1 %v7924_v8  ;;  %v1695_v59 = vsel %vm1641_vm1, %v1690_v6, %v1694_v12  ;;  %v735_v60 = vrot.slane %v10121_v18, 1  ;;  %v8166_v5 = vrot.slane %v10120_v46, 1  ;;  %1464 = vmatprep.subr.bf16.mxu1 %v6880_v55  ;;  %v8177_v6 = vpack.c.bf16 %v743_v63, %v739_v27 }
  0x7d   : > { %3092 = vmatmul.mubr.bf16.gmra.mrb[16].mxu0 %v8087_v40  ;;  %1177 = vmatprep.mubr.bf16.mxu1 %v7940_v53  ;;  %10226 = vst [vmem:[#allocation16_spill] sm:$0xff] %v8138_v52  ;;  %v1689_v36 = vsel %vm1641_vm1, %v1684_v61, %v1688_v56  ;;  %v8168_v1 = vpack.c.bf16 %v1695_v59, %v1691_v39  ;;  %v6859_v61 = vld [vmem:[%s10091_s3 + $0x5b4] ss:$8 sps:$4 sm:$0xff]   ;;  %v746_v37 = vrot.slane %v10119_v29, 1  ;;  %v6878_v39 = vld [vmem:[%s10091_s3 + $0x80] ss:$8 sps:$4 sm:$0xff]   ;;  %v10231_v55 = vunpack.c.h.bf16 %v7848_v43 }
  0x7e   : > { %3516 = vmatpush1.bf16.msra.mxu0 %v6845_v4  ;;  %3101 = vmatprep.mubr.bf16.mxu0 %v8099_v32  ;;  %v734_v4 = vrot.slane %v10122_v25, 1  ;;  %v1693_v24 = vsel %vm1641_vm1, %v1688_v56, %v1692_v42  ;;  %10230 = vst [vmem:[#allocation17_spill] sm:$0xff] %v8177_v6  ;;  %v10232_v56 = vunpack.c.h.bf16 %v7853_v3  ;;  %v10233_v27 = vunpack.c.h.bf16 %v7856_v2 }
  0x7f   : > { %3517 = vmatprep.subr.bf16.mxu0 %v6850_v45  ;;  %v10118_v45 = vunpack.c.h.bf16 %v8131_v35  ;;  %v8181_v11 = vpack.c.bf16 %v1693_v24, %v1689_v36  ;;  %v1699_v12 = vrot.slane %v10231_v55, 2  ;;  %v741_v63 = vsel %vm661_vm0, %v735_v60, %v8166_v5  ;;  %v6886_v24 = vld [vmem:[%s10091_s3 + $0x94] ss:$8 sps:$4 sm:$0xff]   ;;  %v6857_v55 = vld [vmem:[%s10091_s3 + $0x5b0] ss:$8 sps:$4 sm:$0xff]   ;;  %1465 = vmatpush1.bf16.msra.mxu1 %v6878_v39 }
  0x80   : > { %v1704_v42 = vrot.slane %v10233_v27, 2  ;;  %v736_v36 = vsel %vm661_vm0, %v734_v4, %v735_v60  ;;  %v458_v59 = vunpack.c.l.bf16 %v8111_v7  ;;  %v10234_v60 = vunpack.c.l.bf16 %v7848_v43  ;;  %v6884_v43 = vld [vmem:[%s10091_s3 + $0x90] ss:$8 sps:$4 sm:$0xff]   ;;  %1466 = vmatprep.subr.bf16.mxu1 %v6886_v24 }
  0x81   : > { %v747_v46 = vsel %vm661_vm0, %v8116_v54, %v746_v37  ;;  %v8228_v25 = vpack.c.bf16 %v741_v63, %v736_v36  ;;  %v1712_v54 = vrot.slane %v451_v62, 2  ;;  %v6868_v62 = vld [vmem:[%s10091_s3 + $0x5d4] ss:$8 sps:$4 sm:$0xff]  }
  0x82   : > { %3518 = vmatpush1.bf16.msra.mxu0 %v6848_v22  ;;  %v750_v22 = vrot.slane %v10118_v45, 1  ;;  %v1696_v45 = vrot.slane %v10234_v60, 2 }
  0x83   : > { %3519 = vmatprep.subr.bf16.mxu0 %v6856_v26  ;;  %v1700_v26 = vrot.slane %v10232_v56, 2  ;;  %v460_v56 = vunpack.c.l.bf16 %v8131_v35  ;;  %10237 = vst [vmem:[#allocation18_spill] sm:$0xff] %v8228_v25  ;;  %1467 = vmatpush1.bf16.msra.mxu1 %v6884_v43  ;;  %v1710_v43 = vrot.slane %v450_v51, 2 }
  0x84   : > { %1178 = vmatmul.mubr.bf16.gmra.mrb[20].mxu1 %v7987_v58  ;;  %v751_v18 = vsel %vm661_vm0, %v746_v37, %v750_v22  ;;  %v6863_v37 = vld [vmem:[%s10091_s3 + $0x5c0] ss:$8 sps:$4 sm:$0xff]  }
  0x85   : > { %3102 = vmatmul.mubr.bf16.gmra.mrb[20].mxu0 %v8138_v52  ;;  %1187 = vmatprep.mubr.bf16.mxu1 %v7989_v28  ;;  %v1701_v4 = vsel %vm1641_vm1, %v1699_v12, %v1700_v26  ;;  %v1705_v27 = vsel %vm1641_vm1, %v1700_v26, %v1704_v42  ;;  %v10236_v26 = vunpack.c.l.bf16 %v7856_v2  ;;  %v748_v2 = vrot.slane %v460_v56, 1 }
  0x86   : > { %3520 = vmatpush1.bf16.msra.mxu0 %v6854_v30  ;;  %3111 = vmatprep.mubr.bf16.mxu0 %v8177_v6  ;;  %v6865_v30 = vld [vmem:[%s10091_s3 + $0x5c4] ss:$8 sps:$4 sm:$0xff]   ;;  %v8216_v29 = vpack.c.bf16 %v1705_v27, %v1701_v4  ;;  %v10238_v4 = vunpack.c.h.bf16 %v7915_v9  ;;  %v8246_v36 = vpack.c.bf16 %v751_v18, %v747_v46  ;;  %v6890_v18 = vld [vmem:[%s10091_s3 + $0xa0] ss:$8 sps:$4 sm:$0xff]  }
  0x87   : > { %3521 = vmatprep.subr.bf16.mxu0 %v6859_v61  ;;  %v10235_v61 = vunpack.c.l.bf16 %v7853_v3  ;;  %v1702_v60 = vrot.slane %v10236_v26, 2  ;;  %v744_v3 = vrot.slane %v458_v59, 1  ;;  %v6898_v26 = vld [vmem:[%s10091_s3 + $0xb4] ss:$8 sps:$4 sm:$0xff]   ;;  %v6874_v9 = vld [vmem:[%s10091_s3 + $0x5e4] ss:$8 sps:$4 sm:$0xff]  }
  0x88   : > { %v1708_v27 = vrot.slane %v10238_v4, 2  ;;  %10239 = vst [vmem:[#allocation19_spill] sm:$0xff] %v8246_v36 }
  0x89   : > { %v1697_v12 = vrot.slane %v10235_v61, 2  ;;  %v745_v61 = vsel %vm661_vm0, %v8166_v5, %v744_v3  ;;  %v6872_v5 = vld [vmem:[%s10091_s3 + $0x5e0] ss:$8 sps:$4 sm:$0xff]  }
  0x8a   : > { %3522 = vmatpush1.bf16.msra.mxu0 %v6857_v55  ;;  %v1709_v24 = vsel %vm1641_vm1, %v1704_v42, %v1708_v27  ;;  %v6866_v55 = vld [vmem:[%s10091_s3 + $0x5d0] ss:$8 sps:$4 sm:$0xff]   ;;  %v1706_v42 = vrot.slane %v448_v57, 2 }
  0x8b   : > { %v1698_v22 = vsel %vm1641_vm1, %v1696_v45, %v1697_v12  ;;  %v1703_v39 = vsel %vm1641_vm1, %v1697_v12, %v1702_v60  ;;  %3523 = vmatprep.subr.bf16.mxu0 %v6865_v30  ;;  %v6892_v45 = vld [vmem:[%s10091_s3 + $0xa4] ss:$8 sps:$4 sm:$0xff]   ;;  %v1713_v30 = vsel %vm1641_vm1, %v1708_v27, %v1712_v54  ;;  %v749_v12 = vsel %vm661_vm0, %v744_v3, %v748_v2 }
  0x8c   : > { %v8248_v63 = vpack.c.bf16 %v1703_v39, %v1698_v22  ;;  %1188 = vmatmul.mubr.bf16.gmra.mrb[24].mxu1 %v8087_v40  ;;  %v8263_v46 = vpack.c.bf16 %v1713_v30, %v1709_v24  ;;  %v1707_v0 = vsel %vm1641_vm1, %v1702_v60, %v1706_v42  ;;  %v1711_v57 = vsel %vm1641_vm1, %v1706_v42, %v1710_v43  ;;  %v6877_v60 = vld [vmem:[%s10091_s3 + $0x5f4] ss:$8 sps:$4 sm:$0xff]   ;;  %v8295_v54 = vld [vmem:[%s7584_s8 + $0xa0] sm:$0xff]  ;;  %v8302_v2 = vld [vmem:[%s7584_s8 + $0xa8] sm:$0xff] }
  0x8d   : > { %3112 = vmatmul.mubr.bf16.gmra.mrb[24].mxu0 %v8228_v25  ;;  %1197 = vmatprep.mubr.bf16.mxu1 %v8099_v32  ;;  %v8285_v51 = vpack.c.bf16 %v1711_v57, %v1707_v0  ;;  %v8287_v4 = vpack.c.bf16 %v749_v12, %v745_v61  ;;  %v1717_v27 = vrot.slane %v453_v38, 2  ;;  %v1722_v3 = vrot.slane %v457_v47, 2  ;;  %v8305_v22 = vld [vmem:[%s7584_s8 + $0xb0] sm:$0xff] }
  0x8e   : > { %3524 = vmatpush1.bf16.msra.mxu0 %v6863_v37  ;;  %3121 = vmatprep.mubr.bf16.mxu0 %v8246_v36  ;;  %v1718_v37 = vrot.slane %v455_v19, 2  ;;  %v10241_v38 = vunpack.c.l.bf16 %v8023_v15  ;;  %v6904_v19 = vld [vmem:[%s10091_s3 + $0xc4] ss:$8 sps:$4 sm:$0xff]   ;;  %v10242_v15 = vunpack.c.l.bf16 %v8033_v41  ;;  %v6875_v30 = vld [vmem:[%s10091_s3 + $0x5f0] ss:$8 sps:$4 sm:$0xff]   ;;  %v10129_v42 = vunpack.c.h.bf16 %v8302_v2 }
  0x8f   : > { %3525 = vmatprep.subr.bf16.mxu0 %v6868_v62  ;;  %1468 = vmatprep.subr.bf16.mxu1 %v6892_v45  ;;  %10240 = vst [vmem:[#allocation20_spill] sm:$0xff] %v8287_v4  ;;  %v6896_v62 = vld [vmem:[%s10091_s3 + $0xb0] ss:$8 sps:$4 sm:$0xff]   ;;  %v10243_v43 = vunpack.c.l.bf16 %v8048_v13  ;;  %v10244_v12 = vunpack.c.h.bf16 %v8111_v7  ;;  %v6883_v41 = vld [vmem:[%s10091_s3 + $0x604] ss:$8 sps:$4 sm:$0xff]   ;;  %v10245_v57 = vunpack.c.h.bf16 %v8131_v35 }
  0x90   : > { %1469 = vmatpush1.bf16.msra.mxu1 %v6890_v18  ;;  %v1714_v39 = vrot.slane %v10241_v38, 2  ;;  %v1719_v24 = vsel %vm1641_vm1, %v1717_v27, %v1718_v37  ;;  %v1715_v45 = vrot.slane %v10242_v15, 2  ;;  %v10130_v18 = vunpack.c.h.bf16 %v8295_v54  ;;  %v6902_v13 = vld [vmem:[%s10091_s3 + $0xc0] ss:$8 sps:$4 sm:$0xff]   ;;  %v8360_v15 = vld [vmem:[%s7584_s8 + $0xb8] sm:$0xff] }
  0x91   : > { %1470 = vmatprep.subr.bf16.mxu1 %v6898_v26  ;;  %v1720_v61 = vrot.slane %v10243_v43, 2  ;;  %v1726_v26 = vrot.slane %v10244_v12, 2  ;;  %v8371_v43 = vld [vmem:[%s7584_s8 + $0xc0] sm:$0x11]  ;;  %v6910_v12 = vld [vmem:[%s10091_s3 + $0xd4] ss:$8 sps:$4 sm:$0xff]  }
  0x92   : > { %3526 = vmatpush1.bf16.msra.mxu0 %v6866_v55  ;;  %v1723_v55 = vsel %vm1641_vm1, %v1718_v37, %v1722_v3  ;;  %v1716_v0 = vsel %vm1641_vm1, %v1714_v39, %v1715_v45  ;;  %v6908_v7 = vld [vmem:[%s10091_s3 + $0xd0] ss:$8 sps:$4 sm:$0xff]  }
  0x93   : > { %3527 = vmatprep.subr.bf16.mxu0 %v6874_v9  ;;  %v8319_v47 = vpack.c.bf16 %v1723_v55, %v1719_v24  ;;  %v10128_v9 = vunpack.c.h.bf16 %v8305_v22  ;;  %v1721_v27 = vsel %vm1641_vm1, %v1715_v45, %v1720_v61  ;;  %v1727_v38 = vsel %vm1641_vm1, %v1722_v3, %v1726_v26 }
  0x94   : > { %1198 = vmatmul.mubr.bf16.gmra.mrb[28].mxu1 %v8138_v52  ;;  %v8348_v37 = vpack.c.bf16 %v1721_v27, %v1716_v0  ;;  %v755_v24 = vrot.slane %v10130_v18, 1  ;;  %v756_v55 = vrot.slane %v10129_v42, 1  ;;  %v1724_v45 = vrot.slane %v458_v59, 2  ;;  %v6907_v42 = vld [vmem:[%s10091_s3 + $0x644] ss:$8 sps:$4 sm:$0xff]  }
  0x95   : > { %3122 = vmatmul.mubr.bf16.gmra.mrb[28].mxu0 %v8287_v4  ;;  %1207 = vmatprep.mubr.bf16.mxu1 %v8177_v6  ;;  %v760_v3 = vrot.slane %v10128_v9, 1  ;;  %v10126_v0 = vunpack.c.l.bf16 %v8305_v22  ;;  %v6949_v52 = vld [vmem:[%s10091_s3 + $0x6a4] ss:$8 sps:$4 sm:$0xff]  }
  0x96   : > { %3528 = vmatpush1.bf16.msra.mxu0 %v6872_v5  ;;  %3531 = vmatprep.mubr.bf16.mxu0 %v7991_v17  ;;  %v1730_v5 = vrot.slane %v10245_v57, 2  ;;  %10246 = vst [vmem:[#allocation21_spill] sm:$0xff] %v8348_v37  ;;  %v1725_v35 = vsel %vm1641_vm1, %v1720_v61, %v1724_v45  ;;  %v10125_v57 = vunpack.c.h.bf16 %v8360_v15  ;;  %v757_v61 = vsel %vm661_vm0, %v755_v24, %v756_v55 }
  0x97   : > { %3529 = vmatprep.subr.bf16.mxu0 %v6877_v60  ;;  %1471 = vmatpush1.bf16.msra.mxu1 %v6896_v62  ;;  %v6881_v60 = vld [vmem:[%s10091_s3 + $0x600] ss:$8 sps:$4 sm:$0xff]   ;;  %v6889_v62 = vld [vmem:[%s10091_s3 + $0x614] ss:$8 sps:$4 sm:$0xff]   ;;  %v761_v27 = vsel %vm661_vm0, %v756_v55, %v760_v3  ;;  %v758_v55 = vrot.slane %v10126_v0, 1 }
  0x98   : > { %1472 = vmatprep.subr.bf16.mxu1 %v6904_v19  ;;  %v1731_v39 = vsel %vm1641_vm1, %v1726_v26, %v1730_v5  ;;  %v10127_v26 = vunpack.c.l.bf16 %v8295_v54  ;;  %v6916_v5 = vld [vmem:[%s10091_s3 + $0xe4] ss:$8 sps:$4 sm:$0xff]   ;;  %v8410_v24 = vpack.c.bf16 %v761_v27, %v757_v61  ;;  %v6922_v61 = vld [vmem:[%s10091_s3 + $0xf4] ss:$8 sps:$4 sm:$0xff]   ;;  %v6899_v0 = vld [vmem:[%s10091_s3 + $0x630] ss:$8 sps:$4 sm:$0xff]  }
  0x99   : > { %v8362_v19 = vpack.c.bf16 %v1731_v39, %v1727_v38  ;;  %v10124_v38 = vunpack.c.h.bf16 %v8371_v43 }
  0x9a   : > { %3530 = vmatpush1.bf16.msra.mxu0 %v6875_v30  ;;  %v1728_v30 = vrot.slane %v460_v56, 2  ;;  %v6887_v56 = vld [vmem:[%s10091_s3 + $0x610] ss:$8 sps:$4 sm:$0xff]   ;;  %v752_v39 = vrot.slane %v10127_v26, 1  ;;  %10248 = vst [vmem:[#allocation23_spill] sm:$0xff] %v8410_v24 }
  0x9b   : > { %10247 = vst [vmem:[#allocation22_spill] sm:$0xff] %v8362_v19  ;;  %3953 = vmatprep.subr.bf16.mxu0 %v6883_v41  ;;  %1473 = vmatpush1.bf16.msra.mxu1 %v6902_v13  ;;  %v10123_v41 = vunpack.c.l.bf16 %v8302_v2 }
  0x9c   : > { %1208 = vmatmul.mubr.bf16.gmra.mrb[32].mxu1 %v8228_v25  ;;  %v1729_v59 = vsel %vm1641_vm1, %v1724_v45, %v1728_v30  ;;  %1474 = vmatprep.subr.bf16.mxu1 %v6910_v12  ;;  %v764_v30 = vrot.slane %v10125_v57, 1  ;;  %v6901_v12 = vld [vmem:[%s10091_s3 + $0x634] ss:$8 sps:$4 sm:$0xff]   ;;  %v10136_v57 = vunpack.c.l.bf16 %v8371_v43  ;;  %v8566_v25 = vld [vmem:[%s7584_s8 + $0x108] sm:$0xff] }
  0x9d   : > { %3532 = vmatmul.mubr.bf16.vlgmr.msra.gmra.mrb[0].mxu0 %v7982_v33  ;;  %1217 = vmatprep.mubr.bf16.mxu1 %v8246_v36  ;;  %v8394_v13 = vpack.c.bf16 %v1729_v59, %v1725_v35  ;;  %v753_v45 = vrot.slane %v10123_v41, 1  ;;  %v8420_v35 = vld [vmem:[%s7584_s8 + $0xc8] sm:$0xff]  ;;  %v8423_v59 = vld [vmem:[%s7584_s8 + $0xd0] sm:$0xff]  ;;  %v8426_v41 = vld [vmem:[%s7584_s8 + $0xd8] sm:$0xff] }
  0x9e   : > { %3954 = vmatpush1.bf16.msra.mxu0 %v6881_v60  ;;  %3541 = vmatprep.mubr.bf16.mxu0 %v8035_v31  ;;  %v6895_v60 = vld [vmem:[%s10091_s3 + $0x624] ss:$8 sps:$4 sm:$0xff]   ;;  %v10135_v26 = vunpack.c.h.bf16 %v8420_v35  ;;  %v10134_v9 = vunpack.c.h.bf16 %v8423_v59 }
  0x9f   : > { %3955 = vmatprep.subr.bf16.mxu0 %v6889_v62  ;;  %v6893_v62 = vld [vmem:[%s10091_s3 + $0x620] ss:$8 sps:$4 sm:$0xff]   ;;  %1475 = vmatpush1.bf16.msra.mxu1 %v6908_v7  ;;  %v768_v7 = vrot.slane %v10124_v38, 1  ;;  %v754_v27 = vsel %vm661_vm0, %v752_v39, %v753_v45  ;;  %v10137_v38 = vunpack.c.l.bf16 %v8360_v15 }
  0xa0   : > { %1476 = vmatprep.subr.bf16.mxu1 %v6916_v5  ;;  %v759_v5 = vsel %vm661_vm0, %v753_v45, %v758_v55  ;;  %v8476_v45 = vld [vmem:[%s7584_s8 + $0xe8] sm:$0x11] }
  0xa1   : > { %v769_v39 = vsel %vm661_vm0, %v764_v30, %v768_v7  ;;  %v6905_v7 = vld [vmem:[%s10091_s3 + $0x640] ss:$8 sps:$4 sm:$0xff]   ;;  %v10258_v36 = vunpack.c.l.bf16 %v8476_v45 }
  0xa2   : > { %3956 = vmatpush1.bf16.msra.mxu0 %v6887_v56  ;;  %v6914_v56 = vld [vmem:[%s10091_s3 + $0xe0] ss:$8 sps:$4 sm:$0xff]  }
  0xa3   : > { %3957 = vmatprep.subr.bf16.mxu0 %v6895_v60  ;;  %v765_v60 = vsel %vm661_vm0, %v760_v3, %v764_v30  ;;  %1477 = vmatpush1.bf16.msra.mxu1 %v6914_v56  ;;  %v6920_v3 = vld [vmem:[%s10091_s3 + $0xf0] ss:$8 sps:$4 sm:$0xff]   ;;  %v8461_v30 = vpack.c.bf16 %v759_v5, %v754_v27  ;;  %v8467_v56 = vld [vmem:[%s7584_s8 + $0xe0] sm:$0xff]  ;;  %v773_v27 = vrot.slane %v10135_v26, 1  ;;  %v774_v5 = vrot.slane %v10134_v9, 1 }
  0xa4   : > { %1218 = vmatmul.mubr.bf16.gmra.mrb[36].mxu1 %v8287_v4  ;;  %1478 = vmatprep.subr.bf16.mxu1 %v6922_v61  ;;  %v8469_v18 = vpack.c.bf16 %v769_v39, %v765_v60  ;;  %v766_v61 = vrot.slane %v10136_v57, 1  ;;  %v6913_v60 = vld [vmem:[%s10091_s3 + $0x654] ss:$8 sps:$4 sm:$0xff]   ;;  %v10141_v39 = vunpack.c.l.bf16 %v8423_v59  ;;  %v10142_v9 = vunpack.c.l.bf16 %v8426_v41  ;;  %v6911_v26 = vld [vmem:[%s10091_s3 + $0x650] ss:$8 sps:$4 sm:$0xff]  }
  0xa5   : > { %3542 = vmatmul.mubr.bf16.gmra.mrb[4].mxu0 %v8066_v34  ;;  %1227 = vmatprep.mubr.bf16.mxu1 %v8410_v24  ;;  %10249 = vst [vmem:[#allocation24_spill] sm:$0xff] %v8461_v30  ;;  %v10251_v24 = vunpack.c.h.bf16 %v8426_v41  ;;  %v6919_v57 = vld [vmem:[%s10091_s3 + $0x664] ss:$8 sps:$4 sm:$0xff]   ;;  %v8609_v6 = vcombine.low %v8426_v41, %v8467_v56 }
  0xa6   : > { %3551 = vmatprep.mubr.bf16.mxu0 %v8079_v44  ;;  %3958 = vmatpush1.bf16.msra.mxu0 %v6893_v62  ;;  %v6930_v62 = vld [vmem:[%s10091_s3 + $0x204] ss:$8 sps:$4 sm:$0xff]   ;;  %10250 = vst [vmem:[#allocation25_spill] sm:$0xff] %v8469_v18 }
  0xa7   : > { %3959 = vmatprep.subr.bf16.mxu0 %v6901_v12  ;;  %v762_v12 = vrot.slane %v10137_v38, 1  ;;  %v778_v4 = vrot.slane %v10251_v24, 1  ;;  %1479 = vmatpush1.bf16.msra.mxu1 %v6920_v3  ;;  %v775_v38 = vsel %vm661_vm0, %v773_v27, %v774_v5 }
  0xa8   : > { %2075 = vmatprep.subr.bf16.mxu1 %v6930_v62  ;;  %v771_v62 = vrot.slane %v10141_v39, 1  ;;  %v8530_v39 = vld [vmem:[%s7584_s8 + $0x100] sm:$0xff] }
  0xa9   : > { %v763_v24 = vsel %vm661_vm0, %v758_v55, %v762_v12  ;;  %v767_v3 = vsel %vm661_vm0, %v762_v12, %v766_v61  ;;  %v779_v55 = vsel %vm661_vm0, %v774_v5, %v778_v4 }
  0xaa   : > { %3960 = vmatpush1.bf16.msra.mxu0 %v6899_v0  ;;  %v10140_v0 = vunpack.c.l.bf16 %v8420_v35  ;;  %v8506_v12 = vpack.c.bf16 %v767_v3, %v763_v24  ;;  %v8517_v27 = vpack.c.bf16 %v779_v55, %v775_v38  ;;  %v8524_v3 = vld [vmem:[%s7584_s8 + $0xf0] sm:$0xff] }
  0xab   : > { %3961 = vmatprep.subr.bf16.mxu0 %v6907_v42  ;;  %v776_v42 = vrot.slane %v10142_v9, 1  ;;  %v6925_v9 = vld [vmem:[%s10091_s3 + $0x674] ss:$8 sps:$4 sm:$0xff]  }
  0xac   : > { %1228 = vmatmul.mubr.bf16.gmra.mrb[40].mxu1 %v8461_v30  ;;  %10252 = vst [vmem:[#allocation26_spill] sm:$0xff] %v8506_v12  ;;  %v770_v61 = vrot.slane %v10140_v0, 1  ;;  %10253 = vst [vmem:[#allocation27_spill] sm:$0xff] %v8517_v27  ;;  %v8527_v0 = vld [vmem:[%s7584_s8 + $0xf8] sm:$0xff] }
  0xad   : > { %3552 = vmatmul.mubr.bf16.gmra.mrb[8].mxu0 %v8121_v10  ;;  %1237 = vmatprep.mubr.bf16.mxu1 %v8469_v18  ;;  %v6917_v18 = vld [vmem:[%s10091_s3 + $0x660] ss:$8 sps:$4 sm:$0xff]   ;;  %v777_v55 = vsel %vm661_vm0, %v771_v62, %v776_v42  ;;  %v10263_v40 = vunpack.c.l.bf16 %v8527_v0 }
  0xae   : > { %3561 = vmatprep.mubr.bf16.mxu0 %v8168_v1  ;;  %3962 = vmatpush1.bf16.msra.mxu0 %v6905_v7  ;;  %v10254_v7 = vunpack.c.h.bf16 %v8467_v56  ;;  %v772_v38 = vsel %vm661_vm0, %v770_v61, %v771_v62  ;;  %v6923_v61 = vld [vmem:[%s10091_s3 + $0x670] ss:$8 sps:$4 sm:$0xff]   ;;  %v6933_v62 = vld [vmem:[%s10091_s3 + $0x684] ss:$8 sps:$4 sm:$0xff]  }
  0xaf   : > { %3963 = vmatprep.subr.bf16.mxu0 %v6913_v60  ;;  %v10255_v60 = vunpack.c.h.bf16 %v8476_v45  ;;  %v789_v28 = vrot.slane %v10263_v40, 1 }
  0xb0   : > { %v782_v5 = vrot.slane %v10254_v7, 1 }
  0xb1   : > { %v786_v24 = vrot.slane %v10255_v60, 1 }
  0xb2   : > { %3964 = vmatpush1.bf16.msra.mxu0 %v6911_v26  ;;  %v783_v7 = vsel %vm661_vm0, %v778_v4, %v782_v5  ;;  %v10151_v26 = vunpack.c.l.bf16 %v8467_v56  ;;  %v8569_v4 = vld [vmem:[%s7584_s8 + $0x110] sm:$0x11] }
  0xb3   : > { %3965 = vmatprep.subr.bf16.mxu0 %v6919_v57  ;;  %v787_v60 = vsel %vm661_vm0, %v782_v5, %v786_v24  ;;  %v8554_v5 = vpack.c.bf16 %v777_v55, %v772_v38  ;;  %v6931_v57 = vld [vmem:[%s10091_s3 + $0x680] ss:$8 sps:$4 sm:$0xff]   ;;  %v8580_v38 = vcombine.low %v8420_v35, %v8423_v59  ;;  %v10259_v55 = vunpack.c.h.bf16 %v8524_v3 }
  0xb4   : > { %1238 = vmatmul.mubr.bf16.gmra.mrb[44].mxu1 %v8506_v12  ;;  %v10154_v12 = vunpack.c.h.bf16 %v8530_v39  ;;  %v8556_v24 = vpack.c.bf16 %v787_v60, %v783_v7  ;;  %v780_v30 = vrot.slane %v10151_v26, 1  ;;  %v10269_v53 = vunpack.c.l.bf16 %v8569_v4 }
  0xb5   : > { %3562 = vmatmul.mubr.bf16.gmra.mrb[12].mxu0 %v8181_v11  ;;  %1247 = vmatprep.mubr.bf16.mxu1 %v8517_v27  ;;  %10256 = vst [vmem:[#allocation28_spill] sm:$0xff] %v8554_v5  ;;  %v784_v27 = vrot.slane %v10258_v36, 1  ;;  %v791_v7 = vrot.slane %v10259_v55, 1  ;;  %v10260_v36 = vunpack.c.h.bf16 %v8527_v0  ;;  %v6939_v55 = vld [vmem:[%s10091_s3 + $0x690] ss:$8 sps:$4 sm:$0xff]  }
  0xb6   : > { %3571 = vmatprep.mubr.bf16.mxu0 %v8216_v29  ;;  %3966 = vmatpush1.bf16.msra.mxu0 %v6917_v18  ;;  %10257 = vst [vmem:[#allocation29_spill] sm:$0xff] %v8556_v24  ;;  %v6941_v18 = vld [vmem:[%s10091_s3 + $0x694] ss:$8 sps:$4 sm:$0xff]   ;;  %v796_v26 = vrot.slane %v10154_v12, 1  ;;  %v802_v8 = vrot.slane %v10269_v53, 1 }
  0xb7   : > { %3967 = vmatprep.subr.bf16.mxu0 %v6925_v9  ;;  %v8576_v9 = vcombine.high %v8420_v35, %v8423_v59  ;;  %v792_v60 = vrot.slane %v10260_v36, 1  ;;  %v8597_v36 = vcombine.high %v8426_v41, %v8467_v56  ;;  %v6971_v53 = vld [vmem:[%s10091_s3 + $0x6d0] ss:$8 sps:$4 sm:$0xff]  }
  0xba   : > { %3968 = vmatpush1.bf16.msra.mxu0 %v6923_v61  ;;  %v781_v61 = vsel %vm661_vm0, %v776_v42, %v780_v30  ;;  %v10163_v42 = vunpack.c.h.bf16 %v8569_v4 }
  0xbb   : > { %3969 = vmatprep.subr.bf16.mxu0 %v6933_v62  ;;  %v785_v62 = vsel %vm661_vm0, %v780_v30, %v784_v27  ;;  %v10262_v27 = vunpack.c.l.bf16 %v8524_v3 }
  0xbc   : > { %1248 = vmatmul.mubr.bf16.gmra.mrb[48].mxu1 %v8554_v5  ;;  %v793_v5 = vsel %vm661_vm0, %v791_v7, %v792_v60  ;;  %v8615_v30 = vpack.c.bf16 %v785_v62, %v781_v61  ;;  %v6947_v7 = vld [vmem:[%s10091_s3 + $0x6a0] ss:$8 sps:$4 sm:$0xff]   ;;  %v804_v62 = vrot.slane %v10163_v42, 1 }
  0xbd   : > { %3572 = vmatmul.mubr.bf16.gmra.mrb[16].mxu0 %v8248_v63  ;;  %1257 = vmatprep.mubr.bf16.mxu1 %v8556_v24  ;;  %v797_v24 = vsel %vm661_vm0, %v792_v60, %v796_v26  ;;  %v788_v12 = vrot.slane %v10262_v27, 1  ;;  %v10265_v60 = vunpack.c.l.bf16 %v8530_v39 }
  0xbe   : > { %3581 = vmatprep.mubr.bf16.mxu0 %v8263_v46  ;;  %3970 = vmatpush1.bf16.msra.mxu0 %v6931_v57  ;;  %10261 = vst [vmem:[#allocation30_spill] sm:$0xff] %v8615_v30  ;;  %v8624_v58 = vpack.c.bf16 %v797_v24, %v793_v5  ;;  %v6957_v57 = vld [vmem:[%s10091_s3 + $0x6b4] ss:$8 sps:$4 sm:$0xff]   ;;  %v6955_v5 = vld [vmem:[%s10091_s3 + $0x6b0] ss:$8 sps:$4 sm:$0xff]   ;;  %v8643_v24 = vcombine.high %v8524_v3, %v8527_v0 }
  0xbf   : > { %3971 = vmatprep.subr.bf16.mxu0 %v6941_v18  ;;  %v794_v32 = vrot.slane %v10265_v60, 1  ;;  %v10266_v18 = vunpack.c.h.bf16 %v8566_v25  ;;  %v790_v40 = vsel %vm661_vm0, %v788_v12, %v789_v28  ;;  %v6965_v12 = vld [vmem:[%s10091_s3 + $0x6c4] ss:$8 sps:$4 sm:$0xff]   ;;  %v8655_v60 = vcombine.low %v8524_v3, %v8527_v0 }
  0xc0   : > { %10264 = vst [vmem:[#allocation31_spill] sm:$0xff] %v8624_v58 }
  0xc1   : > { %v800_v61 = vrot.slane %v10266_v18, 1 }
  0xc2   : > { %3972 = vmatpush1.bf16.msra.mxu0 %v6939_v55  ;;  %v10170_v55 = vunpack.c.l.bf16 %v8566_v25 }
  0xc3   : > { %3973 = vmatprep.subr.bf16.mxu0 %v6949_v52  ;;  %v795_v52 = vsel %vm661_vm0, %v789_v28, %v794_v32  ;;  %v801_v18 = vsel %vm661_vm0, %v796_v26, %v800_v61  ;;  %v805_v42 = vsel %vm661_vm0, %v800_v61, %v804_v62  ;;  %v6963_v28 = vld [vmem:[%s10091_s3 + $0x6c0] ss:$8 sps:$4 sm:$0xff]   ;;  %v6973_v26 = vld [vmem:[%s10091_s3 + $0x6d4] ss:$8 sps:$4 sm:$0xff]   ;;  %v10271_v61 = vunpack.c.h.bf16 %v8302_v2 }
  0xc4   : > { %1258 = vmatmul.mubr.bf16.gmra.mrb[52].mxu1 %v8615_v30  ;;  %v8664_v27 = vpack.c.bf16 %v805_v42, %v801_v18  ;;  %v798_v30 = vrot.slane %v10170_v55, 1  ;;  %v10273_v55 = vunpack.c.l.bf16 %v7596_v48 }
  0xc5   : > { %3582 = vmatmul.mubr.bf16.gmra.mrb[20].mxu0 %v8285_v51  ;;  %1267 = vmatprep.mubr.bf16.mxu1 %v8624_v58  ;;  %v8659_v58 = vpack.c.bf16 %v795_v52, %v790_v40  ;;  %v1736_v62 = vrot.slane %v10271_v61, 2  ;;  %v10272_v40 = vunpack.c.h.bf16 %v8305_v22  ;;  %v8686_v52 = vcombine.high %v8530_v39, %v8566_v25 }
  0xc6   : > { %3591 = vmatprep.mubr.bf16.mxu0 %v8319_v47  ;;  %3974 = vmatpush1.bf16.msra.mxu0 %v6947_v7  ;;  %10268 = vst [vmem:[#allocation33_spill] sm:$0xff] %v8664_v27  ;;  %v10270_v7 = vunpack.c.h.bf16 %v8295_v54  ;;  %v799_v18 = vsel %vm661_vm0, %v794_v32, %v798_v30  ;;  %v10274_v32 = vunpack.c.l.bf16 %v7599_v49 }
  0xc7   : > { %3975 = vmatprep.subr.bf16.mxu0 %v6957_v57  ;;  %10267 = vst [vmem:[#allocation32_spill] sm:$0xff] %v8659_v58  ;;  %v1740_v42 = vrot.slane %v10272_v40, 2 }
  0xc8   : > { %v1735_v57 = vrot.slane %v10270_v7, 2  ;;  %v8697_v7 = vcombine.low %v8530_v39, %v8566_v25 }
  0xc9   : > { %v1741_v40 = vsel %vm1641_vm1, %v1736_v62, %v1740_v42 }
  0xca   : > { %3976 = vmatpush1.bf16.msra.mxu0 %v6955_v5  ;;  %v803_v5 = vsel %vm661_vm0, %v798_v30, %v802_v8  ;;  %v1737_v61 = vsel %vm1641_vm1, %v1735_v57, %v1736_v62  ;;  %v1643_v8 = vrot.slane %v10274_v32, 2  ;;  %v10277_v57 = vunpack.c.l.bf16 %v8295_v54 }
  0xcb   : > { %3977 = vmatprep.subr.bf16.mxu0 %v6965_v12  ;;  %v6981_v12 = vld [vmem:[%s10091_s3 + $0x6e4] ss:$8 sps:$4 sm:$0xff]   ;;  %v8705_v30 = vpack.c.bf16 %v803_v5, %v799_v18  ;;  %v10279_v62 = vunpack.c.l.bf16 %v8305_v22  ;;  %v6989_v18 = vld [vmem:[%s10091_s3 + $0x6f4] ss:$8 sps:$4 sm:$0xff]   ;;  %v10280_v5 = vunpack.c.l.bf16 %v7602_v50  ;;  %v10282_v54 = vunpack.c.h.bf16 %v8371_v43 }
  0xcc   : > { %1268 = vmatmul.mubr.bf16.gmra.mrb[56].mxu1 %v8659_v58  ;;  %v6979_v58 = vld [vmem:[%s10091_s3 + $0x6e0] ss:$8 sps:$4 sm:$0xff]  }
  0xcd   : > { %3592 = vmatmul.mubr.bf16.gmra.mrb[24].mxu0 %v8348_v37  ;;  %1277 = vmatprep.mubr.bf16.mxu1 %v8664_v27  ;;  %v1642_v27 = vrot.slane %v10273_v55, 2  ;;  %10275 = vst [vmem:[#allocation34_spill] sm:$0xff] %v8705_v30  ;;  %v1732_v37 = vrot.slane %v10277_v57, 2  ;;  %v1738_v55 = vrot.slane %v10279_v62, 2  ;;  %v8723_v32 = vrot.slane %v10280_v5, 2 }
  0xce   : > { %3601 = vmatprep.mubr.bf16.mxu0 %v8362_v19  ;;  %3978 = vmatpush1.bf16.msra.mxu0 %v6963_v28  ;;  %v8710_v19 = vpack.c.bf16 %v1741_v40, %v1737_v61  ;;  %v10278_v28 = vunpack.c.l.bf16 %v8302_v2  ;;  %v10281_v61 = vunpack.c.h.bf16 %v8360_v15  ;;  %v1748_v57 = vrot.slane %v10282_v54, 2 }
  0xcf   : > { %3979 = vmatprep.subr.bf16.mxu0 %v6973_v26  ;;  %v10283_v2 = vcombine.high %v7596_v48, %v7599_v49  ;;  %v8745_v62 = vsel %vm1641_vm1, %v1643_v8, %v8723_v32 }
  0xd0   : > { %10276 = vst [vmem:[#allocation35_spill] sm:$0xff] %v8710_v19  ;;  %v1733_v26 = vrot.slane %v10278_v28, 2  ;;  %v1744_v40 = vrot.slane %v10281_v61, 2  ;;  %v8738_v28 = vsel %vm1641_vm1, %v1642_v27, %v1643_v8  ;;  %v10284_v8 = vunpack.c.l.bf16 %v8360_v15 }
  0xd1   : > { %v10289_v15 = vcombine.low %v7596_v48, %v7599_v49 }
  0xd2   : > { %3980 = vmatpush1.bf16.msra.mxu0 %v6971_v53  ;;  %v1734_v22 = vsel %vm1641_vm1, %v1732_v37, %v1733_v26  ;;  %v1739_v53 = vsel %vm1641_vm1, %v1733_v26, %v1738_v55  ;;  %v1745_v5 = vsel %vm1641_vm1, %v1740_v42, %v1744_v40  ;;  %v1749_v61 = vsel %vm1641_vm1, %v1744_v40, %v1748_v57  ;;  %v6997_v37 = vld [vmem:[%s10091_s3 + $0x704] ss:$8 sps:$4 sm:$0xff]   ;;  %v6928_v26 = vld [vmem:[%s10091_s3 + $0x200] ss:$8 sps:$4 sm:$0xff]   ;;  %v6938_v57 = vld [vmem:[%s10091_s3 + $0x214] ss:$8 sps:$4 sm:$0xff]  }
  0xd3   : > { %3981 = vmatprep.subr.bf16.mxu0 %v6981_v12  ;;  %v6987_v12 = vld [vmem:[%s10091_s3 + $0x6f0] ss:$8 sps:$4 sm:$0xff]   ;;  %v8754_v27 = vpack.c.bf16 %v1739_v53, %v1734_v22  ;;  %v1742_v54 = vrot.slane %v10284_v8, 2  ;;  %v10285_v42 = vunpack.c.l.bf16 %v8371_v43  ;;  %v10287_v53 = vunpack.c.h.bf16 %v8423_v59 }
  0xd4   : > { %1278 = vmatmul.mubr.bf16.gmra.mrb[60].mxu1 %v8705_v30  ;;  %v10288_v30 = vunpack.c.h.bf16 %v8426_v41  ;;  %v10290_v43 = vcombine.high %v7602_v50, %v7672_v20 }
  0xd5   : > { %3602 = vmatmul.mubr.bf16.gmra.mrb[28].mxu0 %v8394_v13  ;;  %1480 = vmatprep.mubr.bf16.mxu1 %v10283_v2  ;;  %v1746_v40 = vrot.slane %v10285_v42, 2  ;;  %v10286_v2 = vunpack.c.h.bf16 %v8420_v35 }
  0xd6   : > { %3611 = vmatprep.mubr.bf16.mxu0 %v8710_v19  ;;  %3982 = vmatpush1.bf16.msra.mxu0 %v6979_v58  ;;  %v1754_v58 = vrot.slane %v10287_v53, 2  ;;  %v1758_v19 = vrot.slane %v10288_v30, 2  ;;  %v10294_v53 = vunpack.c.h.bf16 %v8467_v56 }
  0xd7   : > { %3983 = vmatprep.subr.bf16.mxu0 %v6989_v18  ;;  %v8763_v18 = vpack.c.bf16 %v1749_v61, %v1745_v5  ;;  %v1753_v22 = vrot.slane %v10286_v2, 2  ;;  %v6936_v5 = vld [vmem:[%s10091_s3 + $0x210] ss:$8 sps:$4 sm:$0xff]   ;;  %v1743_v61 = vsel %vm1641_vm1, %v1738_v55, %v1742_v54  ;;  %v1747_v30 = vsel %vm1641_vm1, %v1742_v54, %v1746_v40 }
  0xd8   : > { %v8792_v8 = vpack.c.bf16 %v1747_v30, %v1743_v61  ;;  %v10291_v55 = vunpack.c.l.bf16 %v8420_v35  ;;  %v10292_v54 = vunpack.c.l.bf16 %v8423_v59  ;;  %v6954_v35 = vld [vmem:[%s10091_s3 + $0x234] ss:$8 sps:$4 sm:$0xff]  }
  0xda   : > { %3984 = vmatpush1.bf16.msra.mxu0 %v6987_v12  ;;  %v1755_v12 = vsel %vm1641_vm1, %v1753_v22, %v1754_v58  ;;  %v1750_v2 = vrot.slane %v10291_v55, 2  ;;  %v1751_v40 = vrot.slane %v10292_v54, 2  ;;  %v7182_v54 = vld [vmem:[%s7584_s8 + $0x10] sm:$0xff] }
  0xdb   : > { %4443 = vmatprep.subr.bf16.mxu0 %v6997_v37  ;;  %v1759_v37 = vsel %vm1641_vm1, %v1754_v58, %v1758_v19  ;;  %v6944_v58 = vld [vmem:[%s10091_s3 + $0x220] ss:$8 sps:$4 sm:$0xff]  }
  0xdc   : > { %1481 = vmatmul.mubr.bf16.vlgmr.msra.gmra.mrb[0].mxu1 %v10289_v15  ;;  %v8794_v42 = vpack.c.bf16 %v1759_v37, %v1755_v12  ;;  %v1762_v15 = vrot.slane %v10294_v53, 2  ;;  %v1752_v59 = vsel %vm1641_vm1, %v1750_v2, %v1751_v40  ;;  %v6952_v37 = vld [vmem:[%s10091_s3 + $0x230] ss:$8 sps:$4 sm:$0xff]   ;;  %v10301_v53 = vunpack.c.l.bf16 %v8476_v45 }
  0xdd   : > { %3612 = vmatmul.mubr.bf16.gmra.mrb[32].mxu0 %v8754_v27  ;;  %2076 = vmatpush1.bf16.msra.mxu1 %v6928_v26  ;;  %v6946_v26 = vld [vmem:[%s10091_s3 + $0x224] ss:$8 sps:$4 sm:$0xff]   ;;  %v7183_v2 = vld [vmem:[%s7584_s8 + $0x18] sm:$0xff] }
  0xde   : > { %1490 = vmatprep.mubr.bf16.mxu1 %v10290_v43  ;;  %3621 = vmatprep.mubr.bf16.mxu0 %v8763_v18  ;;  %v10295_v43 = vunpack.c.h.bf16 %v8476_v45  ;;  %v1763_v30 = vsel %vm1641_vm1, %v1758_v19, %v1762_v15  ;;  %v10300_v19 = vunpack.c.l.bf16 %v8467_v56  ;;  %v6970_v45 = vld [vmem:[%s10091_s3 + $0x254] ss:$8 sps:$4 sm:$0xff]  }
  0xdf   : > { %2077 = vmatprep.subr.bf16.mxu1 %v6938_v57  ;;  %v10293_v57 = vunpack.c.l.bf16 %v8426_v41  ;;  %v10296_v41 = vcombine.low %v7602_v50, %v7672_v20 }
  0xe1   : > { %2078 = vmatpush1.bf16.msra.mxu1 %v6936_v5  ;;  %v1756_v22 = vrot.slane %v10293_v57, 2  ;;  %v1766_v5 = vrot.slane %v10295_v43, 2  ;;  %v8832_v57 = vcombine.high %v7182_v54, %v7183_v2  ;;  %v10302_v43 = vunpack.c.h.bf16 %v8524_v3 }
  0xe2   : > { %2079 = vmatprep.subr.bf16.mxu1 %v6946_v26  ;;  %v6962_v26 = vld [vmem:[%s10091_s3 + $0x244] ss:$8 sps:$4 sm:$0xff]  }
  0xe3   : > { %v1757_v61 = vsel %vm1641_vm1, %v1751_v40, %v1756_v22  ;;  %v1767_v12 = vsel %vm1641_vm1, %v1762_v15, %v1766_v5  ;;  %10298 = vst [vmem:[#allocation37_spill] sm:$0xff] %v8832_v57  ;;  %v1764_v15 = vrot.slane %v10301_v53, 2  ;;  %v1771_v5 = vrot.slane %v10302_v43, 2  ;;  %v6978_v53 = vld [vmem:[%s10091_s3 + $0x264] ss:$8 sps:$4 sm:$0xff]   ;;  %v7185_v43 = vld [vmem:[%s7584_s8 + $0x30] sm:$0xff] }
  0xe4   : > { %1491 = vmatmul.mubr.bf16.gmra.mrb[4].mxu1 %v10296_v41  ;;  %v8828_v55 = vpack.c.bf16 %v1757_v61, %v1752_v59  ;;  %v8834_v40 = vpack.c.bf16 %v1767_v12, %v1763_v30  ;;  %v10304_v59 = vunpack.c.h.bf16 %v8530_v39  ;;  %v6960_v30 = vld [vmem:[%s10091_s3 + $0x240] ss:$8 sps:$4 sm:$0xff]  }
  0xe5   : > { %3622 = vmatmul.mubr.bf16.gmra.mrb[36].mxu0 %v8792_v8  ;;  %1500 = vmatprep.mubr.bf16.mxu1 %v8056_v14  ;;  %v8887_v14 = vld [vmem:[%s7584_s8 + $0x118] sm:$0xff] }
  0xe6   : > { %3631 = vmatprep.mubr.bf16.mxu0 %v8794_v42  ;;  %2080 = vmatpush1.bf16.msra.mxu1 %v6944_v58  ;;  %10297 = vst [vmem:[#allocation36_spill] sm:$0xff] %v8828_v55  ;;  %10299 = vst [vmem:[#allocation38_spill] sm:$0xff] %v8834_v40  ;;  %v1760_v58 = vrot.slane %v10300_v19, 2  ;;  %v1776_v61 = vrot.slane %v10304_v59, 2  ;;  %v6968_v19 = vld [vmem:[%s10091_s3 + $0x250] ss:$8 sps:$4 sm:$0xff]  }
  0xe7   : > { %2081 = vmatprep.subr.bf16.mxu1 %v6954_v35  ;;  %v10303_v35 = vunpack.c.h.bf16 %v8527_v0 }
  0xe8   : > { %v1761_v56 = vsel %vm1641_vm1, %v1756_v22, %v1760_v58  ;;  %v1765_v12 = vsel %vm1641_vm1, %v1760_v58, %v1764_v15  ;;  %v8866_v22 = vcombine.low %v7182_v54, %v7183_v2  ;;  %v7184_v15 = vld [vmem:[%s7584_s8 + $0x28] sm:$0xff]  ;;  %v10311_v54 = vunpack.c.h.bf16 %v8566_v25 }
  0xe9   : > { %v1772_v41 = vrot.slane %v10303_v35, 2  ;;  %v8868_v58 = vpack.c.bf16 %v1765_v12, %v1761_v56  ;;  %v10307_v35 = vunpack.c.l.bf16 %v8524_v3  ;;  %v10312_v56 = vunpack.c.h.bf16 %v8569_v4  ;;  %v6976_v3 = vld [vmem:[%s10091_s3 + $0x260] ss:$8 sps:$4 sm:$0xff]  }
  0xea   : > { %2082 = vmatpush1.bf16.msra.mxu1 %v6952_v37  ;;  %10305 = vst [vmem:[#allocation39_spill] sm:$0xff] %v8866_v22  ;;  %v1780_v2 = vrot.slane %v10311_v54, 2  ;;  %v7186_v54 = vld [vmem:[%s7584_s8 + $0x38] sm:$0xff] }
  0xeb   : > { %2083 = vmatprep.subr.bf16.mxu1 %v6962_v26  ;;  %v1773_v37 = vsel %vm1641_vm1, %v1771_v5, %v1772_v41  ;;  %v1777_v26 = vsel %vm1641_vm1, %v1772_v41, %v1776_v61  ;;  %10306 = vst [vmem:[#allocation40_spill] sm:$0xff] %v8868_v58  ;;  %v8872_v5 = vcombine.high %v7184_v15, %v7185_v43  ;;  %v1768_v41 = vrot.slane %v10307_v35, 2 }
  0xec   : > { %1501 = vmatmul.mubr.bf16.gmra.mrb[8].mxu1 %v8060_v16  ;;  %v8876_v59 = vpack.c.bf16 %v1777_v26, %v1773_v37  ;;  %v1784_v12 = vrot.slane %v10312_v56, 2  ;;  %v8893_v37 = vld [vmem:[%s7584_s8 + $0x120] sm:$0xff]  ;;  %v6984_v56 = vld [vmem:[%s10091_s3 + $0x270] ss:$8 sps:$4 sm:$0xff]  }
  0xed   : > { %3632 = vmatmul.mubr.bf16.gmra.mrb[40].mxu0 %v8828_v55  ;;  %1510 = vmatprep.mubr.bf16.mxu1 %v8832_v57  ;;  %v10310_v57 = vunpack.c.l.bf16 %v8530_v39  ;;  %v6986_v39 = vld [vmem:[%s10091_s3 + $0x274] ss:$8 sps:$4 sm:$0xff]  }
  0xee   : > { %3641 = vmatprep.mubr.bf16.mxu0 %v8834_v40  ;;  %2084 = vmatpush1.bf16.msra.mxu1 %v6960_v30  ;;  %10308 = vst [vmem:[#allocation41_spill] sm:$0xff] %v8876_v59  ;;  %v10309_v30 = vunpack.c.l.bf16 %v8527_v0  ;;  %v8896_v0 = vld [vmem:[%s7584_s8 + $0x128] sm:$0xff] }
  0xef   : > { %2085 = vmatprep.subr.bf16.mxu1 %v6970_v45  ;;  %v1774_v16 = vrot.slane %v10310_v57, 2  ;;  %v10323_v40 = vunpack.c.l.bf16 %v8896_v0 }
  0xf0   : > { %v1769_v45 = vrot.slane %v10309_v30, 2 }
  0xf1   : > { %v3282_v55 = vrot.slane %v10323_v40, 2 }
  0xf2   : > { %2086 = vmatpush1.bf16.msra.mxu1 %v6968_v19  ;;  %v1770_v57 = vsel %vm1641_vm1, %v1768_v41, %v1769_v45  ;;  %v1775_v26 = vsel %vm1641_vm1, %v1769_v45, %v1774_v16  ;;  %v1781_v19 = vsel %vm1641_vm1, %v1776_v61, %v1780_v2  ;;  %v6994_v61 = vld [vmem:[%s10091_s3 + $0x284] ss:$8 sps:$4 sm:$0xff]   ;;  %v8918_v41 = vcombine.low %v7184_v15, %v7185_v43 }
  0xf3   : > { %2087 = vmatprep.subr.bf16.mxu1 %v6978_v53  ;;  %v1785_v53 = vsel %vm1641_vm1, %v1780_v2, %v1784_v12  ;;  %v8920_v45 = vpack.c.bf16 %v1775_v26, %v1770_v57  ;;  %v10314_v2 = vunpack.c.l.bf16 %v8566_v25  ;;  %v10318_v15 = vunpack.c.h.bf16 %v8893_v37  ;;  %v6992_v25 = vld [vmem:[%s10091_s3 + $0x280] ss:$8 sps:$4 sm:$0xff]  }
  0xf4   : > { %1511 = vmatmul.mubr.bf16.gmra.mrb[12].mxu1 %v8866_v22  ;;  %v8928_v35 = vpack.c.bf16 %v1785_v53, %v1781_v19  ;;  %v10319_v57 = vunpack.c.h.bf16 %v8896_v0  ;;  %v8945_v19 = vld [vmem:[%s7584_s8 + $0x138] sm:$0x11] }
  0xf5   : > { %3642 = vmatmul.mubr.bf16.gmra.mrb[44].mxu0 %v8868_v58  ;;  %1520 = vmatprep.mubr.bf16.mxu1 %v8872_v5  ;;  %10313 = vst [vmem:[#allocation42_spill] sm:$0xff] %v8920_v45  ;;  %v1778_v12 = vrot.slane %v10314_v2, 2  ;;  %v3280_v43 = vrot.slane %v10318_v15, 2  ;;  %v8942_v2 = vld [vmem:[%s7584_s8 + $0x130] sm:$0xff] }
  0xf6   : > { %3651 = vmatprep.mubr.bf16.mxu0 %v8876_v59  ;;  %2088 = vmatpush1.bf16.msra.mxu1 %v6976_v3  ;;  %v7187_v3 = vld [vmem:[%s7584_s8 + $0x40] sm:$0xff]  ;;  %10315 = vst [vmem:[#allocation43_spill] sm:$0xff] %v8928_v35  ;;  %v10317_v59 = vunpack.c.h.bf16 %v8887_v14  ;;  %v3284_v26 = vrot.slane %v10319_v57, 2 }
  0xf7   : > { %2089 = vmatprep.subr.bf16.mxu1 %v6986_v39  ;;  %v8926_v30 = vcombine.high %v7186_v54, %v7187_v3  ;;  %v10316_v39 = vunpack.c.l.bf16 %v8569_v4  ;;  %v7002_v4 = vld [vmem:[%s10091_s3 + $0x294] ss:$8 sps:$4 sm:$0xff]  }
  0xf8   : > { %v3279_v58 = vrot.slane %v10317_v59, 2  ;;  %v1779_v59 = vsel %vm1641_vm1, %v1774_v16, %v1778_v12  ;;  %v3285_v57 = vsel %vm1641_vm1, %v3280_v43, %v3284_v26 }
  0xf9   : > { %v1782_v22 = vrot.slane %v10316_v39, 2 }
  0xfa   : > { %2090 = vmatpush1.bf16.msra.mxu1 %v6984_v56  ;;  %v10199_v56 = vunpack.c.l.bf16 %v8887_v14  ;;  %v3281_v15 = vsel %vm1641_vm1, %v3279_v58, %v3280_v43  ;;  %v7188_v58 = vld [vmem:[%s7584_s8 + $0x50] sm:$0xff]  ;;  %v7189_v43 = vld [vmem:[%s7584_s8 + $0x58] sm:$0xff] }
  0xfb   : > { %2091 = vmatprep.subr.bf16.mxu1 %v6994_v61  ;;  %v1783_v53 = vsel %vm1641_vm1, %v1778_v12, %v1782_v22  ;;  %v7010_v22 = vld [vmem:[%s10091_s3 + $0x2a4] ss:$8 sps:$4 sm:$0xff]   ;;  %v8969_v12 = vcombine.low %v7186_v54, %v7187_v3  ;;  %v8975_v61 = vcombine.high %v7188_v58, %v7189_v43  ;;  %v8977_v16 = vpack.c.bf16 %v3285_v57, %v3281_v15  ;;  %v7008_v15 = vld [vmem:[%s10091_s3 + $0x2a0] ss:$8 sps:$4 sm:$0xff]   ;;  %v7018_v57 = vld [vmem:[%s10091_s3 + $0x2b4] ss:$8 sps:$4 sm:$0xff]  }
  0xfc   : > { %1521 = vmatmul.mubr.bf16.gmra.mrb[16].mxu1 %v8918_v41  ;;  %v8971_v39 = vpack.c.bf16 %v1783_v53, %v1779_v59  ;;  %v10324_v54 = vunpack.c.h.bf16 %v8942_v2  ;;  %v10325_v59 = vunpack.c.h.bf16 %v8945_v19 }
  0xfd   : > { %3652 = vmatmul.mubr.bf16.gmra.mrb[48].mxu0 %v8920_v45  ;;  %1530 = vmatprep.mubr.bf16.mxu1 %v8926_v30  ;;  %10321 = vst [vmem:[#allocation45_spill] sm:$0xff] %v8977_v16  ;;  %v10322_v45 = vunpack.c.l.bf16 %v8893_v37 }
  0xfe   : > { %3661 = vmatprep.mubr.bf16.mxu0 %v8928_v35  ;;  %2092 = vmatpush1.bf16.msra.mxu1 %v6992_v25  ;;  %v7000_v35 = vld [vmem:[%s10091_s3 + $0x290] ss:$8 sps:$4 sm:$0xff]   ;;  %10320 = vst [vmem:[#allocation44_spill] sm:$0xff] %v8971_v39  ;;  %v3276_v25 = vrot.slane %v10199_v56, 2  ;;  %v3288_v3 = vrot.slane %v10324_v54, 2  ;;  %v3292_v53 = vrot.slane %v10325_v59, 2 }
  0xff   : > { %2093 = vmatprep.subr.bf16.mxu1 %v7002_v4  ;;  %v3277_v4 = vrot.slane %v10322_v45, 2  ;;  %v7016_v56 = vld [vmem:[%s10091_s3 + $0x2b0] ss:$8 sps:$4 sm:$0xff]   ;;  %v7190_v45 = vld [vmem:[%s7584_s8 + $0x60] sm:$0xff] }
 0x100   : > { %v3289_v54 = vsel %vm1641_vm1, %v3284_v26, %v3288_v3  ;;  %v3293_v59 = vsel %vm1641_vm1, %v3288_v3, %v3292_v53  ;;  %v10328_v3 = vunpack.c.l.bf16 %v8942_v2 }
 0x101   : > { %v3278_v40 = vsel %vm1641_vm1, %v3276_v25, %v3277_v4  ;;  %v7026_v25 = vld [vmem:[%s10091_s3 + $0x2c4] ss:$8 sps:$4 sm:$0xff]   ;;  %v9019_v26 = vpack.c.bf16 %v3293_v59, %v3289_v54 }
 0x102   : > { %2094 = vmatpush1.bf16.msra.mxu1 %v7000_v35  ;;  %v3283_v35 = vsel %vm1641_vm1, %v3277_v4, %v3282_v55  ;;  %v3286_v53 = vrot.slane %v10328_v3, 2  ;;  %v7042_v54 = vld [vmem:[%s10091_s3 + $0x2e4] ss:$8 sps:$4 sm:$0xff]   ;;  %v7192_v3 = vld [vmem:[%s7584_s8 + $0x78] sm:$0xff] }
 0x103   : > { %2095 = vmatprep.subr.bf16.mxu1 %v7010_v22  ;;  %v9013_v4 = vpack.c.bf16 %v3283_v35, %v3278_v40  ;;  %v7191_v22 = vld [vmem:[%s7584_s8 + $0x68] sm:$0xff]  ;;  %10327 = vst [vmem:[#allocation47_spill] sm:$0xff] %v9019_v26  ;;  %v7032_v35 = vld [vmem:[%s10091_s3 + $0x2d0] ss:$8 sps:$4 sm:$0xff]  }
 0x104   : > { %1531 = vmatmul.mubr.bf16.gmra.mrb[20].mxu1 %v8969_v12  ;;  %v9043_v59 = vcombine.low %v7190_v45, %v7191_v22 }
 0x105   : > { %3662 = vmatmul.mubr.bf16.gmra.mrb[52].mxu0 %v8971_v39  ;;  %1540 = vmatprep.mubr.bf16.mxu1 %v8975_v61  ;;  %10326 = vst [vmem:[#allocation46_spill] sm:$0xff] %v9013_v4  ;;  %v9017_v39 = vcombine.high %v7190_v45, %v7191_v22  ;;  %v7048_v45 = vld [vmem:[%s10091_s3 + $0x2f0] ss:$8 sps:$4 sm:$0xff]   ;;  %v7056_v22 = vld [vmem:[%s10091_s3 + $0x304] ss:$8 sps:$4 sm:$0xff]  }
 0x106   : > { %3671 = vmatprep.mubr.bf16.mxu0 %v8977_v16  ;;  %2096 = vmatpush1.bf16.msra.mxu1 %v7008_v15  ;;  %v9011_v16 = vcombine.low %v7188_v58, %v7189_v43  ;;  %v10329_v15 = vunpack.c.l.bf16 %v8945_v19  ;;  %v7024_v58 = vld [vmem:[%s10091_s3 + $0x2c0] ss:$8 sps:$4 sm:$0xff]   ;;  %v7034_v43 = vld [vmem:[%s10091_s3 + $0x2d4] ss:$8 sps:$4 sm:$0xff]  }
 0x107   : > { %2097 = vmatprep.subr.bf16.mxu1 %v7018_v57 }
 0x108   : > { %v3290_v57 = vrot.slane %v10329_v15, 2  ;;  %v7193_v15 = vld [vmem:[%s7584_s8 + $0x80] sm:$0xff] }
 0x10a   : > { %2098 = vmatpush1.bf16.msra.mxu1 %v7016_v56  ;;  %v3287_v56 = vsel %vm1641_vm1, %v3282_v55, %v3286_v53  ;;  %v3291_v40 = vsel %vm1641_vm1, %v3286_v53, %v3290_v57  ;;  %v9049_v55 = vcombine.high %v7192_v3, %v7193_v15  ;;  %v7040_v53 = vld [vmem:[%s10091_s3 + $0x2e0] ss:$8 sps:$4 sm:$0xff]   ;;  %v7050_v57 = vld [vmem:[%s10091_s3 + $0x2f4] ss:$8 sps:$4 sm:$0xff]  }
 0x10b   : > { %2099 = vmatprep.subr.bf16.mxu1 %v7026_v25  ;;  %v9045_v25 = vpack.c.bf16 %v3291_v40, %v3287_v56  ;;  %v7194_v56 = vld [vmem:[%s7584_s8 + $0x88] sm:$0xff]  ;;  %v7195_v40 = vld [vmem:[%s7584_s8 + $0x90] sm:$0xff] }
 0x10c   : > { %1541 = vmatmul.mubr.bf16.gmra.mrb[24].mxu1 %v9011_v16 }
 0x10d   : > { %3672 = vmatmul.mubr.bf16.gmra.mrb[56].mxu0 %v9013_v4  ;;  %1550 = vmatprep.mubr.bf16.mxu1 %v9017_v39  ;;  %10330 = vst [vmem:[#allocation48_spill] sm:$0xff] %v9045_v25 }
 0x10e   : > { %3681 = vmatprep.mubr.bf16.mxu0 %v9019_v26  ;;  %2100 = vmatpush1.bf16.msra.mxu1 %v7024_v58  ;;  %v9067_v58 = vcombine.low %v7192_v3, %v7193_v15  ;;  %v7003_v3 = vld [vmem:[%s10091_s3 + $0x710] ss:$8 sps:$4 sm:$0xff]   ;;  %v7013_v15 = vld [vmem:[%s10091_s3 + $0x724] ss:$8 sps:$4 sm:$0xff]  }
 0x10f   : > { %2101 = vmatprep.subr.bf16.mxu1 %v7034_v43  ;;  %v6995_v43 = vld [vmem:[%s10091_s3 + $0x700] ss:$8 sps:$4 sm:$0xff]  }
 0x112   : > { %2102 = vmatpush1.bf16.msra.mxu1 %v7032_v35  ;;  %v9074_v35 = vcombine.high %v7194_v56, %v7195_v40 }
 0x113   : > { %2103 = vmatprep.subr.bf16.mxu1 %v7042_v54  ;;  %v7005_v54 = vld [vmem:[%s10091_s3 + $0x714] ss:$8 sps:$4 sm:$0xff]  }
 0x114   : > { %1551 = vmatmul.mubr.bf16.gmra.mrb[28].mxu1 %v9043_v59  ;;  %10331 = vst [vmem:[#allocation49_spill] sm:$0xff] %v9074_v35 }
 0x115   : > { %3682 = vmatmul.mubr.bf16.gmra.mrb[60].mxu0 %v9045_v25  ;;  %1560 = vmatprep.mubr.bf16.mxu1 %v9049_v55  ;;  %v7199_v25 = vld [vmem:[%s7584_s8 + $0xb8] sm:$0xff] }
 0x116   : > { %3985 = vmatprep.mubr.bf16.mxu0 %v8872_v5  ;;  %2104 = vmatpush1.bf16.msra.mxu1 %v7040_v53  ;;  %v9089_v53 = vcombine.low %v7194_v56, %v7195_v40  ;;  %v7019_v56 = vld [vmem:[%s10091_s3 + $0x730] ss:$8 sps:$4 sm:$0xff]   ;;  %v7029_v40 = vld [vmem:[%s10091_s3 + $0x744] ss:$8 sps:$4 sm:$0xff]  }
 0x117   : > { %2105 = vmatprep.subr.bf16.mxu1 %v7050_v57  ;;  %v7196_v57 = vld [vmem:[%s7584_s8 + $0xa0] sm:$0xff] }
 0x118   : > { %10332 = vst [vmem:[#allocation50_spill] sm:$0xff] %v9089_v53 }
 0x11a   : > { %2106 = vmatpush1.bf16.msra.mxu1 %v7048_v45  ;;  %v7197_v45 = vld [vmem:[%s7584_s8 + $0xa8] sm:$0xff] }
 0x11b   : > { %2529 = vmatprep.subr.bf16.mxu1 %v7056_v22  ;;  %v9093_v22 = vcombine.high %v7196_v57, %v7197_v45 }
 0x11c   : > { %1561 = vmatmul.mubr.bf16.gmra.mrb[32].mxu1 %v9067_v58 }
 0x11d   : > { %3986 = vmatmul.mubr.bf16.vlgmr.msra.gmra.mrb[0].mxu0 %v8918_v41  ;;  %1570 = vmatprep.mubr.bf16.mxu1 %v9074_v35 }
 0x11e   : > { %4444 = vmatpush1.bf16.msra.mxu0 %v6995_v43  ;;  %3995 = vmatprep.mubr.bf16.mxu0 %v8926_v30  ;;  %v7011_v43 = vld [vmem:[%s10091_s3 + $0x720] ss:$8 sps:$4 sm:$0xff]  }
 0x11f   : > { %4445 = vmatprep.subr.bf16.mxu0 %v7005_v54  ;;  %v7021_v54 = vld [vmem:[%s10091_s3 + $0x734] ss:$8 sps:$4 sm:$0xff]  }
 0x122   : > { %4446 = vmatpush1.bf16.msra.mxu0 %v7003_v3  ;;  %v9111_v3 = vcombine.low %v7196_v57, %v7197_v45  ;;  %v7035_v57 = vld [vmem:[%s10091_s3 + $0x750] ss:$8 sps:$4 sm:$0xff]   ;;  %v7045_v45 = vld [vmem:[%s10091_s3 + $0x764] ss:$8 sps:$4 sm:$0xff]  }
 0x123   : > { %4447 = vmatprep.subr.bf16.mxu0 %v7013_v15  ;;  %v7198_v15 = vld [vmem:[%s7584_s8 + $0xb0] sm:$0xff]  ;;  %s6636_s8 = smul.u32 10, %s10437_s10 }
 0x124   : > { %1571 = vmatmul.mubr.bf16.gmra.mrb[36].mxu1 %v9089_v53  ;;  %v9115_v26 = vcombine.high %v7198_v15, %v7199_v25 }
 0x125   : > { %3996 = vmatmul.mubr.bf16.gmra.mrb[4].mxu0 %v8969_v12  ;;  %1580 = vmatprep.mubr.bf16.mxu1 %v9093_v22  ;;  %s361_s24 = sadd.s32 %s6636_s8, %s7536_s9  ;;  %s7328_s9 = smov [#allocation2]  }
 0x126   : > { %4005 = vmatprep.mubr.bf16.mxu0 %v8975_v61  ;;  %4448 = vmatpush1.bf16.msra.mxu0 %v7011_v43  ;;  %10333 = vst [vmem:[#allocation51_spill] sm:$0xff] %v9115_v26  ;;  %v7027_v43 = vld [vmem:[%s10091_s3 + $0x740] ss:$8 sps:$4 sm:$0xff]   ;;  %s5482_s28 = sshll.u32 %s361_s24, 2  ;;  %s5334_s24 = sadd.s32 %s6088_s26, %s6070_s16 }
 0x127   : > { %4449 = vmatprep.subr.bf16.mxu0 %v7021_v54  ;;  %v7037_v54 = vld [vmem:[%s10091_s3 + $0x754] ss:$8 sps:$4 sm:$0xff]   ;;  %s9320_s8 = scalar_lea.vmem %s10090_s2, %s5482_s28  ;;  %s6071_s21 = sshll.u32 %s5334_s24, 7 }
 0x128   : > { %s10026_s15 = scalar_lea.hbm %s10093_s5, %s6071_s21  ;;  %s7236_s29 = sshll.u32 %s7328_s9, 4  ;;  %s7237_s29 = int_to_ptr.vmem [resolvable:$false] %s7236_s29 }
 0x129   : > { %s7238_s30 = scalar_lea.vmem %s7237_s29, 16384 }
 0x12a   : > { %4450 = vmatpush1.bf16.msra.mxu0 %v7019_v56  ;;  %v9133_v56 = vcombine.low %v7198_v15, %v7199_v25  ;;  %v7051_v25 = vld [vmem:[%s10091_s3 + $0x770] ss:$8 sps:$4 sm:$0xff]   ;;  %v7059_v15 = vld [vmem:[%s10091_s3 + $0x784] ss:$8 sps:$4 sm:$0xff]  }
 0x12b   : > { %4451 = vmatprep.subr.bf16.mxu0 %v7029_v40  ;;  %v7043_v40 = vld [vmem:[%s10091_s3 + $0x760] ss:$8 sps:$4 sm:$0xff]  }
 0x12c   : > { %1581 = vmatmul.mubr.bf16.gmra.mrb[40].mxu1 %v9111_v3 }
 0x12d   : > { %4006 = vmatmul.mubr.bf16.gmra.mrb[8].mxu0 %v9011_v16  ;;  %1590 = vmatprep.mubr.bf16.mxu1 %v9115_v26 }
 0x12e   : > { %4015 = vmatprep.mubr.bf16.mxu0 %v9017_v39  ;;  %4452 = vmatpush1.bf16.msra.mxu0 %v7027_v43  ;;  %v7053_v43 = vld [vmem:[%s10091_s3 + $0x774] ss:$8 sps:$4 sm:$0xff]  }
 0x12f   : > { %4453 = vmatprep.subr.bf16.mxu0 %v7037_v54  ;;  %v7057_v54 = vld [vmem:[%s10091_s3 + $0x780] ss:$8 sps:$4 sm:$0xff]  }
 0x132   : > { %4454 = vmatpush1.bf16.msra.mxu0 %v7035_v57  ;;  %v7065_v57 = vld [vmem:[%s10091_s3 + $0x794] ss:$8 sps:$4 sm:$0xff]  }
 0x133   : > { %4455 = vmatprep.subr.bf16.mxu0 %v7045_v45  ;;  %v7063_v45 = vld [vmem:[%s10091_s3 + $0x790] ss:$8 sps:$4 sm:$0xff]  }
 0x134   : > { %1591 = vmatmul.mubr.bf16.gmra.mrb[44].mxu1 %v9133_v56 }
 0x135   : > { %4016 = vmatmul.mubr.bf16.gmra.mrb[12].mxu0 %v9043_v59  ;;  %1600 = vmatprep.mubr.bf16.mxu1 %v8576_v9 }
 0x136   : > { %4025 = vmatprep.mubr.bf16.mxu0 %v9049_v55  ;;  %4456 = vmatpush1.bf16.msra.mxu0 %v7043_v40  ;;  %v7071_v40 = vld [vmem:[%s10091_s3 + $0x7a4] ss:$8 sps:$4 sm:$0xff]  }
 0x137   : > { %4457 = vmatprep.subr.bf16.mxu0 %v7053_v43  ;;  %v7069_v43 = vld [vmem:[%s10091_s3 + $0x7a0] ss:$8 sps:$4 sm:$0xff]  }
 0x13a   : > { %4458 = vmatpush1.bf16.msra.mxu0 %v7051_v25  ;;  %v7077_v25 = vld [vmem:[%s10091_s3 + $0x7b4] ss:$8 sps:$4 sm:$0xff]  }
 0x13b   : > { %4459 = vmatprep.subr.bf16.mxu0 %v7059_v15  ;;  %v7075_v15 = vld [vmem:[%s10091_s3 + $0x7b0] ss:$8 sps:$4 sm:$0xff]  }
 0x13c   : > { %1601 = vmatmul.mubr.bf16.gmra.mrb[48].mxu1 %v8580_v38 }
 0x13d   : > { %4026 = vmatmul.mubr.bf16.gmra.mrb[16].mxu0 %v9067_v58  ;;  %1610 = vmatprep.mubr.bf16.mxu1 %v8597_v36 }
 0x13e   : > { %4035 = vmatprep.mubr.bf16.mxu0 %v9074_v35  ;;  %4460 = vmatpush1.bf16.msra.mxu0 %v7057_v54  ;;  %v7085_v54 = vld [vmem:[%s10091_s3 + $0x7c4] ss:$8 sps:$4 sm:$0xff]  }
 0x13f   : > { %4461 = vmatprep.subr.bf16.mxu0 %v7065_v57  ;;  %v10334_v57 = vunpack.c.h.bf16 %v7596_v48 }
 0x142   : > { %4462 = vmatpush1.bf16.msra.mxu0 %v7063_v45  ;;  %v1645_v45 = vrot.slane %v10334_v57, 2 }
 0x143   : > { %4463 = vmatprep.subr.bf16.mxu0 %v7071_v40  ;;  %v10335_v40 = vunpack.c.h.bf16 %v7599_v49 }
 0x144   : > { %1611 = vmatmul.mubr.bf16.gmra.mrb[52].mxu1 %v8609_v6 }
 0x145   : > { %4036 = vmatmul.mubr.bf16.gmra.mrb[20].mxu0 %v9089_v53  ;;  %1620 = vmatprep.mubr.bf16.mxu1 %v8643_v24  ;;  %v1646_v4 = vrot.slane %v10335_v40, 2  ;;  %v10336_v53 = vunpack.c.h.bf16 %v7602_v50  ;;  %v7091_v50 = vld [vmem:[%s10091_s3 + $0x7d0] ss:$8 sps:$4 sm:$0xff]   ;;  %v10338_v40 = vunpack.c.h.bf16 %v7675_v21 }
 0x146   : > { %4045 = vmatprep.mubr.bf16.mxu0 %v9093_v22  ;;  %4464 = vmatpush1.bf16.msra.mxu0 %v7069_v43  ;;  %v7083_v43 = vld [vmem:[%s10091_s3 + $0x7c0] ss:$8 sps:$4 sm:$0xff]  }
 0x147   : > { %4465 = vmatprep.subr.bf16.mxu0 %v7077_v25  ;;  %v1650_v35 = vrot.slane %v10336_v53, 2  ;;  %v7093_v25 = vld [vmem:[%s10091_s3 + $0x7d4] ss:$8 sps:$4 sm:$0xff]   ;;  %v1647_v48 = vsel %vm1641_vm1, %v1645_v45, %v1646_v4  ;;  %v7101_v53 = vld [vmem:[%s10091_s3 + $0x7e4] ss:$8 sps:$4 sm:$0xff]  }
 0x148   : > { %v7109_v45 = vld [vmem:[%s10091_s3 + $0x7f4] ss:$8 sps:$4 sm:$0xff]  }
 0x149   : > { %v1651_v49 = vsel %vm1641_vm1, %v1646_v4, %v1650_v35  ;;  %v7099_v4 = vld [vmem:[%s10091_s3 + $0x7e0] ss:$8 sps:$4 sm:$0xff]  }
 0x14a   : > { %4466 = vmatpush1.bf16.msra.mxu0 %v7075_v15  ;;  %v1851_v15 = vpack.c.bf16 %v1651_v49, %v1647_v48  ;;  %v7107_v48 = vld [vmem:[%s10091_s3 + $0x7f0] ss:$8 sps:$4 sm:$0xff]   ;;  %v7115_v49 = vld [vmem:[%s10091_s3 + $0x804] ss:$8 sps:$4 sm:$0xff]  }
 0x14b   : > { %4467 = vmatprep.subr.bf16.mxu0 %v7085_v54  ;;  %v10337_v54 = vunpack.c.h.bf16 %v7672_v20 }
 0x14c   : > { %1621 = vmatmul.mubr.bf16.gmra.mrb[56].mxu1 %v8655_v60 }
 0x14d   : > { %4046 = vmatmul.mubr.bf16.gmra.mrb[24].mxu0 %v9111_v3  ;;  %1630 = vmatprep.mubr.bf16.mxu1 %v8686_v52  ;;  %v1654_v57 = vrot.slane %v10337_v54, 2 }
 0x14e   : > { %4055 = vmatprep.mubr.bf16.mxu0 %v9115_v26  ;;  %4468 = vmatpush1.bf16.msra.mxu0 %v7083_v43  ;;  %v1658_v26 = vrot.slane %v10338_v40, 2  ;;  %v10341_v40 = vpack.c.bf16 %v8745_v62, %v8738_v28  ;;  %v7068_v28 = vld [vmem:[%s10091_s3 + $0x324] ss:$8 sps:$4 sm:$0xff]  }
 0x14f   : > { %4469 = vmatprep.subr.bf16.mxu0 %v7093_v25  ;;  %v1655_v43 = vsel %vm1641_vm1, %v1650_v35, %v1654_v57 }
 0x150   : > { %v1659_v25 = vsel %vm1641_vm1, %v1654_v57, %v1658_v26  ;;  %v10340_v26 = vunpack.c.l.bf16 %v7675_v21  ;;  %v7062_v57 = vld [vmem:[%s10091_s3 + $0x314] ss:$8 sps:$4 sm:$0xff]  }
 0x152   : > { %4470 = vmatpush1.bf16.msra.mxu0 %v7091_v50  ;;  %v7054_v50 = vld [vmem:[%s10091_s3 + $0x300] ss:$8 sps:$4 sm:$0xff]   ;;  %v1656_v54 = vrot.slane %v10340_v26, 2  ;;  %v9312_v26 = vcombine.high %v8896_v0, %v8942_v2 }
 0x153   : > { %4471 = vmatprep.subr.bf16.mxu0 %v7101_v53  ;;  %v1853_v53 = vpack.c.bf16 %v1659_v25, %v1655_v43  ;;  %v7072_v43 = vld [vmem:[%s10091_s3 + $0x330] ss:$8 sps:$4 sm:$0xff]   ;;  %v7081_v25 = vld [vmem:[%s10091_s3 + $0x344] ss:$8 sps:$4 sm:$0xff]  }
 0x154   : > { %1631 = vmatmul.mubr.bf16.gmra.mrb[60].mxu1 %v8697_v7 }
 0x155   : > { %4056 = vmatmul.mubr.bf16.gmra.mrb[28].mxu0 %v9133_v56  ;;  %2107 = vmatprep.mubr.bf16.mxu1 %v1851_v15  ;;  %v10339_v15 = vunpack.c.l.bf16 %v7672_v20 }
 0x156   : > { %4065 = vmatprep.mubr.bf16.mxu0 %v8576_v9  ;;  %4472 = vmatpush1.bf16.msra.mxu0 %v7099_v4  ;;  %v7060_v4 = vld [vmem:[%s10091_s3 + $0x310] ss:$8 sps:$4 sm:$0xff]  }
 0x157   : > { %4473 = vmatprep.subr.bf16.mxu0 %v7109_v45  ;;  %v1652_v35 = vrot.slane %v10339_v15, 2  ;;  %v7074_v45 = vld [vmem:[%s10091_s3 + $0x334] ss:$8 sps:$4 sm:$0xff]   ;;  %v7103_v15 = vld [vmem:[%s10091_s3 + $0x370] ss:$8 sps:$4 sm:$0xff]  }
 0x159   : > { %v1653_v20 = vsel %vm1641_vm1, %v8723_v32, %v1652_v35  ;;  %v1657_v21 = vsel %vm1641_vm1, %v1652_v35, %v1656_v54  ;;  %v7066_v32 = vld [vmem:[%s10091_s3 + $0x320] ss:$8 sps:$4 sm:$0xff]   ;;  %v7112_v35 = vld [vmem:[%s10091_s3 + $0x384] ss:$8 sps:$4 sm:$0xff]  }
 0x15a   : > { %4474 = vmatpush1.bf16.msra.mxu0 %v7107_v48  ;;  %v1852_v62 = vpack.c.bf16 %v1657_v21, %v1653_v20  ;;  %v7089_v48 = vld [vmem:[%s10091_s3 + $0x354] ss:$8 sps:$4 sm:$0xff]   ;;  %v7110_v54 = vld [vmem:[%s10091_s3 + $0x380] ss:$8 sps:$4 sm:$0xff]   ;;  %v7116_v21 = vld [vmem:[%s10091_s3 + $0x390] ss:$8 sps:$4 sm:$0xff]  }
 0x15b   : > { %4923 = vmatprep.subr.bf16.mxu0 %v7115_v49  ;;  %v7087_v49 = vld [vmem:[%s10091_s3 + $0x350] ss:$8 sps:$4 sm:$0xff]   ;;  %v9333_v20 = vld [vmem:[%s9320_s8 + $0x8] sm:$0xff] }
 0x15c   : > { %2108 = vmatmul.mubr.bf16.vlgmr.msra.gmra.mrb[0].mxu1 %v10341_v40  ;;  %v9330_v40 = vld [vmem:[%s9320_s8] sm:$0xff] }
 0x15d   : > { %4066 = vmatmul.mubr.bf16.gmra.mrb[32].mxu0 %v8580_v38  ;;  %2530 = vmatpush1.bf16.msra.mxu1 %v7054_v50  ;;  %v7097_v50 = vld [vmem:[%s10091_s3 + $0x364] ss:$8 sps:$4 sm:$0xff]  }
 0x15e   : > { %2117 = vmatprep.mubr.bf16.mxu1 %v1853_v53  ;;  %4075 = vmatprep.mubr.bf16.mxu0 %v8597_v36  ;;  %v7105_v53 = vld [vmem:[%s10091_s3 + $0x374] ss:$8 sps:$4 sm:$0xff]  }
 0x15f   : > { %2531 = vmatprep.subr.bf16.mxu1 %v7062_v57  ;;  %v7118_v57 = vld [vmem:[%s10091_s3 + $0x394] ss:$8 sps:$4 sm:$0xff]  }
 0x161   : > { %2532 = vmatpush1.bf16.msra.mxu1 %v7060_v4  ;;  %v7124_v4 = vld [vmem:[%s10091_s3 + $0x3a4] ss:$8 sps:$4 sm:$0xff]  }
 0x162   : > { %2533 = vmatprep.subr.bf16.mxu1 %v7068_v28  ;;  %v9343_v28 = vcombine.low %v8896_v0, %v8942_v2 }
 0x164   : > { %2118 = vmatmul.mubr.bf16.gmra.mrb[4].mxu1 %v1852_v62  ;;  %v5872_v62 = vcombine.high %v9330_v40, %v9333_v20 }
 0x165   : > { %4076 = vmatmul.mubr.bf16.gmra.mrb[36].mxu0 %v8609_v6  ;;  %2127 = vmatprep.mubr.bf16.mxu1 %v7991_v17  ;;  %v7079_v17 = vld [vmem:[%s10091_s3 + $0x340] ss:$8 sps:$4 sm:$0xff]  }
 0x166   : > { %4085 = vmatprep.mubr.bf16.mxu0 %v8643_v24  ;;  %2534 = vmatpush1.bf16.msra.mxu1 %v7066_v32  ;;  %v7122_v32 = vld [vmem:[%s10091_s3 + $0x3a0] ss:$8 sps:$4 sm:$0xff]  }
 0x167   : > { %2535 = vmatprep.subr.bf16.mxu1 %v7074_v45  ;;  %v7130_v45 = vld [vmem:[%s10091_s3 + $0x3b4] ss:$8 sps:$4 sm:$0xff]  }
 0x16a   : > { %2536 = vmatpush1.bf16.msra.mxu1 %v7072_v43  ;;  %v9357_v43 = vld [vmem:[%s9320_s8 + $0x10] sm:$0xff] }
 0x16b   : > { %2537 = vmatprep.subr.bf16.mxu1 %v7081_v25  ;;  %v9360_v25 = vld [vmem:[%s9320_s8 + $0x18] sm:$0xff] }
 0x16c   : > { %2128 = vmatmul.mubr.bf16.gmra.mrb[8].mxu1 %v7982_v33  ;;  %v9287_v33 = vcombine.high %v8887_v14, %v8893_v37 }
 0x16d   : > { %4086 = vmatmul.mubr.bf16.gmra.mrb[40].mxu0 %v8655_v60  ;;  %2137 = vmatprep.mubr.bf16.mxu1 %v8035_v31  ;;  %v7095_v31 = vld [vmem:[%s10091_s3 + $0x360] ss:$8 sps:$4 sm:$0xff]  }
 0x16e   : > { %4095 = vmatprep.mubr.bf16.mxu0 %v8686_v52  ;;  %2538 = vmatpush1.bf16.msra.mxu1 %v7079_v17  ;;  %v7128_v17 = vld [vmem:[%s10091_s3 + $0x3b0] ss:$8 sps:$4 sm:$0xff]  }
 0x16f   : > { %2539 = vmatprep.subr.bf16.mxu1 %v7089_v48  ;;  %v7136_v48 = vld [vmem:[%s10091_s3 + $0x3c4] ss:$8 sps:$4 sm:$0xff]  }
 0x172   : > { %2540 = vmatpush1.bf16.msra.mxu1 %v7087_v49  ;;  %v5871_v49 = vcombine.low %v9330_v40, %v9333_v20 }
 0x173   : > { %2541 = vmatprep.subr.bf16.mxu1 %v7097_v50  ;;  %v5874_v50 = vcombine.high %v9357_v43, %v9360_v25 }
 0x174   : > { %2138 = vmatmul.mubr.bf16.gmra.mrb[12].mxu1 %v8066_v34  ;;  %v9308_v34 = vcombine.low %v8887_v14, %v8893_v37 }
 0x175   : > { %4096 = vmatmul.mubr.bf16.gmra.mrb[44].mxu0 %v8697_v7  ;;  %2147 = vmatprep.mubr.bf16.mxu1 %v8079_v44 }
 0x176   : > { %4105 = vmatprep.mubr.bf16.mxu0 %v9287_v33  ;;  %2542 = vmatpush1.bf16.msra.mxu1 %v7095_v31  ;;  %v7134_v31 = vld [vmem:[%s10091_s3 + $0x3c0] ss:$8 sps:$4 sm:$0xff]  }
 0x177   : > { %2543 = vmatprep.subr.bf16.mxu1 %v7105_v53  ;;  %v7142_v53 = vld [vmem:[%s10091_s3 + $0x3d4] ss:$8 sps:$4 sm:$0xff]  }
 0x17a   : > { %2544 = vmatpush1.bf16.msra.mxu1 %v7103_v15  ;;  %v7140_v15 = vld [vmem:[%s10091_s3 + $0x3d0] ss:$8 sps:$4 sm:$0xff]  }
 0x17b   : > { %2545 = vmatprep.subr.bf16.mxu1 %v7112_v35  ;;  %v7148_v35 = vld [vmem:[%s10091_s3 + $0x3e4] ss:$8 sps:$4 sm:$0xff]  }
 0x17c   : > { %2148 = vmatmul.mubr.bf16.gmra.mrb[16].mxu1 %v8121_v10 }
 0x17d   : > { %4106 = vmatmul.mubr.bf16.gmra.mrb[48].mxu0 %v9308_v34  ;;  %2157 = vmatprep.mubr.bf16.mxu1 %v8168_v1 }
 0x17e   : > { %4115 = vmatprep.mubr.bf16.mxu0 %v9312_v26  ;;  %2546 = vmatpush1.bf16.msra.mxu1 %v7110_v54  ;;  %v5873_v54 = vcombine.low %v9357_v43, %v9360_v25 }
 0x17f   : > { %2547 = vmatprep.subr.bf16.mxu1 %v7118_v57  ;;  %v7146_v57 = vld [vmem:[%s10091_s3 + $0x3e0] ss:$8 sps:$4 sm:$0xff]  }
 0x182   : > { %2548 = vmatpush1.bf16.msra.mxu1 %v7116_v21  ;;  %v7154_v21 = vld [vmem:[%s10091_s3 + $0x3f4] ss:$8 sps:$4 sm:$0xff]  }
 0x183   : > { %2549 = vmatprep.subr.bf16.mxu1 %v7124_v4  ;;  %v7152_v4 = vld [vmem:[%s10091_s3 + $0x3f0] ss:$8 sps:$4 sm:$0xff]  }
 0x184   : > { %2158 = vmatmul.mubr.bf16.gmra.mrb[20].mxu1 %v8181_v11 }
 0x185   : > { %4116 = vmatmul.mubr.bf16.gmra.mrb[52].mxu0 %v9343_v28  ;;  %2167 = vmatprep.mubr.bf16.mxu1 %v8216_v29 }
 0x186   : > { %4125 = vmatprep.mubr.bf16.mxu0 %v5872_v62  ;;  %2550 = vmatpush1.bf16.msra.mxu1 %v7122_v32  ;;  %v7113_v62 = vld [vmem:[%s10091_s3 + $0x800] ss:$8 sps:$4 sm:$0xff]   ;;  %v7121_v32 = vld [vmem:[%s10091_s3 + $0x814] ss:$8 sps:$4 sm:$0xff]  }
 0x187   : > { %2551 = vmatprep.subr.bf16.mxu1 %v7130_v45  ;;  %v7200_v45 = vld [vmem:[%s10091_s3 + $0x404] ss:$8 sps:$4 sm:$0xff]  }
 0x18a   : > { %2552 = vmatpush1.bf16.msra.mxu1 %v7128_v17  ;;  %v10344_v17 = vld [vmem:[#allocation8_spill] sm:$0xff] }
 0x18b   : > { %2553 = vmatprep.subr.bf16.mxu1 %v7136_v48  ;;  %v10345_v48 = vld [vmem:[#allocation22_spill] sm:$0xff] }
 0x18c   : > { %2168 = vmatmul.mubr.bf16.gmra.mrb[24].mxu1 %v8248_v63 }
 0x18d   : > { %4126 = vmatmul.mubr.bf16.gmra.mrb[56].mxu0 %v5871_v49  ;;  %2177 = vmatprep.mubr.bf16.mxu1 %v8263_v46  ;;  %v7119_v49 = vld [vmem:[%s10091_s3 + $0x810] ss:$8 sps:$4 sm:$0xff]  }
 0x18e   : > { %4135 = vmatprep.mubr.bf16.mxu0 %v5874_v50  ;;  %2554 = vmatpush1.bf16.msra.mxu1 %v7134_v31  ;;  %v10346_v50 = vld [vmem:[#allocation9_spill] sm:$0xff] }
 0x18f   : > { %2555 = vmatprep.subr.bf16.mxu1 %v7142_v53  ;;  %v7127_v31 = vld [vmem:[%s10091_s3 + $0x824] ss:$8 sps:$4 sm:$0xff]   ;;  %v7125_v53 = vld [vmem:[%s10091_s3 + $0x820] ss:$8 sps:$4 sm:$0xff]  }
 0x192   : > { %2556 = vmatpush1.bf16.msra.mxu1 %v7140_v15  ;;  %v7133_v15 = vld [vmem:[%s10091_s3 + $0x834] ss:$8 sps:$4 sm:$0xff]  }
 0x193   : > { %2557 = vmatprep.subr.bf16.mxu1 %v7148_v35  ;;  %v10347_v35 = vld [vmem:[#allocation10_spill] sm:$0xff] }
 0x194   : > { %2178 = vmatmul.mubr.bf16.gmra.mrb[28].mxu1 %v8285_v51 }
 0x195   : > { %4136 = vmatmul.mubr.bf16.gmra.mrb[60].mxu0 %v5873_v54  ;;  %2187 = vmatprep.mubr.bf16.mxu1 %v8319_v47  ;;  %v10348_v54 = vld [vmem:[#allocation35_spill] sm:$0xff] }
 0x196   : > { %4475 = vmatprep.mubr.bf16.mxu0 %v7861_v23  ;;  %2558 = vmatpush1.bf16.msra.mxu1 %v7146_v57  ;;  %v10343_v23 = vld [vmem:[#allocation21_spill] sm:$0xff]  ;;  %v10349_v57 = vld [vmem:[#allocation11_spill] sm:$0xff] }
 0x197   : > { %2559 = vmatprep.subr.bf16.mxu1 %v7154_v21  ;;  %v7131_v21 = vld [vmem:[%s10091_s3 + $0x830] ss:$8 sps:$4 sm:$0xff]  }
 0x19a   : > { %2560 = vmatpush1.bf16.msra.mxu1 %v7152_v4  ;;  %v7139_v4 = vld [vmem:[%s10091_s3 + $0x844] ss:$8 sps:$4 sm:$0xff]  }
 0x19b   : > { %6089 = vmatprep.subr.bf16.mxu1 %v7200_v45  ;;  %v10350_v45 = vld [vmem:[#allocation14_spill] sm:$0xff] }
 0x19c   : > { %2188 = vmatmul.mubr.bf16.gmra.mrb[32].mxu1 %v10343_v23 }
 0x19d   : > { %4476 = vmatmul.mubr.bf16.vlgmr.msra.gmra.mrb[0].mxu0 %v10344_v17  ;;  %2197 = vmatprep.mubr.bf16.mxu1 %v10345_v48  ;;  %v10351_v17 = vld [vmem:[#allocation15_spill] sm:$0xff] }
 0x19e   : > { %4924 = vmatpush1.bf16.msra.mxu0 %v7113_v62  ;;  %4485 = vmatprep.mubr.bf16.mxu0 %v10346_v50  ;;  %v7137_v62 = vld [vmem:[%s10091_s3 + $0x840] ss:$8 sps:$4 sm:$0xff]   ;;  %v7151_v50 = vld [vmem:[%s10091_s3 + $0x864] ss:$8 sps:$4 sm:$0xff]  }
 0x19f   : > { %4925 = vmatprep.subr.bf16.mxu0 %v7121_v32  ;;  %v7145_v32 = vld [vmem:[%s10091_s3 + $0x854] ss:$8 sps:$4 sm:$0xff]  }
 0x1a2   : > { %4926 = vmatpush1.bf16.msra.mxu0 %v7119_v49  ;;  %v7143_v49 = vld [vmem:[%s10091_s3 + $0x850] ss:$8 sps:$4 sm:$0xff]  }
 0x1a3   : > { %4927 = vmatprep.subr.bf16.mxu0 %v7127_v31  ;;  %v7149_v31 = vld [vmem:[%s10091_s3 + $0x860] ss:$8 sps:$4 sm:$0xff]  }
 0x1a4   : > { %2198 = vmatmul.mubr.bf16.gmra.mrb[36].mxu1 %v8394_v13 }
 0x1a5   : > { %4486 = vmatmul.mubr.bf16.gmra.mrb[4].mxu0 %v10347_v35  ;;  %2207 = vmatprep.mubr.bf16.mxu1 %v10348_v54  ;;  %v10353_v35 = vld [vmem:[#allocation17_spill] sm:$0xff] }
 0x1a6   : > { %4495 = vmatprep.mubr.bf16.mxu0 %v10349_v57  ;;  %4928 = vmatpush1.bf16.msra.mxu0 %v7125_v53  ;;  %v7157_v53 = vld [vmem:[%s10091_s3 + $0x874] ss:$8 sps:$4 sm:$0xff]   ;;  %v7155_v57 = vld [vmem:[%s10091_s3 + $0x870] ss:$8 sps:$4 sm:$0xff]  }
 0x1a7   : > { %4929 = vmatprep.subr.bf16.mxu0 %v7133_v15  ;;  %v10352_v15 = vld [vmem:[#allocation16_spill] sm:$0xff] }
 0x1aa   : > { %4930 = vmatpush1.bf16.msra.mxu0 %v7131_v21  ;;  %v7160_v21 = vld [vmem:[%s10091_s3 + $0x884] ss:$8 sps:$4 sm:$0xff]  }
 0x1ab   : > { %4931 = vmatprep.subr.bf16.mxu0 %v7139_v4  ;;  %v7158_v4 = vld [vmem:[%s10091_s3 + $0x880] ss:$8 sps:$4 sm:$0xff]  }
 0x1ac   : > { %2208 = vmatmul.mubr.bf16.gmra.mrb[40].mxu1 %v8754_v27 }
 0x1ad   : > { %4496 = vmatmul.mubr.bf16.gmra.mrb[8].mxu0 %v10350_v45  ;;  %2217 = vmatprep.mubr.bf16.mxu1 %v8763_v18  ;;  %v10355_v45 = vld [vmem:[#allocation18_spill] sm:$0xff] }
 0x1ae   : > { %4505 = vmatprep.mubr.bf16.mxu0 %v10351_v17  ;;  %4932 = vmatpush1.bf16.msra.mxu0 %v7137_v62  ;;  %v7163_v62 = vld [vmem:[%s10091_s3 + $0x894] ss:$8 sps:$4 sm:$0xff]  }
 0x1af   : > { %4933 = vmatprep.subr.bf16.mxu0 %v7145_v32  ;;  %v10354_v32 = vld [vmem:[#allocation36_spill] sm:$0xff]  ;;  %v10356_v17 = vld [vmem:[#allocation38_spill] sm:$0xff] }
 0x1b2   : > { %4934 = vmatpush1.bf16.msra.mxu0 %v7143_v49  ;;  %v10357_v49 = vld [vmem:[#allocation19_spill] sm:$0xff] }
 0x1b3   : > { %4935 = vmatprep.subr.bf16.mxu0 %v7151_v50  ;;  %v7161_v50 = vld [vmem:[%s10091_s3 + $0x890] ss:$8 sps:$4 sm:$0xff]  }
 0x1b4   : > { %2218 = vmatmul.mubr.bf16.gmra.mrb[44].mxu1 %v8792_v8 }
 0x1b5   : > { %4506 = vmatmul.mubr.bf16.gmra.mrb[12].mxu0 %v10352_v15  ;;  %2227 = vmatprep.mubr.bf16.mxu1 %v8794_v42  ;;  %v7169_v15 = vld [vmem:[%s10091_s3 + $0x8b4] ss:$8 sps:$4 sm:$0xff]  }
 0x1b6   : > { %4515 = vmatprep.mubr.bf16.mxu0 %v10353_v35  ;;  %4936 = vmatpush1.bf16.msra.mxu0 %v7149_v31  ;;  %v7166_v31 = vld [vmem:[%s10091_s3 + $0x8a4] ss:$8 sps:$4 sm:$0xff]  }
 0x1b7   : > { %4937 = vmatprep.subr.bf16.mxu0 %v7157_v53  ;;  %v7164_v53 = vld [vmem:[%s10091_s3 + $0x8a0] ss:$8 sps:$4 sm:$0xff]  }
 0x1b8   : > { %v10358_v35 = vld [vmem:[#allocation40_spill] sm:$0xff] }
 0x1ba   : > { %4938 = vmatpush1.bf16.msra.mxu0 %v7155_v57  ;;  %v10359_v57 = vld [vmem:[#allocation20_spill] sm:$0xff] }
 0x1bb   : > { %4939 = vmatprep.subr.bf16.mxu0 %v7160_v21  ;;  %v10360_v21 = vld [vmem:[#allocation41_spill] sm:$0xff] }
 0x1bc   : > { %2228 = vmatmul.mubr.bf16.gmra.mrb[48].mxu1 %v10354_v32 }
 0x1bd   : > { %4516 = vmatmul.mubr.bf16.gmra.mrb[16].mxu0 %v10355_v45  ;;  %2237 = vmatprep.mubr.bf16.mxu1 %v10356_v17  ;;  %v7172_v45 = vld [vmem:[%s10091_s3 + $0x8c4] ss:$8 sps:$4 sm:$0xff]  }
 0x1be   : > { %4525 = vmatprep.mubr.bf16.mxu0 %v10357_v49  ;;  %4940 = vmatpush1.bf16.msra.mxu0 %v7158_v4  ;;  %v10361_v4 = vld [vmem:[#allocation23_spill] sm:$0xff]  ;;  %v7170_v49 = vld [vmem:[%s10091_s3 + $0x8c0] ss:$8 sps:$4 sm:$0xff]  }
 0x1bf   : > { %4941 = vmatprep.subr.bf16.mxu0 %v7163_v62  ;;  %v7167_v62 = vld [vmem:[%s10091_s3 + $0x8b0] ss:$8 sps:$4 sm:$0xff]   ;;  %v10371_v17 = vld [vmem:[#allocation28_spill] sm:$0xff] }
 0x1c2   : > { %4942 = vmatpush1.bf16.msra.mxu0 %v7161_v50  ;;  %v7175_v50 = vld [vmem:[%s10091_s3 + $0x8d4] ss:$8 sps:$4 sm:$0xff]  }
 0x1c3   : > { %4943 = vmatprep.subr.bf16.mxu0 %v7166_v31  ;;  %v10362_v31 = vld [vmem:[#allocation42_spill] sm:$0xff] }
 0x1c4   : > { %2238 = vmatmul.mubr.bf16.gmra.mrb[52].mxu1 %v10358_v35  ;;  %v10368_v35 = vld [vmem:[#allocation12_spill] sm:$0xff] }
 0x1c5   : > { %4526 = vmatmul.mubr.bf16.gmra.mrb[20].mxu0 %v10359_v57  ;;  %2247 = vmatprep.mubr.bf16.mxu1 %v10360_v21  ;;  %v10364_v57 = vld [vmem:[#allocation43_spill] sm:$0xff]  ;;  %v10367_v21 = vld [vmem:[#allocation26_spill] sm:$0xff] }
 0x1c6   : > { %4535 = vmatprep.mubr.bf16.mxu0 %v10361_v4  ;;  %4944 = vmatpush1.bf16.msra.mxu0 %v7164_v53  ;;  %v10363_v53 = vld [vmem:[#allocation24_spill] sm:$0xff] }
 0x1c7   : > { %4945 = vmatprep.subr.bf16.mxu0 %v7169_v15  ;;  %v10365_v15 = vld [vmem:[#allocation25_spill] sm:$0xff] }
 0x1ca   : > { %4946 = vmatpush1.bf16.msra.mxu0 %v7167_v62  ;;  %v7173_v62 = vld [vmem:[%s10091_s3 + $0x8d0] ss:$8 sps:$4 sm:$0xff]  }
 0x1cb   : > { %4947 = vmatprep.subr.bf16.mxu0 %v7172_v45  ;;  %v7178_v45 = vld [vmem:[%s10091_s3 + $0x8e4] ss:$8 sps:$4 sm:$0xff]  }
 0x1cc   : > { %2248 = vmatmul.mubr.bf16.gmra.mrb[56].mxu1 %v10362_v31  ;;  %v7176_v31 = vld [vmem:[%s10091_s3 + $0x8e0] ss:$8 sps:$4 sm:$0xff]  }
 0x1cd   : > { %4536 = vmatmul.mubr.bf16.gmra.mrb[24].mxu0 %v10363_v53  ;;  %2257 = vmatprep.mubr.bf16.mxu1 %v10364_v57  ;;  %v7181_v57 = vld [vmem:[%s10091_s3 + $0x8f4] ss:$8 sps:$4 sm:$0xff]  }
 0x1ce   : > { %4545 = vmatprep.mubr.bf16.mxu0 %v10365_v15  ;;  %4948 = vmatpush1.bf16.msra.mxu0 %v7170_v49  ;;  %v10366_v49 = vld [vmem:[#allocation44_spill] sm:$0xff]  ;;  %v10385_v15 = vunpack.c.h.bf16 %v8942_v2 }
 0x1cf   : > { %4949 = vmatprep.subr.bf16.mxu0 %v7175_v50  ;;  %v10369_v50 = vld [vmem:[#allocation27_spill] sm:$0xff] }
 0x1d0   : > { %v2808_v32 = vrot.slane %v10385_v15, 1 }
 0x1d2   : > { %4950 = vmatpush1.bf16.msra.mxu0 %v7173_v62  ;;  %v7179_v62 = vld [vmem:[%s10091_s3 + $0x8f0] ss:$8 sps:$4 sm:$0xff]  }
 0x1d3   : > { %4951 = vmatprep.subr.bf16.mxu0 %v7178_v45  ;;  %v10370_v45 = vld [vmem:[#allocation13_spill] sm:$0xff] }
 0x1d4   : > { %2258 = vmatmul.mubr.bf16.gmra.mrb[60].mxu1 %v10366_v49  ;;  %v7201_v49 = vld [vmem:[%s10091_s3 + $0x400] ss:$8 sps:$4 sm:$0xff]  }
 0x1d5   : > { %4546 = vmatmul.mubr.bf16.gmra.mrb[28].mxu0 %v10367_v21  ;;  %2561 = vmatprep.mubr.bf16.mxu1 %v10368_v35  ;;  %v10372_v21 = vld [vmem:[#allocation37_spill] sm:$0xff] }
 0x1d6   : > { %4555 = vmatprep.mubr.bf16.mxu0 %v10369_v50  ;;  %4952 = vmatpush1.bf16.msra.mxu0 %v7176_v31  ;;  %v10373_v35 = vld [vmem:[#allocation29_spill] sm:$0xff]  ;;  %v7202_v31 = vld [vmem:[%s10091_s3 + $0x414] ss:$8 sps:$4 sm:$0xff]  }
 0x1d7   : > { %4953 = vmatprep.subr.bf16.mxu0 %v7181_v57  ;;  %v7203_v57 = vld [vmem:[%s10091_s3 + $0x410] ss:$8 sps:$4 sm:$0xff]  }
 0x1da   : > { %4954 = vmatpush1.bf16.msra.mxu0 %v7179_v62  ;;  %v7204_v62 = vld [vmem:[%s10091_s3 + $0x424] ss:$8 sps:$4 sm:$0xff]  }
 0x1dc   : > { %2562 = vmatmul.mubr.bf16.vlgmr.msra.gmra.mrb[0].mxu1 %v10370_v45  ;;  %v10376_v45 = vld [vmem:[#allocation31_spill] sm:$0xff] }
 0x1dd   : > { %4556 = vmatmul.mubr.bf16.gmra.mrb[32].mxu0 %v10371_v17  ;;  %6105 = vmatpush1.bf16.msra.mxu1 %v7201_v49  ;;  %v10374_v49 = vld [vmem:[#allocation39_spill] sm:$0xff] }
 0x1de   : > { %2571 = vmatprep.mubr.bf16.mxu1 %v10372_v21  ;;  %4565 = vmatprep.mubr.bf16.mxu0 %v10373_v35  ;;  %v10375_v21 = vld [vmem:[#allocation30_spill] sm:$0xff]  ;;  %v10379_v35 = vunpack.c.h.bf16 %v8896_v0 }
 0x1df   : > { %6090 = vmatprep.subr.bf16.mxu1 %v7202_v31  ;;  %v7205_v31 = vld [vmem:[%s10091_s3 + $0x420] ss:$8 sps:$4 sm:$0xff]  }
 0x1e0   : > { %v2804_v17 = vrot.slane %v10379_v35, 1  ;;  %v7209_v35 = vld [vmem:[%s10091_s3 + $0x440] ss:$8 sps:$4 sm:$0xff]  }
 0x1e1   : > { %6106 = vmatpush1.bf16.msra.mxu1 %v7203_v57  ;;  %v7206_v57 = vld [vmem:[%s10091_s3 + $0x434] ss:$8 sps:$4 sm:$0xff]  }
 0x1e2   : > { %6091 = vmatprep.subr.bf16.mxu1 %v7204_v62  ;;  %v7207_v62 = vld [vmem:[%s10091_s3 + $0x430] ss:$8 sps:$4 sm:$0xff]  }
 0x1e4   : > { %2572 = vmatmul.mubr.bf16.gmra.mrb[4].mxu1 %v10374_v49  ;;  %v10377_v49 = vunpack.c.h.bf16 %v8887_v14 }
 0x1e5   : > { %4566 = vmatmul.mubr.bf16.gmra.mrb[36].mxu0 %v10375_v21  ;;  %2581 = vmatprep.mubr.bf16.mxu1 %v8872_v5 }
 0x1e6   : > { %4575 = vmatprep.mubr.bf16.mxu0 %v10376_v45  ;;  %6107 = vmatpush1.bf16.msra.mxu1 %v7205_v31  ;;  %v2799_v5 = vrot.slane %v10377_v49, 1  ;;  %v10378_v45 = vunpack.c.h.bf16 %v8893_v37  ;;  %v7208_v31 = vld [vmem:[%s10091_s3 + $0x444] ss:$8 sps:$4 sm:$0xff]  }
 0x1e7   : > { %6092 = vmatprep.subr.bf16.mxu1 %v7206_v57  ;;  %v10380_v57 = vld [vmem:[#allocation32_spill] sm:$0xff] }
 0x1e8   : > { %v2800_v21 = vrot.slane %v10378_v45, 1 }
 0x1ea   : > { %6108 = vmatpush1.bf16.msra.mxu1 %v7207_v62  ;;  %v10381_v62 = vld [vmem:[#allocation33_spill] sm:$0xff]  ;;  %v2801_v49 = vsel %vm661_vm0, %v2799_v5, %v2800_v21  ;;  %v2805_v45 = vsel %vm661_vm0, %v2800_v21, %v2804_v17  ;;  %v10384_v21 = vunpack.c.l.bf16 %v8896_v0 }
 0x1eb   : > { %6093 = vmatprep.subr.bf16.mxu1 %v7208_v31  ;;  %v7210_v31 = vld [vmem:[%s10091_s3 + $0x454] ss:$8 sps:$4 sm:$0xff]  }
 0x1ec   : > { %2582 = vmatmul.mubr.bf16.gmra.mrb[8].mxu1 %v8918_v41  ;;  %v10382_v41 = vunpack.c.l.bf16 %v8887_v14  ;;  %v2802_v50 = vrot.slane %v10384_v21, 1  ;;  %v7212_v14 = vld [vmem:[%s10091_s3 + $0x464] ss:$8 sps:$4 sm:$0xff]   ;;  %v10389_v21 = vunpack.c.l.bf16 %v8945_v19 }
 0x1ed   : > { %4576 = vmatmul.mubr.bf16.gmra.mrb[40].mxu0 %v10380_v57  ;;  %2591 = vmatprep.mubr.bf16.mxu1 %v8926_v30  ;;  %v9580_v30 = vpack.c.bf16 %v2805_v45, %v2801_v49  ;;  %v508_v45 = vunpack.c.h.bf16 %v9330_v40 }
 0x1ee   : > { %4585 = vmatprep.mubr.bf16.mxu0 %v10381_v62  ;;  %6109 = vmatpush1.bf16.msra.mxu1 %v7209_v35  ;;  %v2796_v57 = vrot.slane %v10382_v41, 1  ;;  %v10383_v62 = vunpack.c.l.bf16 %v8893_v37  ;;  %v10386_v35 = vunpack.c.h.bf16 %v8945_v19  ;;  %v10387_v37 = vld [vmem:[#allocation34_spill] sm:$0xff]  ;;  %v10210_v41 = vunpack.c.h.bf16 %v9333_v20  ;;  %v7216_v19 = vld [vmem:[%s10091_s3 + $0x484] ss:$8 sps:$4 sm:$0xff]  }
 0x1ef   : > { %6094 = vmatprep.subr.bf16.mxu1 %v7210_v31  ;;  %v7211_v31 = vld [vmem:[%s10091_s3 + $0x450] ss:$8 sps:$4 sm:$0xff]  }
 0x1f0   : > { %v2797_v5 = vrot.slane %v10383_v62, 1  ;;  %v2812_v53 = vrot.slane %v10386_v35, 1  ;;  %v2809_v62 = vsel %vm661_vm0, %v2804_v17, %v2808_v32  ;;  %v2810_v35 = vrot.slane %v10389_v21, 1 }
 0x1f2   : > { %6110 = vmatpush1.bf16.msra.mxu1 %v7211_v31  ;;  %v2798_v0 = vsel %vm661_vm0, %v2796_v57, %v2797_v5  ;;  %v2803_v15 = vsel %vm661_vm0, %v2797_v5, %v2802_v50  ;;  %v2813_v49 = vsel %vm661_vm0, %v2808_v32, %v2812_v53  ;;  %v7214_v57 = vld [vmem:[%s10091_s3 + $0x474] ss:$8 sps:$4 sm:$0xff]   ;;  %v10388_v32 = vunpack.c.l.bf16 %v8942_v2  ;;  %v9631_v2 = vld [vmem:[%s9320_s8 + $0x20] sm:$0x11]  ;;  %s322_s8 = sand.u32 1, %s7302_s19  }
 0x1f3   : > { %6095 = vmatprep.subr.bf16.mxu1 %v7212_v14  ;;  %v9613_v17 = vpack.c.bf16 %v2803_v15, %v2798_v0  ;;  %v9617_v5 = vpack.c.bf16 %v2813_v49, %v2809_v62  ;;  %v4223_v31 = vrot.slane %v508_v45, 1  ;;  %v4224_v14 = vrot.slane %v10210_v41, 1  ;;  %v7215_v0 = vld [vmem:[%s10091_s3 + $0x470] ss:$8 sps:$4 sm:$0xff]   ;;  %s5475_s13 = sshll.u32 %s322_s8, 9  ;;  %s10036_s27 = scalar_lea.sflag [#allocation3], %s322_s8 }
 0x1f4   : > { %2592 = vmatmul.mubr.bf16.gmra.mrb[12].mxu1 %v8969_v12  ;;  %v10209_v12 = vunpack.c.h.bf16 %v9357_v43  ;;  %v2806_v53 = vrot.slane %v10388_v32, 1  ;;  %v507_v49 = vunpack.c.l.bf16 %v9330_v40  ;;  %v511_v32 = vunpack.c.l.bf16 %v9357_v43  ;;  %s9872_s17 = scalar_lea.vmem [#allocation2], %s5475_s13 }
 0x1f5   : > { %4586 = vmatmul.mubr.bf16.gmra.mrb[44].mxu0 %v10387_v37  ;;  %2601 = vmatprep.mubr.bf16.mxu1 %v8975_v61  ;;  %v7213_v61 = vld [vmem:[%s10091_s3 + $0x460] ss:$8 sps:$4 sm:$0xff]   ;;  %v4225_v21 = vsel %vm661_vm0, %v4223_v31, %v4224_v14  ;;  %s5337_s22 = sshll.u32 %s9872_s17, 4  ;;  %s10028_s22 = int_to_ptr.vmem [resolvable:$true] %s5337_s22 }
 0x1f6   : > { %4595 = vmatprep.mubr.bf16.mxu0 %v9580_v30  ;;  %6111 = vmatpush1.bf16.msra.mxu1 %v7213_v61  ;;  %v4228_v61 = vrot.slane %v10209_v12, 1  ;;  %v2807_v15 = vsel %vm661_vm0, %v2802_v50, %v2806_v53  ;;  %v2811_v62 = vsel %vm661_vm0, %v2806_v53, %v2810_v35  ;;  %v10211_v50 = vunpack.c.h.bf16 %v9631_v2  ;;  %v7218_v53 = vld [vmem:[%s10091_s3 + $0x494] ss:$8 sps:$4 sm:$0xff]   ;;  %s7232_s28 = scalar_lea.vmem %s10028_s22, 8192  ;;  %p7239_p6 = scmp.lt.s32.totalorder %s10028_s22, %s7237_s29 }
 0x1f7   : > { %6096 = vmatprep.subr.bf16.mxu1 %v7214_v57  ;;  %v509_v57 = vunpack.c.l.bf16 %v9333_v20  ;;  %v9655_v35 = vpack.c.bf16 %v2811_v62, %v2807_v15  ;;  %v4220_v31 = vrot.slane %v507_v49, 1  ;;  %v4226_v12 = vrot.slane %v511_v32, 1  ;;  %v7219_v15 = vld [vmem:[%s10091_s3 + $0x490] ss:$8 sps:$4 sm:$0xff]   ;;  %v7220_v62 = vld [vmem:[%s10091_s3 + $0x4a4] ss:$8 sps:$4 sm:$0xff]   ;;  %p7233_p2 = scmp.ne.s32.totalorder %s10028_s22, %s7232_s28  ;;  %p7240_p7 = scmp.lt.s32.totalorder %s7238_s30, %s7232_s28 }
 0x1f8   : > { %v4236_v41 = vrot.slane %v10211_v50, 1 }
 0x1f9   : > { %p7234_p4 = pnand %p7233_p2, %p7412_p3  ;;  %p7241_p9 = por %p7240_p7, %p7239_p6 }
 0x1fa   : > { %6112 = vmatpush1.bf16.msra.mxu1 %v7215_v0  ;;  %v10212_v0 = vunpack.c.h.bf16 %v9360_v25 }
 0x1fb   : > { %6097 = vmatprep.subr.bf16.mxu1 %v7216_v19  ;;  %p7235_p5 = pneg %p7234_p4 }
 0x1fc   : > { %2602 = vmatmul.mubr.bf16.gmra.mrb[16].mxu1 %v9011_v16  ;;  %v4229_v16 = vsel %vm661_vm0, %v4224_v14, %v4228_v61  ;;  %v4221_v14 = vrot.slane %v509_v57, 1 }
 0x1fd   : > { %4596 = vmatmul.mubr.bf16.gmra.mrb[48].mxu0 %v9613_v17  ;;  %2611 = vmatprep.mubr.bf16.mxu1 %v9017_v39  ;;  %v7217_v39 = vld [vmem:[%s10091_s3 + $0x480] ss:$8 sps:$4 sm:$0xff]   ;;  %v4247_v19 = vpack.c.bf16 %v4229_v16, %v4225_v21  ;;  %p7242_p10 = pnand %p7241_p9, %p7235_p5 }
 0x1fe   : > { %4605 = vmatprep.mubr.bf16.mxu0 %v9617_v5  ;;  %6113 = vmatpush1.bf16.msra.mxu1 %v7217_v39  ;;  %v4232_v39 = vrot.slane %v10212_v0, 1  ;;  %v4222_v21 = vsel %vm661_vm0, %v4220_v31, %v4221_v14  ;;  %v4227_v16 = vsel %vm661_vm0, %v4221_v14, %v4226_v12 }
 0x1ff   : > { %6098 = vmatprep.subr.bf16.mxu1 %v7218_v53  ;;  %v513_v53 = vunpack.c.l.bf16 %v9360_v25 }
 0x200   : > { %v4233_v50 = vsel %vm661_vm0, %v4228_v61, %v4232_v39  ;;  %v4237_v0 = vsel %vm661_vm0, %v4232_v39, %v4236_v41  ;;  %v7223_v41 = vld [vmem:[%s10091_s3 + $0x4b0] ss:$8 sps:$4 sm:$0xff]   ;;  %v7224_v39 = vld [vmem:[%s10091_s3 + $0x4c4] ss:$8 sps:$4 sm:$0xff]  }
 0x201   : > { %v4249_v31 = vpack.c.bf16 %v4237_v0, %v4233_v50  ;;  %v4230_v14 = vrot.slane %v513_v53, 1  ;;  %v10390_v0 = vld [vmem:[#allocation49_spill] sm:$0xff] }
 0x202   : > { %6114 = vmatpush1.bf16.msra.mxu1 %v7219_v15  ;;  %v515_v15 = vunpack.c.l.bf16 %v9631_v2 }
 0x203   : > { %6099 = vmatprep.subr.bf16.mxu1 %v7220_v62  ;;  %v4231_v50 = vsel %vm661_vm0, %v4226_v12, %v4230_v14  ;;  %v7228_v12 = vld [vmem:[%s10091_s3 + $0x4e4] ss:$8 sps:$4 sm:$0xff]  }
 0x204   : > { %2612 = vmatmul.mubr.bf16.gmra.mrb[20].mxu1 %v9043_v59  ;;  %v7221_v59 = vld [vmem:[%s10091_s3 + $0x4a0] ss:$8 sps:$4 sm:$0xff]   ;;  %v4234_v61 = vrot.slane %v515_v15, 1 }
 0x205   : > { %4606 = vmatmul.mubr.bf16.gmra.mrb[52].mxu0 %v9655_v35  ;;  %2621 = vmatprep.mubr.bf16.mxu1 %v9049_v55  ;;  %v7222_v55 = vld [vmem:[%s10091_s3 + $0x4b4] ss:$8 sps:$4 sm:$0xff]  }
 0x206   : > { %4615 = vmatprep.mubr.bf16.mxu0 %v4247_v19  ;;  %6115 = vmatpush1.bf16.msra.mxu1 %v7221_v59  ;;  %v4246_v19 = vpack.c.bf16 %v4227_v16, %v4222_v21  ;;  %v4235_v62 = vsel %vm661_vm0, %v4230_v14, %v4234_v61  ;;  %v7225_v21 = vld [vmem:[%s10091_s3 + $0x4c0] ss:$8 sps:$4 sm:$0xff]   ;;  %v7226_v16 = vld [vmem:[%s10091_s3 + $0x4d4] ss:$8 sps:$4 sm:$0xff]   ;;  %v7231_v14 = vld [vmem:[%s10091_s3 + $0x4f0] ss:$8 sps:$4 sm:$0xff]   ;;  %v10416_v61 = vunpack.c.h.bf16 %v9631_v2 }
 0x207   : > { %6100 = vmatprep.subr.bf16.mxu1 %v7222_v55  ;;  %v4248_v59 = vpack.c.bf16 %v4235_v62, %v4231_v50  ;;  %v10391_v55 = vld [vmem:[#allocation50_spill] sm:$0xff] }
 0x20a   : > { %6116 = vmatpush1.bf16.msra.mxu1 %v7223_v41  ;;  %v4716_v41 = vrot.slane %v10416_v61, 2 }
 0x20b   : > { %6101 = vmatprep.subr.bf16.mxu1 %v7224_v39  ;;  %v10417_v39 = vld [vmem:[#allocation48_spill] sm:$0xff] }
 0x20c   : > { %2622 = vmatmul.mubr.bf16.gmra.mrb[24].mxu1 %v9067_v58  ;;  %v7227_v58 = vld [vmem:[%s10091_s3 + $0x4d0] ss:$8 sps:$4 sm:$0xff]  }
 0x20d   : > { %4616 = vmatmul.mubr.bf16.gmra.mrb[56].mxu0 %v4246_v19  ;;  %2631 = vmatprep.mubr.bf16.mxu1 %v10390_v0  ;;  %v7229_v19 = vld [vmem:[%s10091_s3 + $0x4e0] ss:$8 sps:$4 sm:$0xff]   ;;  %v4710_v0 = vrot.slane %v513_v53, 2 }
 0x20e   : > { %4625 = vmatprep.mubr.bf16.mxu0 %v4249_v31  ;;  %6117 = vmatpush1.bf16.msra.mxu1 %v7225_v21  ;;  %v7230_v31 = vld [vmem:[%s10091_s3 + $0x4f4] ss:$8 sps:$4 sm:$0xff]  }
 0x20f   : > { %6102 = vmatprep.subr.bf16.mxu1 %v7226_v16 }
 0x212   : > { %6118 = vmatpush1.bf16.msra.mxu1 %v7227_v58 }
 0x213   : > { %6103 = vmatprep.subr.bf16.mxu1 %v7228_v12 }
 0x214   : > { %2632 = vmatmul.mubr.bf16.gmra.mrb[28].mxu1 %v10391_v55 }
 0x215   : > { %4626 = vmatmul.mubr.bf16.gmra.mrb[60].mxu0 %v4248_v59  ;;  %2641 = vmatprep.mubr.bf16.mxu1 %v9093_v22  ;;  %v10411_v22 = vld [vmem:[#allocation32_spill] sm:$0xff] }
 0x216   : > { %4955 = vmatprep.mubr.bf16.mxu0 %v8079_v44  ;;  %6119 = vmatpush1.bf16.msra.mxu1 %v7229_v19  ;;  %v10392_v44 = vld [vmem:[#allocation51_spill] sm:$0xff] }
 0x217   : > { %6104 = vmatprep.subr.bf16.mxu1 %v7230_v31 }
 0x21a   : > { %6120 = vmatpush1.bf16.msra.mxu1 %v7231_v14 }
 0x21c   : > { %2642 = vmatmul.mubr.bf16.gmra.mrb[32].mxu1 %v9111_v3  ;;  %v10412_v3 = vld [vmem:[#allocation46_spill] sm:$0xff] }
 0x21d   : > { %4956 = vmatmul.mubr.bf16.vlgmr.msra.gmra.mrb[0].mxu0 %v8121_v10  ;;  %2651 = vmatprep.mubr.bf16.mxu1 %v10392_v44  ;;  %v10393_v10 = vld [vmem:[#allocation24_spill] sm:$0xff] }
 0x21e   : > { %4965 = vmatprep.mubr.bf16.mxu0 %v8168_v1  ;;  %v10395_v1 = vld [vmem:[#allocation25_spill] sm:$0xff] }
 0x224   : > { %2652 = vmatmul.mubr.bf16.gmra.mrb[36].mxu1 %v9133_v56  ;;  %v10413_v56 = vld [vmem:[#allocation33_spill] sm:$0xff] }
 0x225   : > { %4966 = vmatmul.mubr.bf16.gmra.mrb[4].mxu0 %v8181_v11  ;;  %2661 = vmatprep.mubr.bf16.mxu1 %v8576_v9  ;;  %v10397_v11 = vld [vmem:[#allocation26_spill] sm:$0xff]  ;;  %v10403_v9 = vld [vmem:[#allocation29_spill] sm:$0xff] }
 0x226   : > { %4975 = vmatprep.mubr.bf16.mxu0 %v8216_v29  ;;  %v10394_v29 = vld [vmem:[#allocation36_spill] sm:$0xff] }
 0x22c   : > { %2662 = vmatmul.mubr.bf16.gmra.mrb[40].mxu1 %v8580_v38  ;;  %v10404_v38 = vld [vmem:[#allocation43_spill] sm:$0xff] }
 0x22d   : > { %4976 = vmatmul.mubr.bf16.gmra.mrb[8].mxu0 %v8248_v63  ;;  %2671 = vmatprep.mubr.bf16.mxu1 %v8597_v36  ;;  %v10398_v63 = vld [vmem:[#allocation40_spill] sm:$0xff]  ;;  %v10405_v36 = vld [vmem:[#allocation30_spill] sm:$0xff] }
 0x22e   : > { %4985 = vmatprep.mubr.bf16.mxu0 %v8263_v46  ;;  %v10399_v46 = vld [vmem:[#allocation27_spill] sm:$0xff] }
 0x234   : > { %2672 = vmatmul.mubr.bf16.gmra.mrb[44].mxu1 %v8609_v6  ;;  %v10396_v6 = vld [vmem:[#allocation38_spill] sm:$0xff] }
 0x235   : > { %4986 = vmatmul.mubr.bf16.gmra.mrb[12].mxu0 %v8285_v51  ;;  %2681 = vmatprep.mubr.bf16.mxu1 %v8643_v24  ;;  %v10400_v51 = vld [vmem:[#allocation41_spill] sm:$0xff]  ;;  %v10406_v24 = vld [vmem:[#allocation44_spill] sm:$0xff] }
 0x236   : > { %4995 = vmatprep.mubr.bf16.mxu0 %v8319_v47  ;;  %v10401_v47 = vld [vmem:[#allocation28_spill] sm:$0xff] }
 0x23c   : > { %2682 = vmatmul.mubr.bf16.gmra.mrb[48].mxu1 %v8655_v60  ;;  %v10407_v60 = vld [vmem:[#allocation31_spill] sm:$0xff] }
 0x23d   : > { %4996 = vmatmul.mubr.bf16.gmra.mrb[16].mxu0 %v10343_v23  ;;  %2691 = vmatprep.mubr.bf16.mxu1 %v8686_v52  ;;  %v10408_v52 = vld [vmem:[#allocation45_spill] sm:$0xff]  ;;  %v4700_v23 = vrot.slane %v507_v49, 2 }
 0x23e   : > { %5005 = vmatprep.mubr.bf16.mxu0 %v10345_v48  ;;  %v4701_v48 = vrot.slane %v509_v57, 2 }
 0x240   : > { %v4702_v40 = vsel %vm1641_vm1, %v4700_v23, %v4701_v48 }
 0x244   : > { %2692 = vmatmul.mubr.bf16.gmra.mrb[52].mxu1 %v8697_v7  ;;  %v4703_v7 = vrot.slane %v508_v45, 2 }
 0x245   : > { %5006 = vmatmul.mubr.bf16.gmra.mrb[20].mxu0 %v8394_v13  ;;  %2701 = vmatprep.mubr.bf16.mxu1 %v9287_v33  ;;  %v10402_v13 = vld [vmem:[#allocation42_spill] sm:$0xff]  ;;  %v10414_v33 = vld [vmem:[#allocation47_spill] sm:$0xff] }
 0x246   : > { %5015 = vmatprep.mubr.bf16.mxu0 %v10348_v54  ;;  %v4706_v54 = vrot.slane %v511_v32, 2 }
 0x24c   : > { %2702 = vmatmul.mubr.bf16.gmra.mrb[56].mxu1 %v9308_v34 }
 0x24d   : > { %5016 = vmatmul.mubr.bf16.gmra.mrb[24].mxu0 %v8754_v27  ;;  %2711 = vmatprep.mubr.bf16.mxu1 %v9312_v26  ;;  %v10409_v27 = vunpack.c.h.bf16 %v9333_v20  ;;  %v4707_v20 = vsel %vm1641_vm1, %v4701_v48, %v4706_v54 }
 0x24e   : > { %5025 = vmatprep.mubr.bf16.mxu0 %v8763_v18  ;;  %v4726_v57 = vpack.c.bf16 %v4707_v20, %v4702_v40 }
 0x24f   : > { %v4704_v18 = vrot.slane %v10409_v27, 2 }
 0x251   : > { %v4705_v34 = vsel %vm1641_vm1, %v4703_v7, %v4704_v18 }
 0x254   : > { %2712 = vmatmul.mubr.bf16.gmra.mrb[60].mxu1 %v9343_v28 }
 0x255   : > { %5026 = vmatmul.mubr.bf16.gmra.mrb[28].mxu0 %v8792_v8  ;;  %3131 = vmatprep.mubr.bf16.mxu1 %v10361_v4  ;;  %v10410_v8 = vunpack.c.h.bf16 %v9357_v43  ;;  %v10415_v4 = vunpack.c.h.bf16 %v9360_v25 }
 0x256   : > { %5035 = vmatprep.mubr.bf16.mxu0 %v8794_v42 }
 0x257   : > { %v4708_v42 = vrot.slane %v10410_v8, 2  ;;  %v4712_v45 = vrot.slane %v10415_v4, 2 }
 0x259   : > { %v4709_v26 = vsel %vm1641_vm1, %v4704_v18, %v4708_v42  ;;  %v4713_v43 = vsel %vm1641_vm1, %v4708_v42, %v4712_v45  ;;  %v4717_v49 = vsel %vm1641_vm1, %v4712_v45, %v4716_v41  ;;  %v5180_v18 = vld [vmem:[%s10092_s4] sm:$0x3] }
 0x25a   : > { %v4727_v28 = vpack.c.bf16 %v4709_v26, %v4705_v34  ;;  %v4729_v32 = vpack.c.bf16 %v4717_v49, %v4713_v43 }
 0x25c   : > { %3132 = vmatmul.mubr.bf16.vlgmr.msra.gmra.mrb[32].mxu1 %v10393_v10 }
 0x25d   : > { %5036 = vmatmul.mubr.bf16.gmra.mrb[32].mxu0 %v10394_v29  ;;  %3141 = vmatprep.mubr.bf16.mxu1 %v10395_v1 }
 0x25e   : > { %5045 = vmatprep.mubr.bf16.mxu0 %v10396_v6 }
 0x264   : > { %3142 = vmatmul.mubr.bf16.gmra.mrb[36].mxu1 %v10397_v11 }
 0x265   : > { %5046 = vmatmul.mubr.bf16.gmra.mrb[36].mxu0 %v10398_v63  ;;  %3151 = vmatprep.mubr.bf16.mxu1 %v10399_v46 }
 0x266   : > { %5055 = vmatprep.mubr.bf16.mxu0 %v10400_v51 }
 0x26c   : > { %3152 = vmatmul.mubr.bf16.gmra.mrb[40].mxu1 %v10401_v47 }
 0x26d   : > { %5056 = vmatmul.mubr.bf16.gmra.mrb[40].mxu0 %v10402_v13  ;;  %3161 = vmatprep.mubr.bf16.mxu1 %v10403_v9 }
 0x26e   : > { %5065 = vmatprep.mubr.bf16.mxu0 %v10404_v38  ;;  %v5182_v38 = vlaneseq }
 0x274   : > { %3162 = vmatmul.mubr.bf16.gmra.mrb[44].mxu1 %v10405_v36  ;;  %v5183_v36 = vshrl.u32 %v5182_v38, 7 }
 0x275   : > { %5066 = vmatmul.mubr.bf16.gmra.mrb[44].mxu0 %v10406_v24  ;;  %3171 = vmatprep.mubr.bf16.mxu1 %v10407_v60 }
 0x276   : > { %5075 = vmatprep.mubr.bf16.mxu0 %v10408_v52  ;;  %v5184_v27 = vsub.s32 0, %v5183_v36  ;;  %v5188_v8 = vsub.s32 1, %v5183_v36 }
 0x278   : > { %v9866_v42 = vrot.slane %v5180_v18, %v5184_v27 }
 0x27c   : > { %3172 = vmatmul.mubr.bf16.gmra.mrb[48].mxu1 %v10411_v22 }
 0x27d   : > { %5076 = vmatmul.mubr.bf16.gmra.mrb[48].mxu0 %v10412_v3  ;;  %3181 = vmatprep.mubr.bf16.mxu1 %v10413_v56  ;;  %v9868_v3 = vrot.slane %v5180_v18, %v5188_v8 }
 0x27e   : > { %5085 = vmatprep.mubr.bf16.mxu0 %v10414_v33 }
 0x284   : > { %3182 = vmatmul.mubr.bf16.gmra.mrb[52].mxu1 %v10387_v37  ;;  %v4714_v37 = vrot.slane %v515_v15, 2 }
 0x285   : > { %5086 = vmatmul.mubr.bf16.gmra.mrb[52].mxu0 %v10417_v39  ;;  %3191 = vmatprep.mubr.bf16.mxu1 %v9580_v30  ;;  %v4711_v30 = vsel %vm1641_vm1, %v4706_v54, %v4710_v0 }
 0x286   : > { %5095 = vmatprep.mubr.bf16.mxu0 %v4727_v28  ;;  %v4715_v50 = vsel %vm1641_vm1, %v4710_v0, %v4714_v37 }
 0x287   : > { %v4728_v62 = vpack.c.bf16 %v4715_v50, %v4711_v30 }
 0x28c   : > { %3192 = vmatmul.mubr.bf16.gmra.mrb[56].mxu1 %v9613_v17 }
 0x28d   : > { %5096 = vmatmul.mubr.bf16.gmra.mrb[56].mxu0 %v4726_v57  ;;  %3201 = vmatprep.mubr.bf16.mxu1 %v9617_v5 }
 0x28e   : > { %5105 = vmatprep.mubr.bf16.mxu0 %v4729_v32 }
 0x294   : > { %3202 = vmatmul.mubr.bf16.gmra.mrb[60].mxu1 %v9655_v35 }
 0x295   : > { %5106 = vmatmul.mubr.bf16.gmra.mrb[60].mxu0 %v4728_v62 }
 0x2af   : > { %v2563_v21 = vpop.f32.mrb[0].mxu1 }
 0x2b0   : > { %v2565_v25 = vpop.f32.mrb[1].mxu1 }
 0x2b1   : > { %v2567_v53 = vpop.f32.mrb[2].mxu1 }
 0x2b2   : > { %v2569_v16 = vpop.f32.mrb[3].mxu1 }
 0x2b7   : > { %v2573_v2 = vpop.f32.mrb[4].mxu1 }
 0x2b8   : > { %v2575_v15 = vpop.f32.mrb[5].mxu1 }
 0x2b9   : > { %v2577_v59 = vpop.f32.mrb[6].mxu1 }
 0x2ba   : > { %v2579_v17 = vpop.f32.mrb[7].mxu1 }
 0x2bf   : > { %v9812_v58 = vpop.f32.mrb[8].mxu1 }
 0x2c0   : > { %v9814_v5 = vpop.f32.mrb[9].mxu1 }
 0x2c1   : > { %v9816_v12 = vpop.f32.mrb[10].mxu1 }
 0x2c2   : > { %v9818_v55 = vpop.f32.mrb[11].mxu1 }
 0x2c7   : > { %v9820_v19 = vpop.f32.mrb[12].mxu1 }
 0x2c8   : > { %v9822_v35 = vpop.f32.mrb[13].mxu1 }
 0x2c9   : > { %v9824_v31 = vpop.f32.mrb[14].mxu1 }
 0x2ca   : > { %v9826_v14 = vpop.f32.mrb[15].mxu1 }
 0x2cf   : > { %v9828_v44 = vpop.f32.mrb[16].mxu1 }
 0x2d0   : > { %v9830_v10 = vpop.f32.mrb[17].mxu1 }
 0x2d1   : > { %v9832_v29 = vpop.f32.mrb[18].mxu1 }
 0x2d2   : > { %v9834_v1 = vpop.f32.mrb[19].mxu1 }
 0x2d7   : > { %v9836_v6 = vpop.f32.mrb[20].mxu1 }
 0x2d8   : > { %v9838_v11 = vpop.f32.mrb[21].mxu1 }
 0x2d9   : > { %v9840_v63 = vpop.f32.mrb[22].mxu1 }
 0x2da   : > { %v9842_v46 = vpop.f32.mrb[23].mxu1 }
 0x2df   : > { %v9844_v51 = vpop.f32.mrb[24].mxu1 }
 0x2e0   : > { %v9846_v47 = vpop.f32.mrb[25].mxu1 }
 0x2e1   : > { %v9848_v13 = vpop.f32.mrb[26].mxu1 }
 0x2e2   : > { %v9850_v9 = vpop.f32.mrb[27].mxu1 }
 0x2e7   : > { %v9852_v24 = vpop.f32.mrb[28].mxu1 }
 0x2e8   : > { %v9854_v60 = vpop.f32.mrb[29].mxu1 }
 0x2e9   : > { %v9856_v52 = vpop.f32.mrb[30].mxu1 }
 0x2ea   : > { %v9858_v7 = vpop.f32.mrb[31].mxu1 }
 0x2f0   : > { %v4957_v22 = vpop.f32.mrb[0].mxu0 }
 0x2f1   : > { %v6121_v56 = vadd.f32 %v4957_v22, %v2563_v21  ;;  %v4959_v33 = vpop.f32.mrb[1].mxu0 }
 0x2f2   : > { %v6122_v34 = vadd.f32 %v4959_v33, %v2565_v25  ;;  %v4961_v26 = vpop.f32.mrb[2].mxu0 }
 0x2f3   : > { %v5192_v28 = vadd.f32 %v6121_v56, %v9866_v42  ;;  %v6123_v23 = vadd.f32 %v4961_v26, %v2567_v53  ;;  %v4963_v48 = vpop.f32.mrb[3].mxu0 }
 0x2f4   : > { %v5193_v54 = vadd.f32 %v6122_v34, %v9868_v3  ;;  %v6124_v4 = vadd.f32 %v4963_v48, %v2569_v16 }
 0x2f5   : > { %5256 = vst [vmem:[%s9872_s17] sm:$0xff] %v5192_v28  ;;  %v5194_v45 = vadd.f32 %v6123_v23, %v9866_v42 }
 0x2f6   : > { %5257 = vst [vmem:[%s9872_s17 + $0x8] sm:$0xff] %v5193_v54  ;;  %v5195_v61 = vadd.f32 %v6124_v4, %v9868_v3 }
 0x2f7   : > { %5258 = vst [vmem:[%s9872_s17 + $0x10] sm:$0xff] %v5194_v45 }
 0x2f8   : > { %5259 = vst [vmem:[%s9872_s17 + $0x18] sm:$0xff] %v5195_v61  ;;  %v4967_v41 = vpop.f32.mrb[4].mxu0 }
 0x2f9   : > { %v6125_v39 = vadd.f32 %v4967_v41, %v2573_v2  ;;  %v4969_v40 = vpop.f32.mrb[5].mxu0 }
 0x2fa   : > { %v6126_v20 = vadd.f32 %v4969_v40, %v2575_v15  ;;  %v4971_v43 = vpop.f32.mrb[6].mxu0 }
 0x2fb   : > { %v5196_v49 = vadd.f32 %v6125_v39, %v9866_v42  ;;  %v6127_v57 = vadd.f32 %v4971_v43, %v2577_v59  ;;  %v4973_v32 = vpop.f32.mrb[7].mxu0 }
 0x2fc   : > { %v5197_v0 = vadd.f32 %v6126_v20, %v9868_v3  ;;  %v6128_v37 = vadd.f32 %v4973_v32, %v2579_v17 }
 0x2fd   : > { %5260 = vst [vmem:[%s9872_s17 + $0x20] sm:$0xff] %v5196_v49  ;;  %v5198_v30 = vadd.f32 %v6127_v57, %v9866_v42 }
 0x2fe   : > { %5261 = vst [vmem:[%s9872_s17 + $0x28] sm:$0xff] %v5197_v0  ;;  %v5199_v50 = vadd.f32 %v6128_v37, %v9868_v3 }
 0x2ff   : > { %5262 = vst [vmem:[%s9872_s17 + $0x30] sm:$0xff] %v5198_v30 }
 0x300   : > { %5263 = vst [vmem:[%s9872_s17 + $0x38] sm:$0xff] %v5199_v50  ;;  %v4977_v62 = vpop.f32.mrb[8].mxu0 }
 0x301   : > { %v6129_v21 = vadd.f32 %v4977_v62, %v9812_v58  ;;  %v4979_v25 = vpop.f32.mrb[9].mxu0 }
 0x302   : > { %v6130_v53 = vadd.f32 %v4979_v25, %v9814_v5  ;;  %v4981_v16 = vpop.f32.mrb[10].mxu0 }
 0x303   : > { %v5200_v2 = vadd.f32 %v6129_v21, %v9866_v42  ;;  %v6131_v15 = vadd.f32 %v4981_v16, %v9816_v12  ;;  %v4983_v59 = vpop.f32.mrb[11].mxu0 }
 0x304   : > { %v5201_v17 = vadd.f32 %v6130_v53, %v9868_v3  ;;  %v6132_v38 = vadd.f32 %v4983_v59, %v9818_v55 }
 0x305   : > { %5264 = vst [vmem:[%s9872_s17 + $0x40] sm:$0xff] %v5200_v2  ;;  %v5202_v36 = vadd.f32 %v6131_v15, %v9866_v42 }
 0x306   : > { %5265 = vst [vmem:[%s9872_s17 + $0x48] sm:$0xff] %v5201_v17  ;;  %v5203_v58 = vadd.f32 %v6132_v38, %v9868_v3 }
 0x307   : > { %5266 = vst [vmem:[%s9872_s17 + $0x50] sm:$0xff] %v5202_v36 }
 0x308   : > { %5267 = vst [vmem:[%s9872_s17 + $0x58] sm:$0xff] %v5203_v58  ;;  %v4987_v5 = vpop.f32.mrb[12].mxu0 }
 0x309   : > { %v6133_v12 = vadd.f32 %v4987_v5, %v9820_v19  ;;  %v4989_v27 = vpop.f32.mrb[13].mxu0 }
 0x30a   : > { %v6134_v18 = vadd.f32 %v4989_v27, %v9822_v35  ;;  %v4991_v8 = vpop.f32.mrb[14].mxu0 }
 0x30b   : > { %v5204_v55 = vadd.f32 %v6133_v12, %v9866_v42  ;;  %v6135_v22 = vadd.f32 %v4991_v8, %v9824_v31  ;;  %v4993_v56 = vpop.f32.mrb[15].mxu0 }
 0x30c   : > { %v5205_v33 = vadd.f32 %v6134_v18, %v9868_v3  ;;  %v6136_v34 = vadd.f32 %v4993_v56, %v9826_v14 }
 0x30d   : > { %5268 = vst [vmem:[%s9872_s17 + $0x60] sm:$0xff] %v5204_v55  ;;  %v5206_v26 = vadd.f32 %v6135_v22, %v9866_v42 }
 0x30e   : > { %5269 = vst [vmem:[%s9872_s17 + $0x68] sm:$0xff] %v5205_v33  ;;  %v5207_v19 = vadd.f32 %v6136_v34, %v9868_v3 }
 0x30f   : > { %5270 = vst [vmem:[%s9872_s17 + $0x70] sm:$0xff] %v5206_v26 }
 0x310   : > { %5271 = vst [vmem:[%s9872_s17 + $0x78] sm:$0xff] %v5207_v19  ;;  %v4997_v35 = vpop.f32.mrb[16].mxu0 }
 0x311   : > { %v6137_v31 = vadd.f32 %v4997_v35, %v9828_v44  ;;  %v4999_v28 = vpop.f32.mrb[17].mxu0 }
 0x312   : > { %v6138_v23 = vadd.f32 %v4999_v28, %v9830_v10  ;;  %v5001_v48 = vpop.f32.mrb[18].mxu0 }
 0x313   : > { %v5208_v14 = vadd.f32 %v6137_v31, %v9866_v42  ;;  %v6139_v54 = vadd.f32 %v5001_v48, %v9832_v29  ;;  %v5003_v4 = vpop.f32.mrb[19].mxu0 }
 0x314   : > { %v5209_v45 = vadd.f32 %v6138_v23, %v9868_v3  ;;  %v6140_v61 = vadd.f32 %v5003_v4, %v9834_v1 }
 0x315   : > { %5272 = vst [vmem:[%s9872_s17 + $0x80] sm:$0xff] %v5208_v14  ;;  %v5210_v41 = vadd.f32 %v6139_v54, %v9866_v42 }
 0x316   : > { %5273 = vst [vmem:[%s9872_s17 + $0x88] sm:$0xff] %v5209_v45  ;;  %v5211_v44 = vadd.f32 %v6140_v61, %v9868_v3 }
 0x317   : > { %5274 = vst [vmem:[%s9872_s17 + $0x90] sm:$0xff] %v5210_v41 }
 0x318   : > { %5275 = vst [vmem:[%s9872_s17 + $0x98] sm:$0xff] %v5211_v44  ;;  %v5007_v10 = vpop.f32.mrb[20].mxu0 }
 0x319   : > { %v6141_v29 = vadd.f32 %v5007_v10, %v9836_v6  ;;  %v5009_v39 = vpop.f32.mrb[21].mxu0 }
 0x31a   : > { %v6142_v40 = vadd.f32 %v5009_v39, %v9838_v11  ;;  %v5011_v20 = vpop.f32.mrb[22].mxu0 }
 0x31b   : > { %v5212_v1 = vadd.f32 %v6141_v29, %v9866_v42  ;;  %v6143_v43 = vadd.f32 %v5011_v20, %v9840_v63  ;;  %v5013_v49 = vpop.f32.mrb[23].mxu0 }
 0x31c   : > { %v5213_v57 = vadd.f32 %v6142_v40, %v9868_v3  ;;  %v6144_v32 = vadd.f32 %v5013_v49, %v9842_v46 }
 0x31d   : > { %5276 = vst [vmem:[%s9872_s17 + $0xa0] sm:$0xff] %v5212_v1  ;;  %v5214_v0 = vadd.f32 %v6143_v43, %v9866_v42 }
 0x31e   : > { %5277 = vst [vmem:[%s9872_s17 + $0xa8] sm:$0xff] %v5213_v57  ;;  %v5215_v6 = vadd.f32 %v6144_v32, %v9868_v3 }
 0x31f   : > { %5278 = vst [vmem:[%s9872_s17 + $0xb0] sm:$0xff] %v5214_v0 }
 0x320   : > { %5279 = vst [vmem:[%s9872_s17 + $0xb8] sm:$0xff] %v5215_v6  ;;  %v5017_v11 = vpop.f32.mrb[24].mxu0 }
 0x321   : > { %v6145_v63 = vadd.f32 %v5017_v11, %v9844_v51  ;;  %v5019_v37 = vpop.f32.mrb[25].mxu0 }
 0x322   : > { %v6146_v30 = vadd.f32 %v5019_v37, %v9846_v47  ;;  %v5021_v50 = vpop.f32.mrb[26].mxu0 }
 0x323   : > { %v5216_v46 = vadd.f32 %v6145_v63, %v9866_v42  ;;  %v6147_v62 = vadd.f32 %v5021_v50, %v9848_v13  ;;  %v5023_v21 = vpop.f32.mrb[27].mxu0 }
 0x324   : > { %v5217_v25 = vadd.f32 %v6146_v30, %v9868_v3  ;;  %v6148_v53 = vadd.f32 %v5023_v21, %v9850_v9 }
 0x325   : > { %5280 = vst [vmem:[%s9872_s17 + $0xc0] sm:$0xff] %v5216_v46  ;;  %v5218_v16 = vadd.f32 %v6147_v62, %v9866_v42 }
 0x326   : > { %5281 = vst [vmem:[%s9872_s17 + $0xc8] sm:$0xff] %v5217_v25  ;;  %v5219_v51 = vadd.f32 %v6148_v53, %v9868_v3 }
 0x327   : > { %5282 = vst [vmem:[%s9872_s17 + $0xd0] sm:$0xff] %v5218_v16 }
 0x328   : > { %5283 = vst [vmem:[%s9872_s17 + $0xd8] sm:$0xff] %v5219_v51  ;;  %v5027_v47 = vpop.f32.mrb[28].mxu0 }
 0x329   : > { %v6149_v13 = vadd.f32 %v5027_v47, %v9852_v24  ;;  %v5029_v2 = vpop.f32.mrb[29].mxu0 }
 0x32a   : > { %v6150_v15 = vadd.f32 %v5029_v2, %v9854_v60  ;;  %v5031_v59 = vpop.f32.mrb[30].mxu0 }
 0x32b   : > { %v5220_v9 = vadd.f32 %v6149_v13, %v9866_v42  ;;  %v6151_v17 = vadd.f32 %v5031_v59, %v9856_v52  ;;  %v5033_v38 = vpop.f32.mrb[31].mxu0 }
 0x32c   : > { %v5221_v36 = vadd.f32 %v6150_v15, %v9868_v3  ;;  %v6152_v58 = vadd.f32 %v5033_v38, %v9858_v7 }
 0x32d   : > { %5284 = vst [vmem:[%s9872_s17 + $0xe0] sm:$0xff] %v5220_v9  ;;  %v5222_v5 = vadd.f32 %v6151_v17, %v9866_v42 }
 0x32e   : > { %5285 = vst [vmem:[%s9872_s17 + $0xe8] sm:$0xff] %v5221_v36  ;;  %v5223_v12 = vadd.f32 %v6152_v58, %v9868_v3 }
 0x32f   : > { %5286 = vst [vmem:[%s9872_s17 + $0xf0] sm:$0xff] %v5222_v5  ;;  %v3133_v24 = vpop.f32.mrb[32].mxu1 }
 0x330   : > { %5287 = vst [vmem:[%s9872_s17 + $0xf8] sm:$0xff] %v5223_v12  ;;  %v5037_v60 = vpop.f32.mrb[32].mxu0  ;;  %v3135_v52 = vpop.f32.mrb[33].mxu1 }
 0x331   : > { %v6153_v27 = vadd.f32 %v5037_v60, %v3133_v24  ;;  %v5039_v18 = vpop.f32.mrb[33].mxu0  ;;  %v3137_v55 = vpop.f32.mrb[34].mxu1 }
 0x332   : > { %v6154_v8 = vadd.f32 %v5039_v18, %v3135_v52  ;;  %v5041_v7 = vpop.f32.mrb[34].mxu0  ;;  %v3139_v33 = vpop.f32.mrb[35].mxu1 }
 0x333   : > { %v5224_v22 = vadd.f32 %v6153_v27, %v9866_v42  ;;  %v6155_v56 = vadd.f32 %v5041_v7, %v3137_v55  ;;  %v5043_v34 = vpop.f32.mrb[35].mxu0 }
 0x334   : > { %v5225_v26 = vadd.f32 %v6154_v8, %v9868_v3  ;;  %v6156_v19 = vadd.f32 %v5043_v34, %v3139_v33 }
 0x335   : > { %5288 = vst [vmem:[%s9872_s17 + $0x100] sm:$0xff] %v5224_v22  ;;  %v5226_v35 = vadd.f32 %v6155_v56, %v9866_v42 }
 0x336   : > { %5289 = vst [vmem:[%s9872_s17 + $0x108] sm:$0xff] %v5225_v26  ;;  %v5227_v31 = vadd.f32 %v6156_v19, %v9868_v3 }
 0x337   : > { %5290 = vst [vmem:[%s9872_s17 + $0x110] sm:$0xff] %v5226_v35  ;;  %v3143_v28 = vpop.f32.mrb[36].mxu1 }
 0x338   : > { %5291 = vst [vmem:[%s9872_s17 + $0x118] sm:$0xff] %v5227_v31  ;;  %v5047_v23 = vpop.f32.mrb[36].mxu0  ;;  %v3145_v14 = vpop.f32.mrb[37].mxu1 }
 0x339   : > { %v6157_v48 = vadd.f32 %v5047_v23, %v3143_v28  ;;  %v5049_v54 = vpop.f32.mrb[37].mxu0  ;;  %v3147_v45 = vpop.f32.mrb[38].mxu1 }
 0x33a   : > { %v6158_v4 = vadd.f32 %v5049_v54, %v3145_v14  ;;  %v5051_v61 = vpop.f32.mrb[38].mxu0  ;;  %v3149_v10 = vpop.f32.mrb[39].mxu1 }
 0x33b   : > { %v5228_v41 = vadd.f32 %v6157_v48, %v9866_v42  ;;  %v6159_v44 = vadd.f32 %v5051_v61, %v3147_v45  ;;  %v5053_v29 = vpop.f32.mrb[39].mxu0 }
 0x33c   : > { %v5229_v39 = vadd.f32 %v6158_v4, %v9868_v3  ;;  %v6160_v40 = vadd.f32 %v5053_v29, %v3149_v10 }
 0x33d   : > { %5292 = vst [vmem:[%s9872_s17 + $0x120] sm:$0xff] %v5228_v41  ;;  %v5230_v20 = vadd.f32 %v6159_v44, %v9866_v42 }
 0x33e   : > { %5293 = vst [vmem:[%s9872_s17 + $0x128] sm:$0xff] %v5229_v39  ;;  %v5231_v1 = vadd.f32 %v6160_v40, %v9868_v3 }
 0x33f   : > { %5294 = vst [vmem:[%s9872_s17 + $0x130] sm:$0xff] %v5230_v20  ;;  %v3153_v43 = vpop.f32.mrb[40].mxu1 }
 0x340   : > { %5295 = vst [vmem:[%s9872_s17 + $0x138] sm:$0xff] %v5231_v1  ;;  %v5057_v49 = vpop.f32.mrb[40].mxu0  ;;  %v3155_v32 = vpop.f32.mrb[41].mxu1 }
 0x341   : > { %v6161_v57 = vadd.f32 %v5057_v49, %v3153_v43  ;;  %v5059_v0 = vpop.f32.mrb[41].mxu0  ;;  %v3157_v11 = vpop.f32.mrb[42].mxu1 }
 0x342   : > { %v6162_v6 = vadd.f32 %v5059_v0, %v3155_v32  ;;  %v5061_v63 = vpop.f32.mrb[42].mxu0  ;;  %v3159_v50 = vpop.f32.mrb[43].mxu1 }
 0x343   : > { %v5232_v37 = vadd.f32 %v6161_v57, %v9866_v42  ;;  %v6163_v30 = vadd.f32 %v5061_v63, %v3157_v11  ;;  %v5063_v46 = vpop.f32.mrb[43].mxu0 }
 0x344   : > { %v5233_v62 = vadd.f32 %v6162_v6, %v9868_v3  ;;  %v6164_v21 = vadd.f32 %v5063_v46, %v3159_v50 }
 0x345   : > { %5296 = vst [vmem:[%s9872_s17 + $0x140] sm:$0xff] %v5232_v37  ;;  %v5234_v25 = vadd.f32 %v6163_v30, %v9866_v42 }
 0x346   : > { %5297 = vst [vmem:[%s9872_s17 + $0x148] sm:$0xff] %v5233_v62  ;;  %v5235_v53 = vadd.f32 %v6164_v21, %v9868_v3 }
 0x347   : > { %5298 = vst [vmem:[%s9872_s17 + $0x150] sm:$0xff] %v5234_v25  ;;  %v3163_v16 = vpop.f32.mrb[44].mxu1 }
 0x348   : > { %5299 = vst [vmem:[%s9872_s17 + $0x158] sm:$0xff] %v5235_v53  ;;  %v5067_v51 = vpop.f32.mrb[44].mxu0  ;;  %v3165_v13 = vpop.f32.mrb[45].mxu1 }
 0x349   : > { %v6165_v47 = vadd.f32 %v5067_v51, %v3163_v16  ;;  %v5069_v2 = vpop.f32.mrb[45].mxu0  ;;  %v3167_v59 = vpop.f32.mrb[46].mxu1 }
 0x34a   : > { %v6166_v15 = vadd.f32 %v5069_v2, %v3165_v13  ;;  %v5071_v9 = vpop.f32.mrb[46].mxu0  ;;  %v3169_v36 = vpop.f32.mrb[47].mxu1 }
 0x34b   : > { %v5236_v17 = vadd.f32 %v6165_v47, %v9866_v42  ;;  %v6167_v38 = vadd.f32 %v5071_v9, %v3167_v59  ;;  %v5073_v58 = vpop.f32.mrb[47].mxu0 }
 0x34c   : > { %v5237_v5 = vadd.f32 %v6166_v15, %v9868_v3  ;;  %v6168_v12 = vadd.f32 %v5073_v58, %v3169_v36 }
 0x34d   : > { %5300 = vst [vmem:[%s9872_s17 + $0x160] sm:$0xff] %v5236_v17  ;;  %v5238_v24 = vadd.f32 %v6167_v38, %v9866_v42 }
 0x34e   : > { %5301 = vst [vmem:[%s9872_s17 + $0x168] sm:$0xff] %v5237_v5  ;;  %v5239_v60 = vadd.f32 %v6168_v12, %v9868_v3 }
 0x34f   : > { %5302 = vst [vmem:[%s9872_s17 + $0x170] sm:$0xff] %v5238_v24  ;;  %v3173_v27 = vpop.f32.mrb[48].mxu1 }
 0x350   : > { %5303 = vst [vmem:[%s9872_s17 + $0x178] sm:$0xff] %v5239_v60  ;;  %v5077_v52 = vpop.f32.mrb[48].mxu0  ;;  %v3175_v8 = vpop.f32.mrb[49].mxu1 }
 0x351   : > { %v6169_v18 = vadd.f32 %v5077_v52, %v3173_v27  ;;  %v5079_v55 = vpop.f32.mrb[49].mxu0  ;;  %v3177_v22 = vpop.f32.mrb[50].mxu1 }
 0x352   : > { %v6170_v7 = vadd.f32 %v5079_v55, %v3175_v8  ;;  %v5081_v56 = vpop.f32.mrb[50].mxu0  ;;  %v3179_v26 = vpop.f32.mrb[51].mxu1 }
 0x353   : > { %v5240_v33 = vadd.f32 %v6169_v18, %v9866_v42  ;;  %v6171_v34 = vadd.f32 %v5081_v56, %v3177_v22  ;;  %v5083_v19 = vpop.f32.mrb[51].mxu0 }
 0x354   : > { %v5241_v35 = vadd.f32 %v6170_v7, %v9868_v3  ;;  %v6172_v31 = vadd.f32 %v5083_v19, %v3179_v26 }
 0x355   : > { %5304 = vst [vmem:[%s9872_s17 + $0x180] sm:$0xff] %v5240_v33  ;;  %v5242_v28 = vadd.f32 %v6171_v34, %v9866_v42 }
 0x356   : > { %5305 = vst [vmem:[%s9872_s17 + $0x188] sm:$0xff] %v5241_v35  ;;  %v5243_v23 = vadd.f32 %v6172_v31, %v9868_v3 }
 0x357   : > { %5306 = vst [vmem:[%s9872_s17 + $0x190] sm:$0xff] %v5242_v28  ;;  %v3183_v48 = vpop.f32.mrb[52].mxu1 }
 0x358   : > { %5307 = vst [vmem:[%s9872_s17 + $0x198] sm:$0xff] %v5243_v23  ;;  %v5087_v14 = vpop.f32.mrb[52].mxu0  ;;  %v3185_v4 = vpop.f32.mrb[53].mxu1 }
 0x359   : > { %v6173_v54 = vadd.f32 %v5087_v14, %v3183_v48  ;;  %v5089_v45 = vpop.f32.mrb[53].mxu0  ;;  %v3187_v41 = vpop.f32.mrb[54].mxu1 }
 0x35a   : > { %v6174_v61 = vadd.f32 %v5089_v45, %v3185_v4  ;;  %v5091_v44 = vpop.f32.mrb[54].mxu0  ;;  %v3189_v39 = vpop.f32.mrb[55].mxu1 }
 0x35b   : > { %v5244_v10 = vadd.f32 %v6173_v54, %v9866_v42  ;;  %v6175_v29 = vadd.f32 %v5091_v44, %v3187_v41  ;;  %v5093_v40 = vpop.f32.mrb[55].mxu0 }
 0x35c   : > { %v5245_v20 = vadd.f32 %v6174_v61, %v9868_v3  ;;  %v6176_v1 = vadd.f32 %v5093_v40, %v3189_v39 }
 0x35d   : > { %5308 = vst [vmem:[%s9872_s17 + $0x1a0] sm:$0xff] %v5244_v10  ;;  %v5246_v43 = vadd.f32 %v6175_v29, %v9866_v42 }
 0x35e   : > { %5309 = vst [vmem:[%s9872_s17 + $0x1a8] sm:$0xff] %v5245_v20  ;;  %v5247_v49 = vadd.f32 %v6176_v1, %v9868_v3 }
 0x35f   : > { %5310 = vst [vmem:[%s9872_s17 + $0x1b0] sm:$0xff] %v5246_v43  ;;  %v3193_v57 = vpop.f32.mrb[56].mxu1 }
 0x360   : > { %5311 = vst [vmem:[%s9872_s17 + $0x1b8] sm:$0xff] %v5247_v49  ;;  %v5097_v32 = vpop.f32.mrb[56].mxu0  ;;  %v3195_v6 = vpop.f32.mrb[57].mxu1 }
 0x361   : > { %v6177_v0 = vadd.f32 %v5097_v32, %v3193_v57  ;;  %v5099_v11 = vpop.f32.mrb[57].mxu0  ;;  %v3197_v37 = vpop.f32.mrb[58].mxu1 }
 0x362   : > { %v6178_v63 = vadd.f32 %v5099_v11, %v3195_v6  ;;  %v5101_v30 = vpop.f32.mrb[58].mxu0  ;;  %v3199_v62 = vpop.f32.mrb[59].mxu1 }
 0x363   : > { %v5248_v50 = vadd.f32 %v6177_v0, %v9866_v42  ;;  %v6179_v46 = vadd.f32 %v5101_v30, %v3197_v37  ;;  %v5103_v21 = vpop.f32.mrb[59].mxu0 }
 0x364   : > { %v5249_v25 = vadd.f32 %v6178_v63, %v9868_v3  ;;  %v6180_v53 = vadd.f32 %v5103_v21, %v3199_v62 }
 0x365   : > { %5312 = vst [vmem:[%s9872_s17 + $0x1c0] sm:$0xff] %v5248_v50  ;;  %v5250_v16 = vadd.f32 %v6179_v46, %v9866_v42 }
 0x366   : > { %5313 = vst [vmem:[%s9872_s17 + $0x1c8] sm:$0xff] %v5249_v25  ;;  %v5251_v51 = vadd.f32 %v6180_v53, %v9868_v3 }
 0x367   : > { %5314 = vst [vmem:[%s9872_s17 + $0x1d0] sm:$0xff] %v5250_v16  ;;  %v3203_v47 = vpop.f32.mrb[60].mxu1 }
 0x368   : > { %5315 = vst [vmem:[%s9872_s17 + $0x1d8] sm:$0xff] %v5251_v51  ;;  %v5107_v13 = vpop.f32.mrb[60].mxu0  ;;  %v3205_v15 = vpop.f32.mrb[61].mxu1 }
 0x369   : > { %v6181_v2 = vadd.f32 %v5107_v13, %v3203_v47  ;;  %v5109_v59 = vpop.f32.mrb[61].mxu0  ;;  %v3207_v17 = vpop.f32.mrb[62].mxu1 }
 0x36a   : > { %v6182_v9 = vadd.f32 %v5109_v59, %v3205_v15  ;;  %v5111_v38 = vpop.f32.mrb[62].mxu0  ;;  %v3209_v5 = vpop.f32.mrb[63].mxu1 }
 0x36b   : > { %v5252_v36 = vadd.f32 %v6181_v2, %v9866_v42  ;;  %v6183_v58 = vadd.f32 %v5111_v38, %v3207_v17  ;;  %v5113_v12 = vpop.f32.mrb[63].mxu0 }
 0x36c   : > { %v5253_v24 = vadd.f32 %v6182_v9, %v9868_v3  ;;  %v6184_v60 = vadd.f32 %v5113_v12, %v3209_v5 }
 0x36d   : > { %5316 = vst [vmem:[%s9872_s17 + $0x1e0] sm:$0xff] %v5252_v36  ;;  %v5254_v27 = vadd.f32 %v6183_v58, %v9866_v42 }
 0x36e   : > { %5317 = vst [vmem:[%s9872_s17 + $0x1e8] sm:$0xff] %v5253_v24  ;;  %v5255_v52 = vadd.f32 %v6184_v60, %v9868_v3 }
 0x36f   : > { %5318 = vst [vmem:[%s9872_s17 + $0x1f0] sm:$0xff] %v5254_v27 }
 0x370   : > { %5319 = vst [vmem:[%s9872_s17 + $0x1f8] sm:$0xff] %v5255_v52 }
 0x371   : > { %7245 = shalt.err (!%p7242_p10)
}
 0x372   : > { %s7246_s8 = scalar_lea.hbm %s10026_s15, 8192  ;;  %s7250_s17 = scalar_lea.hbm %s10093_s5, 65536 }
 0x373   : > { %p7247_p11 = scmp.ne.s32.totalorder %s10026_s15, %s7246_s8  ;;  %p7251_p0 = scmp.lt.u32.totalorder %s10026_s15, %s10093_s5 }
 0x374   : > { %p7252_p1 = scmp.lt.u32.totalorder %s7250_s17, %s7246_s8  ;;  %p7254_p4 = scmp.lt.u32.totalorder %s7246_s8, %s10026_s15 }
 0x375   : > { %p7248_p12 = pnand %p7247_p11, %p7412_p3 }
 0x376   : > { %p7253_p2 = por %p7252_p1, %p7251_p0 }
 0x377   : > { %p7249_p13 = pneg %p7248_p12 }
 0x378   : > { %p7255_p5 = por %p7254_p4, %p7253_p2 }
 0x37a   : > { %p7256_p6 = pnand %p7255_p5, %p7249_p13 }
 0x37c   : > { %7259 = shalt.err (!%p7256_p6)
}
 0x37d   : > { %s7329_s24 = smov 256   ;;  %s7330_s21 = smov 16  }
 0x37e   : > { %6637 = dma.vmem_to_hbm [thread:$0]  (%p7412_p3), %s10028_s22, 8192, %s10026_s15, %s10036_s27, %s7329_s24, %s7329_s24, %s7330_s21  }
 0x37f PF: > { %p6643_p7 = scmp.ge.s32.totalorder %s7326_s25, 2  ;;  %s5352_s10 = sand.u32 1, %s7298_s18  }
 0x380   : > { %s5353_s14 = scalar_lea.sflag [#allocation3], %s5352_s10 }
 0x381   : > { %p6640_p9 = pnand %p6643_p7, %p7421_p8 }
 0x383   : > { %7293 = dma.done.wait (!%p6640_p9), %s5353_s14, 8192  }
 0x384   : > { %7295 = vsyncadd (!%p6640_p9), %s5353_s14, 4294959104  ;;  %s18_s25 = sadd.s32 1, %s7326_s25   ;;  %s10418_s22 = sld [smem:[#allocation5_spill]] }
 0x385   : > { %p15_p10 = scmp.ge.s32.totalorder %s18_s25, 10   ;;  %s10419_s6 = sld [smem:[#allocation6_spill]] }
 0x386   : > { %s10420_s24 = sld [smem:[#allocation7_spill]]  ;;  %s10421_s18 = smov %s7302_s19 }
 0x387   : > { %s10422_s19 = smov %s7306_s20  ;;  %s10423_s20 = smov %s7430_s11 }
 0x388   : > { %s10424_s21 = smov %s7318_s23  ;;  %17 = sbr.rel (!%p15_p10) target bundleno = 5 (0x5), region = 89 }
 0x38b   : > { %s10425_s23 = smov %s10419_s6 }
 0x38f   :  { %5358 = vsyncpa [#allocation3], 1 }
 0x390   :  { %5360 = vsyncpa [#allocation3 + $0x1], 1 }

</bundles_post_ra>
